<compile_context>
chip_gen: v6e
topology: v6e:2x2x1
jax: 0.10.0
libtpu: 0.0.40
codegen_flags: <defaults>
</compile_context>

<pallas_src>
import jax
import jax.numpy as jnp
from jax.experimental import pallas as pl
from jax.experimental.pallas import tpu as pltpu

STATE_DIM = 4        # CartPole-v1 observation_space.shape[0]
HIDDEN_DIM = 128
ACTION_DIM = 2       # CartPole-v1 action_space.n
H4 = HIDDEN_DIM * 4  # 512
H2 = HIDDEN_DIM * 2  # 256
OUT_PAD = 128        # lane-dense padded output width (>= ACTION_DIM)

MAX_BATCH_TILE = 512   # big tiles amortize per-grid-step overhead (v5e/v6e)
MIN_SPLIT_TILE = 128   # keep >=2 grid steps once the batch allows it (v7x)

DOT_DTYPE = jnp.bfloat16  # matmul input dtype (f32 MXU accumulation always)


def _elementwise_dtype():
    """bf16 bias/ReLU/skip on chips with a bf16 VPU (v6e/v7x), f32 otherwise."""
    try:
        kind = jax.devices()[0].device_kind.lower()
    except Exception:
        return jnp.float32
    for tag in ("v2", "v3", "v4", "v5"):   # no bf16 VALU on these generations
        if tag in kind:
            return jnp.float32
    return jnp.bfloat16


EW_DTYPE = _elementwise_dtype()


def _round_up(x, m):
    return ((x + m - 1) // m) * m


def _choose_batch_tile(batch):
    """Return (padded_batch, tile).

    tile is a multiple of 16 (so the kernel's two row-halves stay sublane
    aligned).  We take cdiv(b_pad, 512) tiles, but force at least two grid
    steps once the batch reaches 256 rows so both v7x TensorCores get work
    (costs only ~0.35us/step on single-TC chips).  The tile is the smallest
    16-multiple covering the batch -> minimal zero-row padding waste.
    """
    b_pad = _round_up(max(batch, 1), 8)
    n_tiles = max(-(-b_pad // MAX_BATCH_TILE), 1)
    if n_tiles < 2 and b_pad >= 2 * MIN_SPLIT_TILE:
        n_tiles = 2
    tile = _round_up(-(-b_pad // n_tiles), 16)
    n_tiles = -(-b_pad // tile)
    return tile * n_tiles, tile


def qnet_kernel(x_ref,
                w1_ref, b1_ref,
                wr1_ref, br1_ref,
                wr2_ref, br2_ref,
                w3_ref, b3_ref,
                w4_ref, b4_ref,
                out_ref):
    f32 = jnp.float32
    ew = EW_DTYPE

    tile = x_ref.shape[0]
    n_sub = 2 if (tile % 16 == 0 and tile >= 16) else 1
    sub = tile // n_sub

    # Hoist resident parameters (loaded once per grid step, shared by both
    # sub-tile chains).
    w1 = w1_ref[...].astype(f32)        # (4, 512): tiny, used by VPU FMAs
    b1 = b1_ref[...]                    # f32 (1, 512)
    wr1 = wr1_ref[...]
    br1 = br1_ref[...].astype(ew)
    wr2 = wr2_ref[...]
    br2 = br2_ref[...].astype(ew)
    w3 = w3_ref[...]
    b3 = b3_ref[...].astype(ew)
    w4 = w4_ref[...]
    b4 = b4_ref[...]                    # f32 (1, 128), final bias add in f32

    # Two independent row-half chains: the scheduler overlaps one half's MXU
    # matmuls with the other half's VPU bias/ReLU/skip-add.
    for s in range(n_sub):
        rows = pl.ds(s * sub, sub)
        x = x_ref[rows, :].astype(f32)                        # (sub, 4)

        # qnet1: K=4 contraction as 4 broadcast VPU FMAs (no MXU pass).
        h = b1
        for k in range(STATE_DIM):
            h = h + x[:, k:k + 1] * w1[k:k + 1, :]
        h = jnp.maximum(h, 0.0).astype(ew)                    # (sub, 512)

        # residual block: Linear + ReLU + Linear, then skip-add.
        r = jnp.dot(h.astype(DOT_DTYPE), wr1,
                    preferred_element_type=f32).astype(ew) + br1
        r = jnp.maximum(r, 0.0)
        r = jnp.dot(r.astype(DOT_DTYPE), wr2,
                    preferred_element_type=f32).astype(ew) + br2
        h = r + h

        # qnet3: Linear + ReLU + Linear (last layer zero-padded to OUT_PAD).
        g = jnp.dot(h.astype(DOT_DTYPE), w3,
                    preferred_element_type=f32).astype(ew) + b3
        g = jnp.maximum(g, 0.0)
        q = jnp.dot(g.astype(DOT_DTYPE), w4,
                    preferred_element_type=f32) + b4          # f32 (sub, 128)

        out_ref[rows, :] = q.astype(out_ref.dtype)


def qnet_forward(x, params):
    (w1, b1, wr1, br1, wr2, br2, w3, b3, w4p, b4p) = params
    B = x.shape[0]
    b_pad, tile = _choose_batch_tile(B)
    if b_pad != B:
        x = jnp.pad(x, ((0, b_pad - B), (0, 0)))

    def full_spec(arr):
        # whole (small) parameter resident in VMEM every grid step
        return pl.BlockSpec(arr.shape, lambda i: (0,) * arr.ndim)

    grid = (b_pad // tile,)
    out = pl.pallas_call(
        qnet_kernel,
        out_shape=jax.ShapeDtypeStruct((b_pad, OUT_PAD), jnp.bfloat16),
        grid_spec=pltpu.PrefetchScalarGridSpec(
            num_scalar_prefetch=0,
            grid=grid,
            in_specs=[
                pl.BlockSpec((tile, STATE_DIM), lambda i: (i, 0)),
                full_spec(w1), full_spec(b1),
                full_spec(wr1), full_spec(br1),
                full_spec(wr2), full_spec(br2),
                full_spec(w3), full_spec(b3),
                full_spec(w4p), full_spec(b4p),
            ],
            out_specs=pl.BlockSpec((tile, OUT_PAD), lambda i: (i, 0)),
        ),
        compiler_params=pltpu.CompilerParams(
            dimension_semantics=("parallel",)),
    )(x, w1, b1, wr1, br1, wr2, br2, w3, b3, w4p, b4p)

    return out[:B, :ACTION_DIM].astype(jnp.float32)


def init_params(key):
    """Deterministic synthetic init (fan-in scaled normal).

    Weights are (in, out) and stored in bf16; biases stay f32.  The final
    layer is zero-padded to OUT_PAD output features for a lane-dense store.
    """
    ks = jax.random.split(key, 10)

    def lin(kw, kb, fan_in, fan_out):
        scale = 1.0 / jnp.sqrt(jnp.float32(fan_in))
        w = jax.random.normal(kw, (fan_in, fan_out), jnp.float32) * scale
        b = jax.random.normal(kb, (1, fan_out), jnp.float32) * scale
        return w.astype(jnp.bfloat16), b

    w1, b1 = lin(ks[0], ks[1], STATE_DIM, H4)
    wr1, br1 = lin(ks[2], ks[3], H4, H4)
    wr2, br2 = lin(ks[4], ks[5], H4, H4)
    w3, b3 = lin(ks[6], ks[7], H4, H2)
    w4, b4 = lin(ks[8], ks[9], H2, ACTION_DIM)

    # zero-pad last layer to OUT_PAD lanes (no extra MXU cost, unmasked stores)
    w4p = jnp.zeros((H2, OUT_PAD), jnp.bfloat16).at[:, :ACTION_DIM].set(w4)
    b4p = jnp.zeros((1, OUT_PAD), jnp.float32).at[:, :ACTION_DIM].set(b4)
    return (w1, b1, wr1, br1, wr2, br2, w3, b3, w4p, b4p)


def qnet_ref(x, params):
    """Pure-JAX reference mirroring the kernel math exactly."""
    (w1, b1, wr1, br1, wr2, br2, w3, b3, w4p, b4p) = params
    f32, ew, dot = jnp.float32, EW_DTYPE, DOT_DTYPE
    h = jnp.maximum(x.astype(f32) @ w1.astype(f32) + b1, 0.0).astype(ew)
    r = jnp.maximum(
        jnp.dot(h.astype(dot), wr1, preferred_element_type=f32).astype(ew)
        + br1.astype(ew), 0.0)
    r = (jnp.dot(r.astype(dot), wr2, preferred_element_type=f32).astype(ew)
         + br2.astype(ew))
    h = r + h
    g = jnp.maximum(
        jnp.dot(h.astype(dot), w3, preferred_element_type=f32).astype(ew)
        + b3.astype(ew), 0.0)
    q = jnp.dot(g.astype(dot), w4p, preferred_element_type=f32) + b4p
    q = q.astype(jnp.bfloat16).astype(jnp.float32)   # mirror bf16 output store
    return q[:, :ACTION_DIM]


if __name__ == "__main__":
    key = jax.random.PRNGKey(0)
    kx, kp = jax.random.split(key)

    B = 5  # deliberately not a multiple of 8: exercises wrapper-side padding
    x = jax.random.normal(kx, (B, STATE_DIM), jnp.float32)
    params = init_params(kp)

    out = qnet_forward(x, params)
    out = jax.block_until_ready(out)

    ref = qnet_ref(x, params)
    assert out.shape == (B, ACTION_DIM)
    # bf16 matmul inputs / (on v6e+) bf16 elementwise -> slightly loose tol.
    assert jnp.allclose(out, ref, atol=3e-2, rtol=3e-2), "mismatch vs JAX reference"

    print("KERNEL_OK")
</pallas_src>

<mosaic_0001>
module attributes {stable_mosaic.version = 11 : i64} {
  func.func @qnet_kernel(%arg0: i32, %arg1: memref<16x4xf32, #tpu.memory_space<vmem>>, %arg2: memref<4x512xbf16, #tpu.memory_space<vmem>>, %arg3: memref<1x512xf32, #tpu.memory_space<vmem>>, %arg4: memref<512x512xbf16, #tpu.memory_space<vmem>>, %arg5: memref<1x512xf32, #tpu.memory_space<vmem>>, %arg6: memref<512x512xbf16, #tpu.memory_space<vmem>>, %arg7: memref<1x512xf32, #tpu.memory_space<vmem>>, %arg8: memref<512x256xbf16, #tpu.memory_space<vmem>>, %arg9: memref<1x256xf32, #tpu.memory_space<vmem>>, %arg10: memref<256x128xbf16, #tpu.memory_space<vmem>>, %arg11: memref<1x128xf32, #tpu.memory_space<vmem>>, %arg12: memref<16x128xbf16, #tpu.memory_space<vmem>>) attributes {dimension_semantics = [#tpu.dimension_semantics<parallel>], iteration_bounds = array<i64: 1>, scalar_prefetch = 0 : i64, scratch_operands = 0 : i64, tpu.core_type = #tpu.core_type<tc>, window_params = [{transform_indices = @transform_0, window_bounds = array<i64: 16, 4>}, {pipeline_mode = #tpu.pipeline_mode<synchronous>, transform_indices = @transform_1, window_bounds = array<i64: 4, 512>}, {pipeline_mode = #tpu.pipeline_mode<synchronous>, transform_indices = @transform_2, window_bounds = array<i64: 1, 512>}, {pipeline_mode = #tpu.pipeline_mode<synchronous>, transform_indices = @transform_3, window_bounds = array<i64: 512, 512>}, {pipeline_mode = #tpu.pipeline_mode<synchronous>, transform_indices = @transform_4, window_bounds = array<i64: 1, 512>}, {pipeline_mode = #tpu.pipeline_mode<synchronous>, transform_indices = @transform_5, window_bounds = array<i64: 512, 512>}, {pipeline_mode = #tpu.pipeline_mode<synchronous>, transform_indices = @transform_6, window_bounds = array<i64: 1, 512>}, {pipeline_mode = #tpu.pipeline_mode<synchronous>, transform_indices = @transform_7, window_bounds = array<i64: 512, 256>}, {pipeline_mode = #tpu.pipeline_mode<synchronous>, transform_indices = @transform_8, window_bounds = array<i64: 1, 256>}, {pipeline_mode = #tpu.pipeline_mode<synchronous>, transform_indices = @transform_9, window_bounds = array<i64: 256, 128>}, {pipeline_mode = #tpu.pipeline_mode<synchronous>, transform_indices = @transform_10, window_bounds = array<i64: 1, 128>}, {transform_indices = @transform_11, window_bounds = array<i64: 16, 128>}]} {
    %c0 = arith.constant 0 : index
    %c0_0 = arith.constant 0 : index
    %0 = vector.load %arg2[%c0, %c0_0] : memref<4x512xbf16, #tpu.memory_space<vmem>>, vector<4x512xbf16>
    %1 = arith.extf %0 : vector<4x512xbf16> to vector<4x512xf32>
    %c0_1 = arith.constant 0 : index
    %c0_2 = arith.constant 0 : index
    %2 = vector.load %arg3[%c0_1, %c0_2] : memref<1x512xf32, #tpu.memory_space<vmem>>, vector<1x512xf32>
    %c0_3 = arith.constant 0 : index
    %c0_4 = arith.constant 0 : index
    %3 = vector.load %arg4[%c0_3, %c0_4] : memref<512x512xbf16, #tpu.memory_space<vmem>>, vector<512x512xbf16>
    %c0_5 = arith.constant 0 : index
    %c0_6 = arith.constant 0 : index
    %4 = vector.load %arg5[%c0_5, %c0_6] : memref<1x512xf32, #tpu.memory_space<vmem>>, vector<1x512xf32>
    %5 = arith.truncf %4 : vector<1x512xf32> to vector<1x512xbf16>
    %c0_7 = arith.constant 0 : index
    %c0_8 = arith.constant 0 : index
    %6 = vector.load %arg6[%c0_7, %c0_8] : memref<512x512xbf16, #tpu.memory_space<vmem>>, vector<512x512xbf16>
    %c0_9 = arith.constant 0 : index
    %c0_10 = arith.constant 0 : index
    %7 = vector.load %arg7[%c0_9, %c0_10] : memref<1x512xf32, #tpu.memory_space<vmem>>, vector<1x512xf32>
    %8 = arith.truncf %7 : vector<1x512xf32> to vector<1x512xbf16>
    %c0_11 = arith.constant 0 : index
    %c0_12 = arith.constant 0 : index
    %9 = vector.load %arg8[%c0_11, %c0_12] : memref<512x256xbf16, #tpu.memory_space<vmem>>, vector<512x256xbf16>
    %c0_13 = arith.constant 0 : index
    %c0_14 = arith.constant 0 : index
    %10 = vector.load %arg9[%c0_13, %c0_14] : memref<1x256xf32, #tpu.memory_space<vmem>>, vector<1x256xf32>
    %11 = arith.truncf %10 : vector<1x256xf32> to vector<1x256xbf16>
    %c0_15 = arith.constant 0 : index
    %c0_16 = arith.constant 0 : index
    %12 = vector.load %arg10[%c0_15, %c0_16] : memref<256x128xbf16, #tpu.memory_space<vmem>>, vector<256x128xbf16>
    %c0_17 = arith.constant 0 : index
    %c0_18 = arith.constant 0 : index
    %13 = vector.load %arg11[%c0_17, %c0_18] : memref<1x128xf32, #tpu.memory_space<vmem>>, vector<1x128xf32>
    %c0_19 = arith.constant 0 : index
    %c0_20 = arith.constant 0 : index
    %14 = vector.load %arg1[%c0_19, %c0_20] : memref<16x4xf32, #tpu.memory_space<vmem>>, vector<8x4xf32>
    %15 = vector.extract_strided_slice %14 {offsets = [0, 0], sizes = [8, 1], strides = [1, 1]} : vector<8x4xf32> to vector<8x1xf32>
    %16 = vector.extract_strided_slice %1 {offsets = [0, 0], sizes = [1, 512], strides = [1, 1]} : vector<4x512xf32> to vector<1x512xf32>
    %17 = vector.broadcast %15 : vector<8x1xf32> to vector<8x512xf32>
    %18 = vector.broadcast %16 : vector<1x512xf32> to vector<8x512xf32>
    %19 = arith.mulf %17, %18 : vector<8x512xf32>
    %20 = vector.broadcast %2 : vector<1x512xf32> to vector<8x512xf32>
    %21 = arith.addf %20, %19 : vector<8x512xf32>
    %22 = vector.extract_strided_slice %14 {offsets = [0, 1], sizes = [8, 1], strides = [1, 1]} : vector<8x4xf32> to vector<8x1xf32>
    %23 = vector.extract_strided_slice %1 {offsets = [1, 0], sizes = [1, 512], strides = [1, 1]} : vector<4x512xf32> to vector<1x512xf32>
    %24 = vector.broadcast %22 : vector<8x1xf32> to vector<8x512xf32>
    %25 = vector.broadcast %23 : vector<1x512xf32> to vector<8x512xf32>
    %26 = arith.mulf %24, %25 : vector<8x512xf32>
    %27 = arith.addf %21, %26 : vector<8x512xf32>
    %28 = vector.extract_strided_slice %14 {offsets = [0, 2], sizes = [8, 1], strides = [1, 1]} : vector<8x4xf32> to vector<8x1xf32>
    %29 = vector.extract_strided_slice %1 {offsets = [2, 0], sizes = [1, 512], strides = [1, 1]} : vector<4x512xf32> to vector<1x512xf32>
    %30 = vector.broadcast %28 : vector<8x1xf32> to vector<8x512xf32>
    %31 = vector.broadcast %29 : vector<1x512xf32> to vector<8x512xf32>
    %32 = arith.mulf %30, %31 : vector<8x512xf32>
    %33 = arith.addf %27, %32 : vector<8x512xf32>
    %34 = vector.extract_strided_slice %14 {offsets = [0, 3], sizes = [8, 1], strides = [1, 1]} : vector<8x4xf32> to vector<8x1xf32>
    %35 = vector.extract_strided_slice %1 {offsets = [3, 0], sizes = [1, 512], strides = [1, 1]} : vector<4x512xf32> to vector<1x512xf32>
    %36 = vector.broadcast %34 : vector<8x1xf32> to vector<8x512xf32>
    %37 = vector.broadcast %35 : vector<1x512xf32> to vector<8x512xf32>
    %38 = arith.mulf %36, %37 : vector<8x512xf32>
    %39 = arith.addf %33, %38 : vector<8x512xf32>
    %cst = arith.constant 0.000000e+00 : f32
    %40 = vector.broadcast %cst : f32 to vector<8x512xf32>
    %41 = arith.maximumf %39, %40 : vector<8x512xf32>
    %42 = arith.truncf %41 : vector<8x512xf32> to vector<8x512xbf16>
    %cst_21 = arith.constant dense<0.000000e+00> : vector<8x512xf32>
    %43 = tpu.matmul %42, %3, %cst_21 {dimension_numbers = #tpu.dot_dimension_numbers<[1], [0], [0], [1], [0, 0, 1, 1], [], []>} : vector<8x512xbf16>, vector<512x512xbf16>, vector<8x512xf32> -> vector<8x512xf32>
    %44 = arith.truncf %43 : vector<8x512xf32> to vector<8x512xbf16>
    %45 = vector.broadcast %5 : vector<1x512xbf16> to vector<8x512xbf16>
    %46 = arith.addf %44, %45 : vector<8x512xbf16>
    %cst_22 = arith.constant 0.000000e+00 : bf16
    %47 = vector.broadcast %cst_22 : bf16 to vector<8x512xbf16>
    %48 = arith.maximumf %46, %47 : vector<8x512xbf16>
    %cst_23 = arith.constant dense<0.000000e+00> : vector<8x512xf32>
    %49 = tpu.matmul %48, %6, %cst_23 {dimension_numbers = #tpu.dot_dimension_numbers<[1], [0], [0], [1], [0, 0, 1, 1], [], []>} : vector<8x512xbf16>, vector<512x512xbf16>, vector<8x512xf32> -> vector<8x512xf32>
    %50 = arith.truncf %49 : vector<8x512xf32> to vector<8x512xbf16>
    %51 = vector.broadcast %8 : vector<1x512xbf16> to vector<8x512xbf16>
    %52 = arith.addf %50, %51 : vector<8x512xbf16>
    %53 = arith.addf %52, %42 : vector<8x512xbf16>
    %cst_24 = arith.constant dense<0.000000e+00> : vector<8x256xf32>
    %54 = tpu.matmul %53, %9, %cst_24 {dimension_numbers = #tpu.dot_dimension_numbers<[1], [0], [0], [1], [0, 0, 1, 1], [], []>} : vector<8x512xbf16>, vector<512x256xbf16>, vector<8x256xf32> -> vector<8x256xf32>
    %55 = arith.truncf %54 : vector<8x256xf32> to vector<8x256xbf16>
    %56 = vector.broadcast %11 : vector<1x256xbf16> to vector<8x256xbf16>
    %57 = arith.addf %55, %56 : vector<8x256xbf16>
    %cst_25 = arith.constant 0.000000e+00 : bf16
    %58 = vector.broadcast %cst_25 : bf16 to vector<8x256xbf16>
    %59 = arith.maximumf %57, %58 : vector<8x256xbf16>
    %cst_26 = arith.constant dense<0.000000e+00> : vector<8x128xf32>
    %60 = tpu.matmul %59, %12, %cst_26 {dimension_numbers = #tpu.dot_dimension_numbers<[1], [0], [0], [1], [0, 0, 1, 1], [], []>} : vector<8x256xbf16>, vector<256x128xbf16>, vector<8x128xf32> -> vector<8x128xf32>
    %61 = vector.broadcast %13 : vector<1x128xf32> to vector<8x128xf32>
    %62 = arith.addf %60, %61 : vector<8x128xf32>
    %63 = arith.truncf %62 : vector<8x128xf32> to vector<8x128xbf16>
    %c0_27 = arith.constant 0 : index
    %c0_28 = arith.constant 0 : index
    %64 = vector.load %arg12[%c0_27, %c0_28] : memref<16x128xbf16, #tpu.memory_space<vmem>>, vector<8x128xbf16>
    tpu.vector_store %arg12[%c0_27, %c0_28], %63 {strides = array<i32>} : memref<16x128xbf16, #tpu.memory_space<vmem>>, vector<8x128xbf16>,
    %c8 = arith.constant 8 : index
    %c0_29 = arith.constant 0 : index
    %65 = vector.load %arg1[%c8, %c0_29] : memref<16x4xf32, #tpu.memory_space<vmem>>, vector<8x4xf32>
    %66 = vector.extract_strided_slice %65 {offsets = [0, 0], sizes = [8, 1], strides = [1, 1]} : vector<8x4xf32> to vector<8x1xf32>
    %67 = vector.extract_strided_slice %1 {offsets = [0, 0], sizes = [1, 512], strides = [1, 1]} : vector<4x512xf32> to vector<1x512xf32>
    %68 = vector.broadcast %66 : vector<8x1xf32> to vector<8x512xf32>
    %69 = vector.broadcast %67 : vector<1x512xf32> to vector<8x512xf32>
    %70 = arith.mulf %68, %69 : vector<8x512xf32>
    %71 = vector.broadcast %2 : vector<1x512xf32> to vector<8x512xf32>
    %72 = arith.addf %71, %70 : vector<8x512xf32>
    %73 = vector.extract_strided_slice %65 {offsets = [0, 1], sizes = [8, 1], strides = [1, 1]} : vector<8x4xf32> to vector<8x1xf32>
    %74 = vector.extract_strided_slice %1 {offsets = [1, 0], sizes = [1, 512], strides = [1, 1]} : vector<4x512xf32> to vector<1x512xf32>
    %75 = vector.broadcast %73 : vector<8x1xf32> to vector<8x512xf32>
    %76 = vector.broadcast %74 : vector<1x512xf32> to vector<8x512xf32>
    %77 = arith.mulf %75, %76 : vector<8x512xf32>
    %78 = arith.addf %72, %77 : vector<8x512xf32>
    %79 = vector.extract_strided_slice %65 {offsets = [0, 2], sizes = [8, 1], strides = [1, 1]} : vector<8x4xf32> to vector<8x1xf32>
    %80 = vector.extract_strided_slice %1 {offsets = [2, 0], sizes = [1, 512], strides = [1, 1]} : vector<4x512xf32> to vector<1x512xf32>
    %81 = vector.broadcast %79 : vector<8x1xf32> to vector<8x512xf32>
    %82 = vector.broadcast %80 : vector<1x512xf32> to vector<8x512xf32>
    %83 = arith.mulf %81, %82 : vector<8x512xf32>
    %84 = arith.addf %78, %83 : vector<8x512xf32>
    %85 = vector.extract_strided_slice %65 {offsets = [0, 3], sizes = [8, 1], strides = [1, 1]} : vector<8x4xf32> to vector<8x1xf32>
    %86 = vector.extract_strided_slice %1 {offsets = [3, 0], sizes = [1, 512], strides = [1, 1]} : vector<4x512xf32> to vector<1x512xf32>
    %87 = vector.broadcast %85 : vector<8x1xf32> to vector<8x512xf32>
    %88 = vector.broadcast %86 : vector<1x512xf32> to vector<8x512xf32>
    %89 = arith.mulf %87, %88 : vector<8x512xf32>
    %90 = arith.addf %84, %89 : vector<8x512xf32>
    %cst_30 = arith.constant 0.000000e+00 : f32
    %91 = vector.broadcast %cst_30 : f32 to vector<8x512xf32>
    %92 = arith.maximumf %90, %91 : vector<8x512xf32>
    %93 = arith.truncf %92 : vector<8x512xf32> to vector<8x512xbf16>
    %cst_31 = arith.constant dense<0.000000e+00> : vector<8x512xf32>
    %94 = tpu.matmul %93, %3, %cst_31 {dimension_numbers = #tpu.dot_dimension_numbers<[1], [0], [0], [1], [0, 0, 1, 1], [], []>} : vector<8x512xbf16>, vector<512x512xbf16>, vector<8x512xf32> -> vector<8x512xf32>
    %95 = arith.truncf %94 : vector<8x512xf32> to vector<8x512xbf16>
    %96 = vector.broadcast %5 : vector<1x512xbf16> to vector<8x512xbf16>
    %97 = arith.addf %95, %96 : vector<8x512xbf16>
    %cst_32 = arith.constant 0.000000e+00 : bf16
    %98 = vector.broadcast %cst_32 : bf16 to vector<8x512xbf16>
    %99 = arith.maximumf %97, %98 : vector<8x512xbf16>
    %cst_33 = arith.constant dense<0.000000e+00> : vector<8x512xf32>
    %100 = tpu.matmul %99, %6, %cst_33 {dimension_numbers = #tpu.dot_dimension_numbers<[1], [0], [0], [1], [0, 0, 1, 1], [], []>} : vector<8x512xbf16>, vector<512x512xbf16>, vector<8x512xf32> -> vector<8x512xf32>
    %101 = arith.truncf %100 : vector<8x512xf32> to vector<8x512xbf16>
    %102 = vector.broadcast %8 : vector<1x512xbf16> to vector<8x512xbf16>
    %103 = arith.addf %101, %102 : vector<8x512xbf16>
    %104 = arith.addf %103, %93 : vector<8x512xbf16>
    %cst_34 = arith.constant dense<0.000000e+00> : vector<8x256xf32>
    %105 = tpu.matmul %104, %9, %cst_34 {dimension_numbers = #tpu.dot_dimension_numbers<[1], [0], [0], [1], [0, 0, 1, 1], [], []>} : vector<8x512xbf16>, vector<512x256xbf16>, vector<8x256xf32> -> vector<8x256xf32>
    %106 = arith.truncf %105 : vector<8x256xf32> to vector<8x256xbf16>
    %107 = vector.broadcast %11 : vector<1x256xbf16> to vector<8x256xbf16>
    %108 = arith.addf %106, %107 : vector<8x256xbf16>
    %cst_35 = arith.constant 0.000000e+00 : bf16
    %109 = vector.broadcast %cst_35 : bf16 to vector<8x256xbf16>
    %110 = arith.maximumf %108, %109 : vector<8x256xbf16>
    %cst_36 = arith.constant dense<0.000000e+00> : vector<8x128xf32>
    %111 = tpu.matmul %110, %12, %cst_36 {dimension_numbers = #tpu.dot_dimension_numbers<[1], [0], [0], [1], [0, 0, 1, 1], [], []>} : vector<8x256xbf16>, vector<256x128xbf16>, vector<8x128xf32> -> vector<8x128xf32>
    %112 = vector.broadcast %13 : vector<1x128xf32> to vector<8x128xf32>
    %113 = arith.addf %111, %112 : vector<8x128xf32>
    %114 = arith.truncf %113 : vector<8x128xf32> to vector<8x128xbf16>
    %c8_37 = arith.constant 8 : index
    %c0_38 = arith.constant 0 : index
    %115 = vector.load %arg12[%c8_37, %c0_38] : memref<16x128xbf16, #tpu.memory_space<vmem>>, vector<8x128xbf16>
    tpu.vector_store %arg12[%c8_37, %c0_38], %114 {strides = array<i32>} : memref<16x128xbf16, #tpu.memory_space<vmem>>, vector<8x128xbf16>,
    return
  }
  func.func @transform_0(%arg0: i32) -> (i32, i32) {
    %c0_i32 = arith.constant 0 : i32
    %c0_i32_0 = arith.constant 0 : i32
    return %arg0, %c0_i32 : i32, i32
  }
  func.func @transform_1(%arg0: i32) -> (i32, i32) {
    %c0_i32 = arith.constant 0 : i32
    %c0_i32_0 = arith.constant 0 : i32
    %c0_i32_1 = arith.constant 0 : i32
    return %c0_i32, %c0_i32_0 : i32, i32
  }
  func.func @transform_2(%arg0: i32) -> (i32, i32) {
    %c0_i32 = arith.constant 0 : i32
    %c0_i32_0 = arith.constant 0 : i32
    %c0_i32_1 = arith.constant 0 : i32
    return %c0_i32, %c0_i32_0 : i32, i32
  }
  func.func @transform_3(%arg0: i32) -> (i32, i32) {
    %c0_i32 = arith.constant 0 : i32
    %c0_i32_0 = arith.constant 0 : i32
    %c0_i32_1 = arith.constant 0 : i32
    return %c0_i32, %c0_i32_0 : i32, i32
  }
  func.func @transform_4(%arg0: i32) -> (i32, i32) {
    %c0_i32 = arith.constant 0 : i32
    %c0_i32_0 = arith.constant 0 : i32
    %c0_i32_1 = arith.constant 0 : i32
    return %c0_i32, %c0_i32_0 : i32, i32
  }
  func.func @transform_5(%arg0: i32) -> (i32, i32) {
    %c0_i32 = arith.constant 0 : i32
    %c0_i32_0 = arith.constant 0 : i32
    %c0_i32_1 = arith.constant 0 : i32
    return %c0_i32, %c0_i32_0 : i32, i32
  }
  func.func @transform_6(%arg0: i32) -> (i32, i32) {
    %c0_i32 = arith.constant 0 : i32
    %c0_i32_0 = arith.constant 0 : i32
    %c0_i32_1 = arith.constant 0 : i32
    return %c0_i32, %c0_i32_0 : i32, i32
  }
  func.func @transform_7(%arg0: i32) -> (i32, i32) {
    %c0_i32 = arith.constant 0 : i32
    %c0_i32_0 = arith.constant 0 : i32
    %c0_i32_1 = arith.constant 0 : i32
    return %c0_i32, %c0_i32_0 : i32, i32
  }
  func.func @transform_8(%arg0: i32) -> (i32, i32) {
    %c0_i32 = arith.constant 0 : i32
    %c0_i32_0 = arith.constant 0 : i32
    %c0_i32_1 = arith.constant 0 : i32
    return %c0_i32, %c0_i32_0 : i32, i32
  }
  func.func @transform_9(%arg0: i32) -> (i32, i32) {
    %c0_i32 = arith.constant 0 : i32
    %c0_i32_0 = arith.constant 0 : i32
    %c0_i32_1 = arith.constant 0 : i32
    return %c0_i32, %c0_i32_0 : i32, i32
  }
  func.func @transform_10(%arg0: i32) -> (i32, i32) {
    %c0_i32 = arith.constant 0 : i32
    %c0_i32_0 = arith.constant 0 : i32
    %c0_i32_1 = arith.constant 0 : i32
    return %c0_i32, %c0_i32_0 : i32, i32
  }
  func.func @transform_11(%arg0: i32) -> (i32, i32) {
    %c0_i32 = arith.constant 0 : i32
    %c0_i32_0 = arith.constant 0 : i32
    return %arg0, %c0_i32 : i32, i32
  }
}

</mosaic_0001>

<bundles_post_ra>
// kernel: tpu_custom_call.1
= control target key start
LH: loop header
LB: loop body
LE: loop exit
PB: predicated region body
PF: predicated region fallthrough
CT: control target
= control target key end

     0   :  { %16 = vsyncpa [#allocation3], 0  ;;  %s5325_s0 = inlined_call_operand.vmem [shape: f32[16,4], index: 0, kind: input, shape index: {}]   ;;  %s5326_s1 = inlined_call_operand.vmem [shape: bf16[4,512], index: 1, kind: input, shape index: {}]   ;;  %s5327_s2 = inlined_call_operand.vmem [shape: f32[1,512], index: 2, kind: input, shape index: {}]   ;;  %s5328_s3 = inlined_call_operand.hbm [shape: bf16[512,512], index: 3, kind: input, shape index: {}]   ;;  %s5329_s4 = inlined_call_operand.vmem [shape: f32[1,512], index: 4, kind: input, shape index: {}]   ;;  %s5330_s5 = inlined_call_operand.hbm [shape: bf16[512,512], index: 5, kind: input, shape index: {}]   ;;  %s5331_s6 = inlined_call_operand.vmem [shape: f32[1,512], index: 6, kind: input, shape index: {}]   ;;  %s5332_s7 = inlined_call_operand.hbm [shape: bf16[512,256], index: 7, kind: input, shape index: {}]   ;;  %s5333_s8 = inlined_call_operand.vmem [shape: f32[1,256], index: 8, kind: input, shape index: {}]   ;;  %s5334_s9 = inlined_call_operand.hbm [shape: bf16[256,128], index: 9, kind: input, shape index: {}]   ;;  %s5335_s10 = inlined_call_operand.vmem [shape: f32[1,128], index: 10, kind: input, shape index: {}]   ;;  %s5336_s11 = inlined_call_operand.hbm [shape: bf16[16,128], index: 11, kind: output, shape index: {}]  }
   0x1   :  { %17 = vsyncpa [#allocation6], 0 }
   0x2   :  { %18 = vsyncpa [#allocation9], 0 }
   0x3   :  { %19 = vsyncpa [#allocation4], 0  ;;  %s4871_s17 = smov [#allocation5]   ;;  %s4872_s19 = smov [#allocation2]  }
   0x4   :  { %s45_s18 = sshll.u32 %s4871_s17, 4  ;;  %s31_s20 = sshll.u32 %s4872_s19, 4  ;;  %s46_s18 = int_to_ptr.vmem [resolvable:$true] %s45_s18  ;;  %s32_s20 = int_to_ptr.vmem [resolvable:$true] %s31_s20 }
   0x5   :  { %s4771_s21 = scalar_lea.vmem %s46_s18, 16384  ;;  %p4776_p1 = scmp.lt.s32.totalorder %s46_s18, %s46_s18 }
   0x6   :  { %p4772_p0 = scmp.ne.s32.totalorder %s46_s18, %s4771_s21  ;;  %p4777_p2 = scmp.lt.s32.totalorder %s4771_s21, %s4771_s21 }
   0x8   :  { %p4778_p3 = por %p4777_p2, %p4776_p1 }
   0xa   :  { %p4779_p4 = pnand %p4778_p3, %p4772_p0 }
   0xc   :  { %4782 = shalt.err (!%p4779_p4)
}
   0xd   :  { %s4873_s22 = smov 256   ;;  %s4874_s23 = smov 16  }
   0xe   :  { %51 = dma.hbm_to_vmem [thread:$0]  %s5330_s5, 16384, %s46_s18, [#allocation6], %s4873_s22, %s4873_s22, %s4874_s23  }
   0xf   :  { %s4791_s26 = scalar_lea.vmem %s32_s20, 16384  ;;  %p4796_p6 = scmp.lt.s32.totalorder %s32_s20, %s32_s20 }
  0x10   :  { %p4792_p5 = scmp.ne.s32.totalorder %s32_s20, %s4791_s26  ;;  %p4797_p7 = scmp.lt.s32.totalorder %s4791_s26, %s4791_s26 }
  0x12   :  { %p4798_p8 = por %p4797_p7, %p4796_p6 }
  0x14   :  { %p4799_p9 = pnand %p4798_p8, %p4792_p5 }
  0x16   :  { %4802 = shalt.err (!%p4799_p9)
}
  0x17   :  { %37 = dma.hbm_to_vmem [thread:$0]  %s5328_s3, 16384, %s32_s20, [#allocation3], %s4873_s22, %s4873_s22, %s4874_s23  }
  0x18   :  { %s4875_s29 = smov [#allocation7]  }
  0x19   :  { %s59_s30 = sshll.u32 %s4875_s29, 4  ;;  %s60_s30 = int_to_ptr.vmem [resolvable:$true] %s59_s30 }
  0x1a   :  { %s4811_s12 = scalar_lea.vmem %s60_s30, 8192  ;;  %p4816_p11 = scmp.lt.s32.totalorder %s60_s30, %s60_s30 }
  0x1b   :  { %p4812_p10 = scmp.ne.s32.totalorder %s60_s30, %s4811_s12  ;;  %p4817_p12 = scmp.lt.s32.totalorder %s4811_s12, %s4811_s12 }
  0x1d   :  { %p4818_p13 = por %p4817_p12, %p4816_p11 }
  0x1f   :  { %p4819_p0 = pnand %p4818_p13, %p4812_p10 }
  0x21   :  { %4822 = shalt.err (!%p4819_p0)
}
  0x22   :  { %s4876_s5 = smov 128   ;;  %s4877_s13 = smov 8  }
  0x23   :  { %65 = dma.hbm_to_vmem [thread:$0]  %s5332_s7, 8192, %s60_s30, [#allocation6], %s4876_s5, %s4876_s5, %s4877_s13  }
  0x24   :  { %s4878_s16 = smov [#allocation8]  }
  0x25   :  { %s73_s17 = sshll.u32 %s4878_s16, 4  ;;  %s74_s17 = int_to_ptr.vmem [resolvable:$true] %s73_s17 }
  0x26   :  { %s4831_s3 = scalar_lea.vmem %s74_s17, 2048  ;;  %p4836_p2 = scmp.lt.s32.totalorder %s74_s17, %s74_s17 }
  0x27   :  { %p4832_p1 = scmp.ne.s32.totalorder %s74_s17, %s4831_s3  ;;  %p4837_p3 = scmp.lt.s32.totalorder %s4831_s3, %s4831_s3 }
  0x29   :  { %p4838_p4 = por %p4837_p3, %p4836_p2 }
  0x2b   :  { %p4839_p5 = pnand %p4838_p4, %p4832_p1 }
  0x2d   :  { %4842 = shalt.err (!%p4839_p5)
}
  0x2e   :  { %s4879_s18 = smov 64   ;;  %s4880_s19 = smov 4  }
  0x2f   :  { %79 = dma.hbm_to_vmem [thread:$0]  %s5334_s9, 2048, %s74_s17, [#allocation9], %s4879_s18, %s4879_s18, %s4880_s19  }
  0x30   :  { %4863 = dma.done.wait [#allocation3], 16384  }
  0x31   :  { %4864 = vsyncadd [#allocation3], 4294950912 }
  0x32   :  { %4865 = dma.done.wait [#allocation6], 24576  }
  0x33   :  { %4866 = vsyncadd [#allocation6], 4294942720 }
  0x34   :  { %4867 = dma.done.wait [#allocation9], 2048  }
  0x35   :  { %4868 = vsyncadd [#allocation9], 4294965248  ;;  %v4881_v0 = vmov 2   ;;  %v4882_v1 = vmov 0   ;;  %v518_v2 = vld [vmem:[%s5325_s0] sm:$0xff]  ;;  %v4883_v8 = vmov 3  }
  0x36   :  { %3954 = vset.pattern.permute.xlu1 %v4881_v0  ;;  %3952 = vset.pattern.permute.xlu0 %v4882_v1  ;;  %v3959_v3 = vld [vmem:[#allocation2 + $0xe4] ss:$16 sps:$4 sm:$0xff]   ;;  %v3963_v5 = vld [vmem:[#allocation2 + $0xe0] ss:$16 sps:$4 sm:$0xff]   ;;  %v4884_v9 = vmov 1   ;;  %v2997_v10 = vld [vmem:[%s5325_s0 + $0x8] sm:$0xff] }
  0x37   :  { %640 = vperm.xlu1 %3954, %v518_v2   ;;  %521 = vperm.xlu0 %3952, %v518_v2   ;;  %v3961_v4 = vld [vmem:[#allocation2 + $0x2e4] ss:$16 sps:$4 sm:$0xff]   ;;  %v3964_v6 = vld [vmem:[#allocation2 + $0x2e0] ss:$16 sps:$4 sm:$0xff]  }
  0x38   :  { %1383 = vmatprep.subr.bf16.mxu0 %v3959_v3  ;;  %1424 = vmatprep.subr.bf16.mxu1 %v3961_v4  ;;  %v3965_v7 = vld [vmem:[#allocation2 + $0xc4] ss:$16 sps:$4 sm:$0xff]   ;;  %v3969_v12 = vld [vmem:[#allocation2 + $0xc0] ss:$16 sps:$4 sm:$0xff]  }
  0x39   :  { %1384 = vmatpush1.bf16.msra.mxu0 %v3963_v5  ;;  %v3967_v11 = vld [vmem:[#allocation2 + $0x2c4] ss:$16 sps:$4 sm:$0xff]   ;;  %1425 = vmatpush1.bf16.msra.mxu1 %v3964_v6  ;;  %v3970_v14 = vld [vmem:[#allocation2 + $0x2c0] ss:$16 sps:$4 sm:$0xff]   ;;  %v4057_v6 = vld [vmem:[#allocation2 + $0xec] ss:$16 sps:$4 sm:$0xff]  }
  0x3a   :  { %v3971_v13 = vld [vmem:[#allocation2 + $0xa4] ss:$16 sps:$4 sm:$0xff]   ;;  %1385 = vmatprep.subr.bf16.mxu0 %v3965_v7  ;;  %1426 = vmatprep.subr.bf16.mxu1 %v3967_v11  ;;  %v3975_v16 = vld [vmem:[#allocation2 + $0xa0] ss:$16 sps:$4 sm:$0xff]  }
  0x3b   :  { %3955 = vset.pattern.permute.xlu1 %v4883_v8  ;;  %3953 = vset.pattern.permute.xlu0 %v4884_v9  ;;  %v3973_v15 = vld [vmem:[#allocation2 + $0x2a4] ss:$16 sps:$4 sm:$0xff]   ;;  %v3976_v18 = vld [vmem:[#allocation2 + $0x2a0] ss:$16 sps:$4 sm:$0xff]   ;;  %v229_v9 = vlaneseq }
  0x3c   :  { %688 = vperm.xlu1 %3955, %v518_v2   ;;  %592 = vperm.xlu0 %3953, %v518_v2   ;;  %v3977_v17 = vld [vmem:[#allocation2 + $0x84] ss:$16 sps:$4 sm:$0xff]   ;;  %v3981_v20 = vld [vmem:[#allocation2 + $0x80] ss:$16 sps:$4 sm:$0xff]  }
  0x3d   :  { %1386 = vmatpush1.bf16.msra.mxu0 %v3969_v12  ;;  %1427 = vmatpush1.bf16.msra.mxu1 %v3970_v14  ;;  %v3979_v19 = vld [vmem:[#allocation2 + $0x284] ss:$16 sps:$4 sm:$0xff]   ;;  %v3982_v22 = vld [vmem:[#allocation2 + $0x280] ss:$16 sps:$4 sm:$0xff]  }
  0x3e   :  { %1387 = vmatprep.subr.bf16.mxu0 %v3971_v13  ;;  %1428 = vmatprep.subr.bf16.mxu1 %v3973_v15  ;;  %v3983_v21 = vld [vmem:[#allocation2 + $0x64] ss:$16 sps:$4 sm:$0xff]   ;;  %v3987_v24 = vld [vmem:[#allocation2 + $0x60] ss:$16 sps:$4 sm:$0xff]  }
  0x3f   :  { %v3985_v23 = vld [vmem:[#allocation2 + $0x264] ss:$16 sps:$4 sm:$0xff]   ;;  %v3988_v26 = vld [vmem:[#allocation2 + $0x260] ss:$16 sps:$4 sm:$0xff]  }
  0x40   :  { %3956 = vset.pattern.permute.xlu1 %v4882_v1  ;;  %3012 = vperm.xlu0 %3953, %v2997_v10   ;;  %v3989_v25 = vld [vmem:[#allocation2 + $0x44] ss:$16 sps:$4 sm:$0xff]   ;;  %v3993_v28 = vld [vmem:[#allocation2 + $0x40] ss:$16 sps:$4 sm:$0xff]  }
  0x41   :  { %3000 = vperm.xlu1 %3956, %v2997_v10   ;;  %1388 = vmatpush1.bf16.msra.mxu0 %v3975_v16  ;;  %v3991_v27 = vld [vmem:[#allocation2 + $0x244] ss:$16 sps:$4 sm:$0xff]   ;;  %v3994_v30 = vld [vmem:[#allocation2 + $0x240] ss:$16 sps:$4 sm:$0xff]  }
  0x42   :  { %1389 = vmatprep.subr.bf16.mxu0 %v3977_v17  ;;  %1429 = vmatpush1.bf16.msra.mxu1 %v3976_v18  ;;  %v3995_v29 = vld [vmem:[#allocation2 + $0x24] ss:$16 sps:$4 sm:$0xff]   ;;  %v3999_v32 = vld [vmem:[#allocation2 + $0x20] ss:$16 sps:$4 sm:$0xff]  }
  0x43   :  { %1430 = vmatprep.subr.bf16.mxu1 %v3979_v19  ;;  %v3997_v31 = vld [vmem:[#allocation2 + $0x224] ss:$16 sps:$4 sm:$0xff]   ;;  %v4000_v34 = vld [vmem:[#allocation2 + $0x220] ss:$16 sps:$4 sm:$0xff]  }
  0x44   :  { %3958 = vset.pattern.permute.xlu0 %v4883_v8  ;;  %v4001_v33 = vld [vmem:[#allocation2 + $0x4] ss:$16 sps:$4 sm:$0xff]   ;;  %v4005_v36 = vld [vmem:[#allocation2] ss:$16 sps:$4 sm:$0xff]   ;;  %v4060_v8 = vld [vmem:[#allocation2 + $0x2ec] ss:$16 sps:$4 sm:$0xff]  }
  0x45   :  { %3957 = vset.pattern.permute.xlu1 %v4881_v0  ;;  %3036 = vperm.xlu0 %3958, %v2997_v10   ;;  %v4003_v35 = vld [vmem:[#allocation2 + $0x204] ss:$16 sps:$4 sm:$0xff]   ;;  %v4006_v38 = vld [vmem:[#allocation2 + $0x200] ss:$16 sps:$4 sm:$0xff]  }
  0x46   :  { %3024 = vperm.xlu1 %3957, %v2997_v10   ;;  %1390 = vmatpush1.bf16.msra.mxu0 %v3981_v20  ;;  %v4007_v37 = vld [vmem:[#allocation2 + $0x1e4] ss:$16 sps:$4 sm:$0xff]   ;;  %v4011_v40 = vld [vmem:[#allocation2 + $0x1e0] ss:$16 sps:$4 sm:$0xff]   ;;  %v230_v10 = vshrl.u32 %v229_v9, 7 }
  0x47   :  { %1391 = vmatprep.subr.bf16.mxu0 %v3983_v21  ;;  %1431 = vmatpush1.bf16.msra.mxu1 %v3982_v22  ;;  %v4009_v39 = vld [vmem:[#allocation2 + $0x3e4] ss:$16 sps:$4 sm:$0xff]   ;;  %v4012_v42 = vld [vmem:[#allocation2 + $0x3e0] ss:$16 sps:$4 sm:$0xff]  }
  0x48   :  { %1432 = vmatprep.subr.bf16.mxu1 %v3985_v23  ;;  %v4013_v41 = vld [vmem:[#allocation2 + $0x1c4] ss:$16 sps:$4 sm:$0xff]   ;;  %v4017_v44 = vld [vmem:[#allocation2 + $0x1c0] ss:$16 sps:$4 sm:$0xff]   ;;  %v4972_v12 = vsub.s32 0, %v230_v10  ;;  %v532_v13 = vsub.s32 4, %v230_v10 }
  0x49   :  { %v4015_v43 = vld [vmem:[#allocation2 + $0x3c4] ss:$16 sps:$4 sm:$0xff]   ;;  %v4018_v46 = vld [vmem:[#allocation2 + $0x3c0] ss:$16 sps:$4 sm:$0xff]   ;;  %v4974_v16 = vsub.s32 1, %v230_v10  ;;  %v4976_v17 = vsub.s32 2, %v230_v10 }
  0x4a   :  { %1392 = vmatpush1.bf16.msra.mxu0 %v3987_v24  ;;  %v4019_v45 = vld [vmem:[#allocation2 + $0x1a4] ss:$16 sps:$4 sm:$0xff]   ;;  %v4023_v48 = vld [vmem:[#allocation2 + $0x1a0] ss:$16 sps:$4 sm:$0xff]   ;;  %v4978_v18 = vsub.s32 3, %v230_v10  ;;  %v601_v24 = vsub.s32 5, %v230_v10 }
  0x4b   :  { %1393 = vmatprep.subr.bf16.mxu0 %v3989_v25  ;;  %1433 = vmatpush1.bf16.msra.mxu1 %v3988_v26  ;;  %v4021_v47 = vld [vmem:[#allocation2 + $0x3a4] ss:$16 sps:$4 sm:$0xff]   ;;  %v4024_v50 = vld [vmem:[#allocation2 + $0x3a0] ss:$16 sps:$4 sm:$0xff]   ;;  %v649_v25 = vsub.s32 6, %v230_v10  ;;  %v697_v26 = vsub.s32 7, %v230_v10 }
  0x4c   :  { %1434 = vmatprep.subr.bf16.mxu1 %v3991_v27  ;;  %v4025_v49 = vld [vmem:[#allocation2 + $0x184] ss:$16 sps:$4 sm:$0xff]   ;;  %v4029_v52 = vld [vmem:[#allocation2 + $0x180] ss:$16 sps:$4 sm:$0xff]  }
  0x4d   :  { %v4027_v51 = vld [vmem:[#allocation2 + $0x384] ss:$16 sps:$4 sm:$0xff]   ;;  %v4030_v54 = vld [vmem:[#allocation2 + $0x380] ss:$16 sps:$4 sm:$0xff]  }
  0x4e   :  { %1394 = vmatpush1.bf16.msra.mxu0 %v3993_v28  ;;  %v4031_v53 = vld [vmem:[#allocation2 + $0x164] ss:$16 sps:$4 sm:$0xff]   ;;  %v4035_v56 = vld [vmem:[#allocation2 + $0x160] ss:$16 sps:$4 sm:$0xff]  }
  0x4f   :  { %1395 = vmatprep.subr.bf16.mxu0 %v3995_v29  ;;  %1435 = vmatpush1.bf16.msra.mxu1 %v3994_v30  ;;  %v4033_v55 = vld [vmem:[#allocation2 + $0x364] ss:$16 sps:$4 sm:$0xff]   ;;  %v4036_v58 = vld [vmem:[#allocation2 + $0x360] ss:$16 sps:$4 sm:$0xff]  }
  0x50   :  { %1436 = vmatprep.subr.bf16.mxu1 %v3997_v31  ;;  %v4037_v57 = vld [vmem:[#allocation2 + $0x144] ss:$16 sps:$4 sm:$0xff]   ;;  %v4041_v60 = vld [vmem:[#allocation2 + $0x140] ss:$16 sps:$4 sm:$0xff]  }
  0x51   :  { %v4039_v59 = vld [vmem:[#allocation2 + $0x344] ss:$16 sps:$4 sm:$0xff]   ;;  %v4042_v62 = vld [vmem:[#allocation2 + $0x340] ss:$16 sps:$4 sm:$0xff]  }
  0x52   :  { %1396 = vmatpush1.bf16.msra.mxu0 %v3999_v32  ;;  %v4043_v61 = vld [vmem:[#allocation2 + $0x124] ss:$16 sps:$4 sm:$0xff]   ;;  %v4047_v0 = vld [vmem:[#allocation2 + $0x120] ss:$16 sps:$4 sm:$0xff]  }
  0x53   :  { %1397 = vmatprep.subr.bf16.mxu0 %v4001_v33  ;;  %1437 = vmatpush1.bf16.msra.mxu1 %v4000_v34  ;;  %v4045_v63 = vld [vmem:[#allocation2 + $0x324] ss:$16 sps:$4 sm:$0xff]   ;;  %v4048_v3 = vld [vmem:[#allocation2 + $0x320] ss:$16 sps:$4 sm:$0xff]  }
  0x54   :  { %1438 = vmatprep.subr.bf16.mxu1 %v4003_v35  ;;  %v4049_v2 = vld [vmem:[#allocation2 + $0x104] ss:$16 sps:$4 sm:$0xff]   ;;  %v4053_v5 = vld [vmem:[#allocation2 + $0x100] ss:$16 sps:$4 sm:$0xff]  }
  0x55   :  { %v4051_v4 = vld [vmem:[#allocation2 + $0x304] ss:$16 sps:$4 sm:$0xff]   ;;  %v4054_v7 = vld [vmem:[#allocation2 + $0x300] ss:$16 sps:$4 sm:$0xff]  }
  0x56   :  { %1398 = vmatpush1.bf16.msra.mxu0 %v4005_v36  ;;  %v95_v11 = vld [vmem:[%s5326_s1] sm:$0xff] }
  0x57   :  { %1399 = vmatprep.subr.bf16.mxu0 %v4007_v37  ;;  %1439 = vmatpush1.bf16.msra.mxu1 %v4006_v38  ;;  %v96_v14 = vunpack.c.l.bf16 %v95_v11  ;;  %v97_v15 = vunpack.c.h.bf16 %v95_v11  ;;  %v98_v19 = vld [vmem:[%s5327_s2] sm:$0xf] }
  0x58   :  { %1440 = vmatprep.subr.bf16.mxu1 %v4009_v39  ;;  %v4986_v27 = vrot.slane %v98_v19, %v4972_v12  ;;  %v4989_v28 = vrot.slane %v98_v19, %v4974_v16  ;;  %v4992_v29 = vrot.slane %v98_v19, %v4976_v17  ;;  %v4995_v30 = vrot.slane %v98_v19, %v4978_v18 }
  0x59   :  { %v529_v20 = vrot.slane %v96_v14, %v4972_v12  ;;  %v533_v21 = vrot.slane %v96_v14, %v532_v13  ;;  %v537_v22 = vrot.slane %v97_v15, %v4972_v12  ;;  %v541_v23 = vrot.slane %v97_v15, %v532_v13 }
  0x5a   :  { %1400 = vmatpush2.bf16.msra.mxu0 %v4011_v40  ;;  %v598_v35 = vrot.slane %v96_v14, %v4974_v16  ;;  %v602_v36 = vrot.slane %v96_v14, %v601_v24  ;;  %v606_v37 = vrot.slane %v97_v15, %v4974_v16  ;;  %v610_v38 = vrot.slane %v97_v15, %v601_v24 }
  0x5b   :  { %1401 = vmatprep.subr.bf16.mxu0 %v4013_v41  ;;  %1441 = vmatpush2.bf16.msra.mxu1 %v4012_v42  ;;  %v549_v31 = vrot.slane %v529_v20, %v4972_v12  ;;  %v553_v32 = vrot.slane %v533_v21, %v4972_v12  ;;  %v557_v33 = vrot.slane %v537_v22, %v4972_v12 }
  0x5c   :  { %1442 = vmatprep.subr.bf16.mxu1 %v4015_v43  ;;  %v561_v34 = vrot.slane %v541_v23, %v4972_v12  ;;  %v646_v39 = vrot.slane %v96_v14, %v4976_v17  ;;  %v650_v40 = vrot.slane %v96_v14, %v649_v25  ;;  %v654_v41 = vrot.slane %v97_v15, %v4976_v17 }
  0x5d   :  { %v658_v42 = vrot.slane %v97_v15, %v649_v25 }
  0x5e   :  { %1402 = vmatpush2.bf16.msra.mxu0 %v4017_v44 }
  0x5f   :  { %1403 = vmatprep.subr.bf16.mxu0 %v4019_v45  ;;  %1443 = vmatpush2.bf16.msra.mxu1 %v4018_v46  ;;  %v694_v45 = vrot.slane %v96_v14, %v4978_v18  ;;  %v698_v46 = vrot.slane %v96_v14, %v697_v26 }
  0x60   :  { %1444 = vmatprep.subr.bf16.mxu1 %v4021_v47  ;;  %v702_v47 = vrot.slane %v97_v15, %v4978_v18 }
  0x62   :  { %1404 = vmatpush2.bf16.msra.mxu0 %v4023_v48  ;;  %v706_v48 = vrot.slane %v97_v15, %v697_v26 }
  0x63   :  { %1405 = vmatprep.subr.bf16.mxu0 %v4025_v49  ;;  %1445 = vmatpush2.bf16.msra.mxu1 %v4024_v50 }
  0x64   :  { %1446 = vmatprep.subr.bf16.mxu1 %v4027_v51 }
  0x66   :  { %1406 = vmatpush2.bf16.msra.mxu0 %v4029_v52 }
  0x67   :  { %1407 = vmatprep.subr.bf16.mxu0 %v4031_v53  ;;  %1447 = vmatpush2.bf16.msra.mxu1 %v4030_v54  ;;  %v618_v53 = vrot.slane %v598_v35, %v4974_v16  ;;  %v622_v54 = vrot.slane %v602_v36, %v4974_v16 }
  0x68   :  { %1448 = vmatprep.subr.bf16.mxu1 %v4033_v55  ;;  %v626_v55 = vrot.slane %v606_v37, %v4974_v16 }
  0x6a   :  { %1408 = vmatpush2.bf16.msra.mxu0 %v4035_v56  ;;  %v630_v56 = vrot.slane %v610_v38, %v4974_v16 }
  0x6b   :  { %1409 = vmatprep.subr.bf16.mxu0 %v4037_v57  ;;  %1449 = vmatpush2.bf16.msra.mxu1 %v4036_v58  ;;  %v666_v57 = vrot.slane %v646_v39, %v4976_v17  ;;  %v670_v58 = vrot.slane %v650_v40, %v4976_v17 }
  0x6c   :  { %1450 = vmatprep.subr.bf16.mxu1 %v4039_v59  ;;  %v674_v59 = vrot.slane %v654_v41, %v4976_v17 }
  0x6e   :  { %1410 = vmatpush2.bf16.msra.mxu0 %v4041_v60  ;;  %v678_v60 = vrot.slane %v658_v42, %v4976_v17 }
  0x6f   :  { %1411 = vmatprep.subr.bf16.mxu0 %v4043_v61  ;;  %1451 = vmatpush2.bf16.msra.mxu1 %v4042_v62  ;;  %v714_v61 = vrot.slane %v694_v45, %v4978_v18  ;;  %v718_v62 = vrot.slane %v698_v46, %v4978_v18 }
  0x70   :  { %1452 = vmatprep.subr.bf16.mxu1 %v4045_v63  ;;  %v722_v63 = vrot.slane %v702_v47, %v4978_v18 }
  0x72   :  { %1412 = vmatpush2.bf16.msra.mxu0 %v4047_v0  ;;  %v726_v0 = vrot.slane %v706_v48, %v4978_v18 }
  0x73   :  { %1413 = vmatprep.subr.bf16.mxu0 %v4049_v2  ;;  %1453 = vmatpush2.bf16.msra.mxu1 %v4048_v3 }
  0x74   :  { %1454 = vmatprep.subr.bf16.mxu1 %v4051_v4 }
  0x76   :  { %1414 = vmatpush2.bf16.msra.mxu0 %v4053_v5 }
  0x77   :  { %1465 = vmatprep.subr.bf16.mxu0 %v4057_v6  ;;  %1455 = vmatpush2.bf16.msra.mxu1 %v4054_v7 }
  0x78   :  { %1506 = vmatprep.subr.bf16.mxu1 %v4060_v8 }
  0xb2   :  { %v522_v43 = vpop.permute.xlu0 %521  ;;  %v641_v44 = vpop.permute.xlu1 %640 }
  0xb3   :  { %v562_v49 = vmul.f32 %v549_v31, %v522_v43  ;;  %v563_v50 = vmul.f32 %v553_v32, %v522_v43  ;;  %v564_v51 = vmul.f32 %v557_v33, %v522_v43  ;;  %v565_v52 = vmul.f32 %v561_v34, %v522_v43 }
  0xb4   :  { %v679_v13 = vmul.f32 %v666_v57, %v641_v44  ;;  %v680_v14 = vmul.f32 %v670_v58, %v641_v44  ;;  %v681_v15 = vmul.f32 %v674_v59, %v641_v44  ;;  %v682_v19 = vmul.f32 %v678_v60, %v641_v44 }
  0xb5   :  { %v587_v2 = vadd.f32 %v4986_v27, %v562_v49  ;;  %v588_v3 = vadd.f32 %v4989_v28, %v563_v50  ;;  %v589_v4 = vadd.f32 %v4992_v29, %v564_v51  ;;  %v590_v5 = vadd.f32 %v4995_v30, %v565_v52 }
  0xb7   :  { %v593_v6 = vpop.permute.xlu0 %592  ;;  %v689_v7 = vpop.permute.xlu1 %688 }
  0xb8   :  { %v631_v8 = vmul.f32 %v618_v53, %v593_v6  ;;  %v632_v9 = vmul.f32 %v622_v54, %v593_v6  ;;  %v633_v10 = vmul.f32 %v626_v55, %v593_v6  ;;  %v634_v11 = vmul.f32 %v630_v56, %v593_v6 }
  0xb9   :  { %v728_v25 = vmul.f32 %v718_v62, %v689_v7  ;;  %v730_v26 = vmul.f32 %v726_v0, %v689_v7  ;;  %v727_v35 = vmul.f32 %v714_v61, %v689_v7  ;;  %v729_v36 = vmul.f32 %v722_v63, %v689_v7 }
  0xba   :  { %v635_v20 = vadd.f32 %v631_v8, %v587_v2  ;;  %v636_v21 = vadd.f32 %v632_v9, %v588_v3  ;;  %v637_v22 = vadd.f32 %v633_v10, %v589_v4  ;;  %v638_v23 = vadd.f32 %v634_v11, %v590_v5 }
  0xbb   :  { %v3013_v24 = vpop.permute.xlu0 %3012 }
  0xbc   :  { %v3015_v37 = vmul.f32 %v3013_v24, %v618_v53  ;;  %v3016_v38 = vmul.f32 %v3013_v24, %v622_v54  ;;  %v3017_v39 = vmul.f32 %v3013_v24, %v626_v55  ;;  %v3018_v40 = vmul.f32 %v3013_v24, %v630_v56  ;;  %v3001_v41 = vpop.permute.xlu1 %3000  ;;  %v4066_v24 = vld [vmem:[#allocation2 + $0x2cc] ss:$16 sps:$4 sm:$0xff]  }
  0xbd   :  { %v3003_v42 = vmul.f32 %v3001_v41, %v549_v31  ;;  %v3004_v43 = vmul.f32 %v3001_v41, %v553_v32  ;;  %v3005_v45 = vmul.f32 %v3001_v41, %v557_v33  ;;  %v3006_v46 = vmul.f32 %v3001_v41, %v561_v34  ;;  %v4073_v41 = vld [vmem:[#allocation2 + $0x88] ss:$16 sps:$4 sm:$0xff]  }
  0xbe   :  { %v684_v47 = vadd.f32 %v680_v14, %v636_v21  ;;  %v686_v44 = vadd.f32 %v682_v19, %v638_v23  ;;  %v683_v48 = vadd.f32 %v679_v13, %v635_v20  ;;  %v685_v49 = vadd.f32 %v681_v15, %v637_v22  ;;  %v4055_v19 = vld [vmem:[#allocation2 + $0xe8] ss:$16 sps:$4 sm:$0xff]  }
  0xbf   :  { %v3007_v50 = vadd.f32 %v3003_v42, %v4986_v27  ;;  %v3008_v51 = vadd.f32 %v3004_v43, %v4989_v28  ;;  %v3009_v52 = vadd.f32 %v3005_v45, %v4992_v29  ;;  %v3010_v53 = vadd.f32 %v3006_v46, %v4995_v30  ;;  %v4058_v20 = vld [vmem:[#allocation2 + $0x2e8] ss:$16 sps:$4 sm:$0xff]   ;;  %v4081_v43 = vld [vmem:[#allocation2 + $0x6c] ss:$16 sps:$4 sm:$0xff]  }
  0xc0   :  { %v3037_v54 = vpop.permute.xlu0 %3036  ;;  %v732_v55 = vadd.f32 %v728_v25, %v684_v47  ;;  %v734_v56 = vadd.f32 %v730_v26, %v686_v44  ;;  %v731_v2 = vadd.f32 %v727_v35, %v683_v48  ;;  %v733_v31 = vadd.f32 %v729_v36, %v685_v49  ;;  %v4061_v25 = vld [vmem:[#allocation2 + $0xc8] ss:$16 sps:$4 sm:$0xff]   ;;  %v4069_v35 = vld [vmem:[#allocation2 + $0xac] ss:$16 sps:$4 sm:$0xff]  }
  0xc1   :  { %v3025_v32 = vpop.permute.xlu1 %3024  ;;  %v3019_v33 = vadd.f32 %v3015_v37, %v3007_v50  ;;  %v3020_v34 = vadd.f32 %v3016_v38, %v3008_v51  ;;  %v3021_v3 = vadd.f32 %v3017_v39, %v3009_v52  ;;  %v3022_v4 = vadd.f32 %v3018_v40, %v3010_v53  ;;  %v4064_v26 = vld [vmem:[#allocation2 + $0x2c8] ss:$16 sps:$4 sm:$0xff]   ;;  %v4072_v36 = vld [vmem:[#allocation2 + $0x2ac] ss:$16 sps:$4 sm:$0xff]  }
  0xc2   :  { %v3027_v5 = vmul.f32 %v3025_v32, %v666_v57  ;;  %v3028_v6 = vmul.f32 %v3025_v32, %v670_v58  ;;  %v3029_v7 = vmul.f32 %v3025_v32, %v674_v59  ;;  %v3030_v27 = vmul.f32 %v3025_v32, %v678_v60  ;;  %v4067_v37 = vld [vmem:[#allocation2 + $0xa8] ss:$16 sps:$4 sm:$0xff]   ;;  %v4075_v39 = vld [vmem:[#allocation2 + $0x8c] ss:$16 sps:$4 sm:$0xff]  }
  0xc3   :  { %v3039_v8 = vmul.f32 %v3037_v54, %v714_v61  ;;  %v3040_v28 = vmul.f32 %v3037_v54, %v718_v62  ;;  %v3041_v9 = vmul.f32 %v3037_v54, %v722_v63  ;;  %v3042_v29 = vmul.f32 %v3037_v54, %v726_v0  ;;  %v4063_v0 = vld [vmem:[#allocation2 + $0xcc] ss:$16 sps:$4 sm:$0xff]   ;;  %v4070_v38 = vld [vmem:[#allocation2 + $0x2a8] ss:$16 sps:$4 sm:$0xff]  }
  0xc4   :  { %v3031_v10 = vadd.f32 %v3027_v5, %v3019_v33  ;;  %v3032_v30 = vadd.f32 %v3028_v6, %v3020_v34  ;;  %v3033_v11 = vadd.f32 %v3029_v7, %v3021_v3  ;;  %v3034_v13 = vadd.f32 %v3030_v27, %v3022_v4  ;;  %v4078_v40 = vld [vmem:[#allocation2 + $0x28c] ss:$16 sps:$4 sm:$0xff]   ;;  %v4076_v42 = vld [vmem:[#allocation2 + $0x288] ss:$16 sps:$4 sm:$0xff]  }
  0xc5   :  { %v736_v14 = vmax.f32 %v732_v55, 0.0  ;;  %v738_v15 = vmax.f32 %v734_v56, 0.0  ;;  %v735_v21 = vmax.f32 %v731_v2, 0.0  ;;  %v737_v22 = vmax.f32 %v733_v31, 0.0  ;;  %v4084_v45 = vld [vmem:[#allocation2 + $0x26c] ss:$16 sps:$4 sm:$0xff]  }
  0xc6   :  { %v5027_v23 = vadd.f32 %v3039_v8, %v3031_v10  ;;  %v5029_v57 = vadd.f32 %v3041_v9, %v3033_v11  ;;  %v5031_v58 = vadd.f32 %v3040_v28, %v3032_v30  ;;  %v5033_v59 = vadd.f32 %v3042_v29, %v3034_v13  ;;  %v4079_v46 = vld [vmem:[#allocation2 + $0x68] ss:$16 sps:$4 sm:$0xff]   ;;  %v4087_v44 = vld [vmem:[#allocation2 + $0x4c] ss:$16 sps:$4 sm:$0xff]  }
  0xc7   :  { %v5035_v60 = vpack.c.bf16 %v736_v14, %v736_v14  ;;  %v5037_v61 = vpack.c.bf16 %v738_v15, %v738_v15  ;;  %v5039_v62 = vpack.c.bf16 %v735_v21, %v735_v21  ;;  %v5041_v63 = vpack.c.bf16 %v737_v22, %v737_v22  ;;  %v4082_v47 = vld [vmem:[#allocation2 + $0x268] ss:$16 sps:$4 sm:$0xff]   ;;  %v4090_v48 = vld [vmem:[#allocation2 + $0x24c] ss:$16 sps:$4 sm:$0xff]  }
  0xc8   :  { %v4085_v49 = vld [vmem:[#allocation2 + $0x48] ss:$16 sps:$4 sm:$0xff]   ;;  %v4093_v51 = vld [vmem:[#allocation2 + $0x2c] ss:$16 sps:$4 sm:$0xff]  }
  0xc9   :  { %1415 = vmatprep.mubr.bf16.mxu0 %v5035_v60  ;;  %1456 = vmatprep.mubr.bf16.mxu1 %v5037_v61  ;;  %v4088_v50 = vld [vmem:[#allocation2 + $0x248] ss:$16 sps:$4 sm:$0xff]   ;;  %v4096_v52 = vld [vmem:[#allocation2 + $0x22c] ss:$16 sps:$4 sm:$0xff]  }
  0xca   :  { %1416 = vmatmul.mubr.bf16.vlgmr.msra.gmra.mxu0 %v5039_v62  ;;  %1457 = vmatmul.mubr.bf16.vlgmr.msra.gmra.mxu1 %v5041_v63  ;;  %v4091_v53 = vld [vmem:[#allocation2 + $0x28] ss:$16 sps:$4 sm:$0xff]   ;;  %v4099_v55 = vld [vmem:[#allocation2 + $0xc] ss:$16 sps:$4 sm:$0xff]  }
  0xcb   :  { %1466 = vmatpush1.bf16.msra.mxu0 %v4055_v19  ;;  %1507 = vmatpush1.bf16.msra.mxu1 %v4058_v20  ;;  %v4094_v54 = vld [vmem:[#allocation2 + $0x228] ss:$16 sps:$4 sm:$0xff]   ;;  %v4102_v56 = vld [vmem:[#allocation2 + $0x20c] ss:$16 sps:$4 sm:$0xff]  }
  0xcc   :  { %1497 = vmatprep.mubr.bf16.mxu0 %v5035_v60  ;;  %1538 = vmatprep.mubr.bf16.mxu1 %v5037_v61  ;;  %v4097_v2 = vld [vmem:[#allocation2 + $0x8] ss:$16 sps:$4 sm:$0xff]   ;;  %v4105_v32 = vld [vmem:[#allocation2 + $0x1ec] ss:$16 sps:$4 sm:$0xff]  }
  0xcd   :  { %1467 = vmatprep.subr.bf16.mxu0 %v4063_v0  ;;  %1508 = vmatprep.subr.bf16.mxu1 %v4066_v24  ;;  %v4100_v31 = vld [vmem:[#allocation2 + $0x208] ss:$16 sps:$4 sm:$0xff]   ;;  %v4108_v33 = vld [vmem:[#allocation2 + $0x3ec] ss:$16 sps:$4 sm:$0xff]  }
  0xce   :  { %v4103_v34 = vld [vmem:[#allocation2 + $0x1e8] ss:$16 sps:$4 sm:$0xff]   ;;  %v4111_v4 = vld [vmem:[#allocation2 + $0x1cc] ss:$16 sps:$4 sm:$0xff]  }
  0xcf   :  { %1468 = vmatpush1.bf16.msra.mxu0 %v4061_v25  ;;  %1509 = vmatpush1.bf16.msra.mxu1 %v4064_v26  ;;  %v4106_v3 = vld [vmem:[#allocation2 + $0x3e8] ss:$16 sps:$4 sm:$0xff]   ;;  %v4114_v5 = vld [vmem:[#allocation2 + $0x3cc] ss:$16 sps:$4 sm:$0xff]  }
  0xd0   :  { %1469 = vmatprep.subr.bf16.mxu0 %v4069_v35  ;;  %1510 = vmatprep.subr.bf16.mxu1 %v4072_v36  ;;  %v4109_v6 = vld [vmem:[#allocation2 + $0x1c8] ss:$16 sps:$4 sm:$0xff]   ;;  %v4117_v27 = vld [vmem:[#allocation2 + $0x1ac] ss:$16 sps:$4 sm:$0xff]  }
  0xd1   :  { %v4112_v7 = vld [vmem:[#allocation2 + $0x3c8] ss:$16 sps:$4 sm:$0xff]   ;;  %v4120_v8 = vld [vmem:[#allocation2 + $0x3ac] ss:$16 sps:$4 sm:$0xff]  }
  0xd2   :  { %v4115_v28 = vld [vmem:[#allocation2 + $0x1a8] ss:$16 sps:$4 sm:$0xff]   ;;  %v4123_v29 = vld [vmem:[#allocation2 + $0x18c] ss:$16 sps:$4 sm:$0xff]  }
  0xd3   :  { %1470 = vmatpush1.bf16.msra.mxu0 %v4067_v37  ;;  %1511 = vmatpush1.bf16.msra.mxu1 %v4070_v38  ;;  %v4118_v9 = vld [vmem:[#allocation2 + $0x3a8] ss:$16 sps:$4 sm:$0xff]   ;;  %v4126_v10 = vld [vmem:[#allocation2 + $0x38c] ss:$16 sps:$4 sm:$0xff]  }
  0xd4   :  { %1471 = vmatprep.subr.bf16.mxu0 %v4075_v39  ;;  %1512 = vmatprep.subr.bf16.mxu1 %v4078_v40  ;;  %v4121_v30 = vld [vmem:[#allocation2 + $0x188] ss:$16 sps:$4 sm:$0xff]   ;;  %v4129_v13 = vld [vmem:[#allocation2 + $0x16c] ss:$16 sps:$4 sm:$0xff]   ;;  %v4153_v40 = vld [vmem:[#allocation5 + $0xe4] ss:$16 sps:$4 sm:$0xff]  }
  0xd5   :  { %v4124_v11 = vld [vmem:[#allocation2 + $0x388] ss:$16 sps:$4 sm:$0xff]   ;;  %v4132_v14 = vld [vmem:[#allocation2 + $0x36c] ss:$16 sps:$4 sm:$0xff]  }
  0xd6   :  { %v4127_v15 = vld [vmem:[#allocation2 + $0x168] ss:$16 sps:$4 sm:$0xff]   ;;  %v4135_v20 = vld [vmem:[#allocation2 + $0x14c] ss:$16 sps:$4 sm:$0xff]  }
  0xd7   :  { %1472 = vmatpush1.bf16.msra.mxu0 %v4073_v41  ;;  %1513 = vmatpush1.bf16.msra.mxu1 %v4076_v42  ;;  %v4130_v19 = vld [vmem:[#allocation2 + $0x368] ss:$16 sps:$4 sm:$0xff]   ;;  %v4138_v21 = vld [vmem:[#allocation2 + $0x34c] ss:$16 sps:$4 sm:$0xff]   ;;  %v4151_v41 = vld [vmem:[#allocation5 + $0xe0] ss:$16 sps:$4 sm:$0xff]  }
  0xd8   :  { %1473 = vmatprep.subr.bf16.mxu0 %v4081_v43  ;;  %1514 = vmatprep.subr.bf16.mxu1 %v4084_v45  ;;  %v4133_v22 = vld [vmem:[#allocation2 + $0x148] ss:$16 sps:$4 sm:$0xff]   ;;  %v4141_v24 = vld [vmem:[#allocation2 + $0x12c] ss:$16 sps:$4 sm:$0xff]   ;;  %v4156_v42 = vld [vmem:[#allocation5 + $0xc4] ss:$16 sps:$4 sm:$0xff]  }
  0xd9   :  { %v4136_v0 = vld [vmem:[#allocation2 + $0x348] ss:$16 sps:$4 sm:$0xff]   ;;  %v4144_v25 = vld [vmem:[#allocation2 + $0x32c] ss:$16 sps:$4 sm:$0xff]   ;;  %v4154_v43 = vld [vmem:[#allocation5 + $0xc0] ss:$16 sps:$4 sm:$0xff]  }
  0xda   :  { %v4139_v26 = vld [vmem:[#allocation2 + $0x128] ss:$16 sps:$4 sm:$0xff]   ;;  %v4147_v36 = vld [vmem:[#allocation2 + $0x10c] ss:$16 sps:$4 sm:$0xff]   ;;  %v4159_v45 = vld [vmem:[#allocation5 + $0xa4] ss:$16 sps:$4 sm:$0xff]  }
  0xdb   :  { %1474 = vmatpush1.bf16.msra.mxu0 %v4079_v46  ;;  %1515 = vmatpush1.bf16.msra.mxu1 %v4082_v47  ;;  %v4142_v35 = vld [vmem:[#allocation2 + $0x328] ss:$16 sps:$4 sm:$0xff]   ;;  %v4150_v37 = vld [vmem:[#allocation2 + $0x30c] ss:$16 sps:$4 sm:$0xff]   ;;  %v4157_v46 = vld [vmem:[#allocation5 + $0xa0] ss:$16 sps:$4 sm:$0xff]  }
  0xdc   :  { %1475 = vmatprep.subr.bf16.mxu0 %v4087_v44  ;;  %1516 = vmatprep.subr.bf16.mxu1 %v4090_v48  ;;  %v4145_v38 = vld [vmem:[#allocation2 + $0x108] ss:$16 sps:$4 sm:$0xff]   ;;  %v4162_v47 = vld [vmem:[#allocation5 + $0x84] ss:$16 sps:$4 sm:$0xff]   ;;  %v4199_v44 = vld [vmem:[#allocation5 + $0x2e0] ss:$16 sps:$4 sm:$0xff]  }
  0xdd   :  { %v4148_v39 = vld [vmem:[#allocation2 + $0x308] ss:$16 sps:$4 sm:$0xff]   ;;  %v4201_v48 = vld [vmem:[#allocation5 + $0x2e4] ss:$16 sps:$4 sm:$0xff]  }
  0xdf   :  { %1476 = vmatpush1.bf16.msra.mxu0 %v4085_v49  ;;  %1517 = vmatpush1.bf16.msra.mxu1 %v4088_v50  ;;  %v4160_v49 = vld [vmem:[#allocation5 + $0x80] ss:$16 sps:$4 sm:$0xff]   ;;  %v4165_v50 = vld [vmem:[#allocation5 + $0x64] ss:$16 sps:$4 sm:$0xff]  }
  0xe0   :  { %1477 = vmatprep.subr.bf16.mxu0 %v4093_v51  ;;  %1518 = vmatprep.subr.bf16.mxu1 %v4096_v52  ;;  %v4163_v51 = vld [vmem:[#allocation5 + $0x60] ss:$16 sps:$4 sm:$0xff]  }
  0xe1   :  { %v4205_v52 = vld [vmem:[#allocation5 + $0x2c0] ss:$16 sps:$4 sm:$0xff]  }
  0xe3   :  { %1478 = vmatpush1.bf16.msra.mxu0 %v4091_v53  ;;  %1519 = vmatpush1.bf16.msra.mxu1 %v4094_v54  ;;  %v4207_v53 = vld [vmem:[#allocation5 + $0x2c4] ss:$16 sps:$4 sm:$0xff]  }
  0xe4   :  { %1479 = vmatprep.subr.bf16.mxu0 %v4099_v55  ;;  %1520 = vmatprep.subr.bf16.mxu1 %v4102_v56  ;;  %v4168_v54 = vld [vmem:[#allocation5 + $0x44] ss:$16 sps:$4 sm:$0xff]   ;;  %v4166_v55 = vld [vmem:[#allocation5 + $0x40] ss:$16 sps:$4 sm:$0xff]  }
  0xe5   :  { %v4211_v56 = vld [vmem:[#allocation5 + $0x2a0] ss:$16 sps:$4 sm:$0xff]  }
  0xe7   :  { %1480 = vmatpush1.bf16.msra.mxu0 %v4097_v2  ;;  %1521 = vmatpush1.bf16.msra.mxu1 %v4100_v31  ;;  %v4213_v2 = vld [vmem:[#allocation5 + $0x2a4] ss:$16 sps:$4 sm:$0xff]  }
  0xe8   :  { %1481 = vmatprep.subr.bf16.mxu0 %v4105_v32  ;;  %1522 = vmatprep.subr.bf16.mxu1 %v4108_v33  ;;  %v4171_v31 = vld [vmem:[#allocation5 + $0x24] ss:$16 sps:$4 sm:$0xff]   ;;  %v4169_v32 = vld [vmem:[#allocation5 + $0x20] ss:$16 sps:$4 sm:$0xff]  }
  0xe9   :  { %v4217_v33 = vld [vmem:[#allocation5 + $0x280] ss:$16 sps:$4 sm:$0xff]  }
  0xeb   :  { %1482 = vmatpush2.bf16.msra.mxu0 %v4103_v34  ;;  %1523 = vmatpush2.bf16.msra.mxu1 %v4106_v3  ;;  %v4219_v34 = vld [vmem:[#allocation5 + $0x284] ss:$16 sps:$4 sm:$0xff]  }
  0xec   :  { %1483 = vmatprep.subr.bf16.mxu0 %v4111_v4  ;;  %1524 = vmatprep.subr.bf16.mxu1 %v4114_v5  ;;  %v4174_v3 = vld [vmem:[#allocation5 + $0x4] ss:$16 sps:$4 sm:$0xff]   ;;  %v4172_v4 = vld [vmem:[#allocation5] ss:$16 sps:$4 sm:$0xff]  }
  0xed   :  { %v4223_v5 = vld [vmem:[#allocation5 + $0x260] ss:$16 sps:$4 sm:$0xff]  }
  0xef   :  { %1484 = vmatpush2.bf16.msra.mxu0 %v4109_v6  ;;  %1525 = vmatpush2.bf16.msra.mxu1 %v4112_v7  ;;  %v4225_v6 = vld [vmem:[#allocation5 + $0x264] ss:$16 sps:$4 sm:$0xff]  }
  0xf0   :  { %1485 = vmatprep.subr.bf16.mxu0 %v4117_v27  ;;  %1526 = vmatprep.subr.bf16.mxu1 %v4120_v8  ;;  %v4177_v7 = vld [vmem:[#allocation5 + $0x1e4] ss:$16 sps:$4 sm:$0xff]   ;;  %v4175_v27 = vld [vmem:[#allocation5 + $0x1e0] ss:$16 sps:$4 sm:$0xff]  }
  0xf1   :  { %v4229_v8 = vld [vmem:[#allocation5 + $0x240] ss:$16 sps:$4 sm:$0xff]  }
  0xf3   :  { %1486 = vmatpush2.bf16.msra.mxu0 %v4115_v28  ;;  %1527 = vmatpush2.bf16.msra.mxu1 %v4118_v9  ;;  %v4231_v28 = vld [vmem:[#allocation5 + $0x244] ss:$16 sps:$4 sm:$0xff]  }
  0xf4   :  { %1487 = vmatprep.subr.bf16.mxu0 %v4123_v29  ;;  %1528 = vmatprep.subr.bf16.mxu1 %v4126_v10  ;;  %v4180_v9 = vld [vmem:[#allocation5 + $0x1c4] ss:$16 sps:$4 sm:$0xff]   ;;  %v4178_v29 = vld [vmem:[#allocation5 + $0x1c0] ss:$16 sps:$4 sm:$0xff]  }
  0xf5   :  { %v4235_v10 = vld [vmem:[#allocation5 + $0x220] ss:$16 sps:$4 sm:$0xff]  }
  0xf7   :  { %1488 = vmatpush2.bf16.msra.mxu0 %v4121_v30  ;;  %1529 = vmatpush2.bf16.msra.mxu1 %v4124_v11  ;;  %v4237_v30 = vld [vmem:[#allocation5 + $0x224] ss:$16 sps:$4 sm:$0xff]  }
  0xf8   :  { %1489 = vmatprep.subr.bf16.mxu0 %v4129_v13  ;;  %1530 = vmatprep.subr.bf16.mxu1 %v4132_v14  ;;  %v4183_v11 = vld [vmem:[#allocation5 + $0x1a4] ss:$16 sps:$4 sm:$0xff]   ;;  %v4181_v13 = vld [vmem:[#allocation5 + $0x1a0] ss:$16 sps:$4 sm:$0xff]  }
  0xf9   :  { %v4241_v14 = vld [vmem:[#allocation5 + $0x200] ss:$16 sps:$4 sm:$0xff]  }
  0xfb   :  { %1490 = vmatpush2.bf16.msra.mxu0 %v4127_v15  ;;  %1531 = vmatpush2.bf16.msra.mxu1 %v4130_v19  ;;  %v4243_v15 = vld [vmem:[#allocation5 + $0x204] ss:$16 sps:$4 sm:$0xff]  }
  0xfc   :  { %1491 = vmatprep.subr.bf16.mxu0 %v4135_v20  ;;  %1532 = vmatprep.subr.bf16.mxu1 %v4138_v21  ;;  %v4186_v19 = vld [vmem:[#allocation5 + $0x184] ss:$16 sps:$4 sm:$0xff]   ;;  %v4184_v20 = vld [vmem:[#allocation5 + $0x180] ss:$16 sps:$4 sm:$0xff]  }
  0xfd   :  { %v4247_v21 = vld [vmem:[#allocation5 + $0x3e0] ss:$16 sps:$4 sm:$0xff]  }
  0xff   :  { %1492 = vmatpush2.bf16.msra.mxu0 %v4133_v22  ;;  %1533 = vmatpush2.bf16.msra.mxu1 %v4136_v0  ;;  %v4249_v22 = vld [vmem:[#allocation5 + $0x3e4] ss:$16 sps:$4 sm:$0xff]  }
 0x100   :  { %1493 = vmatprep.subr.bf16.mxu0 %v4141_v24  ;;  %1534 = vmatprep.subr.bf16.mxu1 %v4144_v25  ;;  %v4189_v0 = vld [vmem:[#allocation5 + $0x164] ss:$16 sps:$4 sm:$0xff]   ;;  %v4187_v24 = vld [vmem:[#allocation5 + $0x160] ss:$16 sps:$4 sm:$0xff]  }
 0x101   :  { %v4253_v25 = vld [vmem:[#allocation5 + $0x3c0] ss:$16 sps:$4 sm:$0xff]  }
 0x103   :  { %1494 = vmatpush2.bf16.msra.mxu0 %v4139_v26  ;;  %1535 = vmatpush2.bf16.msra.mxu1 %v4142_v35  ;;  %v4255_v26 = vld [vmem:[#allocation5 + $0x3c4] ss:$16 sps:$4 sm:$0xff]  }
 0x104   :  { %1495 = vmatprep.subr.bf16.mxu0 %v4147_v36  ;;  %1536 = vmatprep.subr.bf16.mxu1 %v4150_v37  ;;  %v4192_v35 = vld [vmem:[#allocation5 + $0x144] ss:$16 sps:$4 sm:$0xff]   ;;  %v4190_v36 = vld [vmem:[#allocation5 + $0x140] ss:$16 sps:$4 sm:$0xff]  }
 0x105   :  { %v4259_v37 = vld [vmem:[#allocation5 + $0x3a0] ss:$16 sps:$4 sm:$0xff]  }
 0x107   :  { %1496 = vmatpush2.bf16.msra.mxu0 %v4145_v38  ;;  %1537 = vmatpush2.bf16.msra.mxu1 %v4148_v39  ;;  %v4261_v38 = vld [vmem:[#allocation5 + $0x3a4] ss:$16 sps:$4 sm:$0xff]  }
 0x108   :  { %2227 = vmatprep.subr.bf16.mxu0 %v4153_v40  ;;  %2268 = vmatprep.subr.bf16.mxu1 %v4201_v48  ;;  %v4195_v39 = vld [vmem:[#allocation5 + $0x124] ss:$16 sps:$4 sm:$0xff]   ;;  %v4193_v40 = vld [vmem:[#allocation5 + $0x120] ss:$16 sps:$4 sm:$0xff]  }
 0x109   :  { %v4277_v48 = vld [vmem:[#allocation5 + $0x340] ss:$16 sps:$4 sm:$0xff]  }
 0x10a   :  { %1498 = vmatmul.mubr.bf16.vlgmr.msra.gmra.mxu0 %v5039_v62  ;;  %1539 = vmatmul.mubr.bf16.vlgmr.msra.gmra.mxu1 %v5041_v63 }
 0x10b   :  { %2228 = vmatpush1.bf16.msra.mxu0 %v4151_v41  ;;  %2269 = vmatpush1.bf16.msra.mxu1 %v4199_v44  ;;  %v4265_v41 = vld [vmem:[#allocation5 + $0x380] ss:$16 sps:$4 sm:$0xff]   ;;  %v4204_v44 = vld [vmem:[#allocation5 + $0xec] ss:$16 sps:$4 sm:$0xff]  }
 0x10c   :  { %2229 = vmatprep.subr.bf16.mxu0 %v4156_v42  ;;  %2270 = vmatprep.subr.bf16.mxu1 %v4207_v53  ;;  %v4267_v42 = vld [vmem:[#allocation5 + $0x384] ss:$16 sps:$4 sm:$0xff]   ;;  %v4289_v53 = vld [vmem:[#allocation5 + $0x300] ss:$16 sps:$4 sm:$0xff]  }
 0x10f   :  { %2230 = vmatpush1.bf16.msra.mxu0 %v4154_v43  ;;  %2271 = vmatpush1.bf16.msra.mxu1 %v4205_v52  ;;  %v4198_v43 = vld [vmem:[#allocation5 + $0x104] ss:$16 sps:$4 sm:$0xff]  }
 0x110   :  { %2231 = vmatprep.subr.bf16.mxu0 %v4159_v45  ;;  %2272 = vmatprep.subr.bf16.mxu1 %v4213_v2  ;;  %v4196_v45 = vld [vmem:[#allocation5 + $0x100] ss:$16 sps:$4 sm:$0xff]   ;;  %v4291_v52 = vld [vmem:[#allocation5 + $0x304] ss:$16 sps:$4 sm:$0xff]  }
 0x113   :  { %2232 = vmatpush1.bf16.msra.mxu0 %v4157_v46  ;;  %2273 = vmatpush1.bf16.msra.mxu1 %v4211_v56  ;;  %v4271_v46 = vld [vmem:[#allocation5 + $0x360] ss:$16 sps:$4 sm:$0xff]  }
 0x114   :  { %2233 = vmatprep.subr.bf16.mxu0 %v4162_v47  ;;  %2274 = vmatprep.subr.bf16.mxu1 %v4219_v34  ;;  %v4273_v47 = vld [vmem:[#allocation5 + $0x364] ss:$16 sps:$4 sm:$0xff]  }
 0x117   :  { %2234 = vmatpush1.bf16.msra.mxu0 %v4160_v49  ;;  %2275 = vmatpush1.bf16.msra.mxu1 %v4217_v33  ;;  %v4279_v49 = vld [vmem:[#allocation5 + $0x344] ss:$16 sps:$4 sm:$0xff]  }
 0x118   :  { %2235 = vmatprep.subr.bf16.mxu0 %v4165_v50  ;;  %2276 = vmatprep.subr.bf16.mxu1 %v4225_v6  ;;  %v4285_v50 = vld [vmem:[#allocation5 + $0x324] ss:$16 sps:$4 sm:$0xff]  }
 0x11b   :  { %2236 = vmatpush1.bf16.msra.mxu0 %v4163_v51  ;;  %2277 = vmatpush1.bf16.msra.mxu1 %v4223_v5  ;;  %v4283_v51 = vld [vmem:[#allocation5 + $0x320] ss:$16 sps:$4 sm:$0xff]  }
 0x11c   :  { %2237 = vmatprep.subr.bf16.mxu0 %v4168_v54  ;;  %2278 = vmatprep.subr.bf16.mxu1 %v4231_v28  ;;  %v4297_v54 = vld [vmem:[#allocation5 + $0x2ec] ss:$16 sps:$4 sm:$0xff]  }
 0x11f   :  { %2238 = vmatpush1.bf16.msra.mxu0 %v4166_v55  ;;  %2279 = vmatpush1.bf16.msra.mxu1 %v4229_v8  ;;  %v5054_v55 = vld [vmem:[%s5329_s4] sm:$0xf] }
 0x120   :  { %2239 = vmatprep.subr.bf16.mxu0 %v4171_v31  ;;  %2280 = vmatprep.subr.bf16.mxu1 %v4237_v30  ;;  %v232_v56 = vrot.slane %v5054_v55, %v4972_v12  ;;  %v236_v2 = vrot.slane %v5054_v55, %v4974_v16 }
 0x122   :  { %v249_v31 = vpack.c.bf16 %v232_v56, %v232_v56  ;;  %v4274_v56 = vld [vmem:[#allocation5 + $0x168] ss:$16 sps:$4 sm:$0xff]  }
 0x123   :  { %2240 = vmatpush1.bf16.msra.mxu0 %v4169_v32  ;;  %2281 = vmatpush1.bf16.msra.mxu1 %v4235_v10  ;;  %v250_v32 = vpack.c.bf16 %v236_v2, %v236_v2 }
 0x124   :  { %2241 = vmatprep.subr.bf16.mxu0 %v4174_v3  ;;  %2282 = vmatprep.subr.bf16.mxu1 %v4243_v15  ;;  %v1552_v33 = vpack.i.b16 %v249_v31, %v249_v31  ;;  %v4282_v31 = vld [vmem:[#allocation5 + $0x14c] ss:$16 sps:$4 sm:$0xff]  }
 0x125   :  { %v1559_v34 = vpack.i.b16 %v250_v32, %v250_v32 }
 0x126   :  { %v5061_v6 = vrot.slane %v1552_v33, %v4972_v12  ;;  %v4280_v33 = vld [vmem:[#allocation5 + $0x148] ss:$16 sps:$4 sm:$0xff]  }
 0x127   :  { %2242 = vmatpush1.bf16.msra.mxu0 %v4172_v4  ;;  %2283 = vmatpush1.bf16.msra.mxu1 %v4241_v14 }
 0x128   :  { %2243 = vmatprep.subr.bf16.mxu0 %v4177_v7  ;;  %2284 = vmatprep.subr.bf16.mxu1 %v4249_v22  ;;  %v4210_v22 = vld [vmem:[#allocation5 + $0xcc] ss:$16 sps:$4 sm:$0xff]  }
 0x12b   :  { %2244 = vmatpush2.bf16.msra.mxu0 %v4175_v27  ;;  %2285 = vmatpush2.bf16.msra.mxu1 %v4247_v21 }
 0x12c   :  { %2245 = vmatprep.subr.bf16.mxu0 %v4180_v9  ;;  %2286 = vmatprep.subr.bf16.mxu1 %v4255_v26  ;;  %v5064_v9 = vrot.slane %v1559_v34, %v4972_v12  ;;  %v4222_v26 = vld [vmem:[#allocation5 + $0x8c] ss:$16 sps:$4 sm:$0xff]  }
 0x12f   :  { %2246 = vmatpush2.bf16.msra.mxu0 %v4178_v29  ;;  %2287 = vmatpush2.bf16.msra.mxu1 %v4253_v25  ;;  %v4214_v25 = vld [vmem:[#allocation5 + $0xa8] ss:$16 sps:$4 sm:$0xff]  }
 0x130   :  { %2247 = vmatprep.subr.bf16.mxu0 %v4183_v11  ;;  %2288 = vmatprep.subr.bf16.mxu1 %v4261_v38  ;;  %v4234_v38 = vld [vmem:[#allocation5 + $0x4c] ss:$16 sps:$4 sm:$0xff]  }
 0x133   :  { %2248 = vmatpush2.bf16.msra.mxu0 %v4181_v13  ;;  %2289 = vmatpush2.bf16.msra.mxu1 %v4259_v37  ;;  %v4226_v37 = vld [vmem:[#allocation5 + $0x68] ss:$16 sps:$4 sm:$0xff]  }
 0x134   :  { %2249 = vmatprep.subr.bf16.mxu0 %v4186_v19  ;;  %2290 = vmatprep.subr.bf16.mxu1 %v4267_v42  ;;  %v4246_v42 = vld [vmem:[#allocation5 + $0xc] ss:$16 sps:$4 sm:$0xff]  }
 0x137   :  { %2250 = vmatpush2.bf16.msra.mxu0 %v4184_v20  ;;  %2291 = vmatpush2.bf16.msra.mxu1 %v4265_v41  ;;  %v4202_v20 = vld [vmem:[#allocation5 + $0xe8] ss:$16 sps:$4 sm:$0xff]  }
 0x138   :  { %2251 = vmatprep.subr.bf16.mxu0 %v4189_v0  ;;  %2292 = vmatprep.subr.bf16.mxu1 %v4273_v47  ;;  %v4208_v0 = vld [vmem:[#allocation5 + $0xc8] ss:$16 sps:$4 sm:$0xff]   ;;  %v4258_v47 = vld [vmem:[#allocation5 + $0x1cc] ss:$16 sps:$4 sm:$0xff]  }
 0x139   :  { %v4238_v41 = vld [vmem:[#allocation5 + $0x28] ss:$16 sps:$4 sm:$0xff]  }
 0x13b   :  { %2252 = vmatpush2.bf16.msra.mxu0 %v4187_v24  ;;  %2293 = vmatpush2.bf16.msra.mxu1 %v4271_v46  ;;  %v4216_v24 = vld [vmem:[#allocation5 + $0xac] ss:$16 sps:$4 sm:$0xff]   ;;  %v4250_v46 = vld [vmem:[#allocation5 + $0x1e8] ss:$16 sps:$4 sm:$0xff]  }
 0x13c   :  { %2253 = vmatprep.subr.bf16.mxu0 %v4192_v35  ;;  %2294 = vmatprep.subr.bf16.mxu1 %v4279_v49  ;;  %v4220_v35 = vld [vmem:[#allocation5 + $0x88] ss:$16 sps:$4 sm:$0xff]  }
 0x13d   :  { %v4262_v49 = vld [vmem:[#allocation5 + $0x1a8] ss:$16 sps:$4 sm:$0xff]  }
 0x13f   :  { %2254 = vmatpush2.bf16.msra.mxu0 %v4190_v36  ;;  %2295 = vmatpush2.bf16.msra.mxu1 %v4277_v48  ;;  %v4228_v36 = vld [vmem:[#allocation5 + $0x6c] ss:$16 sps:$4 sm:$0xff]  }
 0x140   :  { %2255 = vmatprep.subr.bf16.mxu0 %v4195_v39  ;;  %2296 = vmatprep.subr.bf16.mxu1 %v4285_v50  ;;  %v4232_v39 = vld [vmem:[#allocation5 + $0x48] ss:$16 sps:$4 sm:$0xff]   ;;  %v4264_v48 = vld [vmem:[#allocation5 + $0x1ac] ss:$16 sps:$4 sm:$0xff]  }
 0x141   :  { %v4270_v50 = vld [vmem:[#allocation5 + $0x18c] ss:$16 sps:$4 sm:$0xff]  }
 0x143   :  { %2256 = vmatpush2.bf16.msra.mxu0 %v4193_v40  ;;  %2297 = vmatpush2.bf16.msra.mxu1 %v4283_v51  ;;  %v4240_v40 = vld [vmem:[#allocation5 + $0x2c] ss:$16 sps:$4 sm:$0xff]   ;;  %v4268_v51 = vld [vmem:[#allocation5 + $0x188] ss:$16 sps:$4 sm:$0xff]  }
 0x144   :  { %2257 = vmatprep.subr.bf16.mxu0 %v4198_v43  ;;  %2298 = vmatprep.subr.bf16.mxu1 %v4291_v52  ;;  %v4244_v43 = vld [vmem:[#allocation5 + $0x8] ss:$16 sps:$4 sm:$0xff]   ;;  %v4276_v52 = vld [vmem:[#allocation5 + $0x16c] ss:$16 sps:$4 sm:$0xff]  }
 0x147   :  { %2258 = vmatpush2.bf16.msra.mxu0 %v4196_v45  ;;  %2299 = vmatpush2.bf16.msra.mxu1 %v4289_v53  ;;  %v4252_v45 = vld [vmem:[#allocation5 + $0x1ec] ss:$16 sps:$4 sm:$0xff]   ;;  %v240_v53 = vrot.slane %v5054_v55, %v4976_v17 }
 0x148   :  { %2309 = vmatprep.subr.bf16.mxu0 %v4204_v44  ;;  %2350 = vmatprep.subr.bf16.mxu1 %v4297_v54  ;;  %v4256_v44 = vld [vmem:[#allocation5 + $0x1c8] ss:$16 sps:$4 sm:$0xff]   ;;  %v244_v54 = vrot.slane %v5054_v55, %v4978_v18 }
 0x149   :  { %v251_v2 = vpack.c.bf16 %v240_v53, %v240_v53  ;;  %v4352_v53 = vld [vmem:[#allocation7 + $0x40] ss:$8 sps:$4 sm:$0xff]  }
 0x14a   :  { %v252_v32 = vpack.c.bf16 %v244_v54, %v244_v54  ;;  %v4315_v54 = vld [vmem:[#allocation5 + $0x22c] ss:$16 sps:$4 sm:$0xff]  }
 0x14b   :  { %v1566_v34 = vpack.i.b16 %v251_v2, %v251_v2  ;;  %v4313_v2 = vld [vmem:[#allocation5 + $0x228] ss:$16 sps:$4 sm:$0xff]  }
 0x18a   :  { %v1417_v3 = vpop.f32.mrf.mxu0  ;;  %v1458_v4 = vpop.f32.mrf.mxu1 }
 0x18b   :  { %v1459_v5 = vadd.f32 %v1458_v4, %v1417_v3  ;;  %v4288_v3 = vld [vmem:[#allocation5 + $0x12c] ss:$16 sps:$4 sm:$0xff]   ;;  %v1573_v4 = vpack.i.b16 %v252_v32, %v252_v32 }
 0x18c   :  { %v1419_v7 = vpop.f32.mrf.mxu0  ;;  %v1460_v27 = vpop.f32.mrf.mxu1  ;;  %v4318_v32 = vld [vmem:[#allocation5 + $0x20c] ss:$16 sps:$4 sm:$0xff]  }
 0x18d   :  { %v1547_v8 = vpack.c.bf16 %v1459_v5, %v1459_v5  ;;  %v1461_v28 = vadd.f32 %v1460_v27, %v1419_v7 }
 0x18e   :  { %v1421_v29 = vpop.f32.mrf.mxu0  ;;  %v1462_v10 = vpop.f32.mrf.mxu1 }
 0x18f   :  { %v1548_v30 = vpack.c.bf16 %v1461_v28, %v1461_v28  ;;  %v1579_v11 = vadd.bf16 %v5061_v6, %v1547_v8  ;;  %v4286_v8 = vld [vmem:[#allocation5 + $0x128] ss:$16 sps:$4 sm:$0xff]   ;;  %v5078_v28 = vrot.slane %v1566_v34, %v4972_v12  ;;  %v4294_v10 = vld [vmem:[#allocation5 + $0x10c] ss:$16 sps:$4 sm:$0xff]  }
 0x190   :  { %v1422_v13 = vpop.f32.mrf.mxu0  ;;  %v1463_v14 = vpop.f32.mrf.mxu1  ;;  %v4316_v34 = vld [vmem:[#allocation5 + $0x208] ss:$16 sps:$4 sm:$0xff]  }
 0x191   :  { %v1580_v15 = vadd.bf16 %v5064_v9, %v1548_v30  ;;  %v5070_v21 = vmax.bf16 %v4882_v1, %v1579_v11  ;;  %v5081_v13 = vrot.slane %v1573_v4, %v4972_v12  ;;  %v4321_v4 = vld [vmem:[#allocation5 + $0x3ec] ss:$16 sps:$4 sm:$0xff]  }
 0x193   :  { %v1584_v19 = vmax.bf16 %v4882_v1, %v1580_v15 }
 0x195   :  { %2259 = vmatprep.mubr.bf16.mxu0 %v1584_v19 }
 0x196   :  { %2260 = vmatmul.mubr.bf16.vlgmr.msra.gmra.mxu0 %v5070_v21 }
 0x197   :  { %2310 = vmatpush1.bf16.msra.mxu0 %v4202_v20  ;;  %2341 = vmatprep.mubr.bf16.mxu0 %v1584_v19  ;;  %v4292_v20 = vld [vmem:[#allocation5 + $0x108] ss:$16 sps:$4 sm:$0xff]  }
 0x198   :  { %2311 = vmatprep.subr.bf16.mxu0 %v4210_v22 }
 0x19b   :  { %2312 = vmatpush1.bf16.msra.mxu0 %v4208_v0 }
 0x19c   :  { %2313 = vmatprep.subr.bf16.mxu0 %v4216_v24 }
 0x19f   :  { %2314 = vmatpush1.bf16.msra.mxu0 %v4214_v25 }
 0x1a0   :  { %2315 = vmatprep.subr.bf16.mxu0 %v4222_v26 }
 0x1a3   :  { %2316 = vmatpush1.bf16.msra.mxu0 %v4220_v35  ;;  %v4295_v35 = vld [vmem:[#allocation5 + $0x2e8] ss:$16 sps:$4 sm:$0xff]  }
 0x1a4   :  { %2317 = vmatprep.subr.bf16.mxu0 %v4228_v36 }
 0x1a7   :  { %2318 = vmatpush1.bf16.msra.mxu0 %v4226_v37  ;;  %v4300_v37 = vld [vmem:[#allocation5 + $0x2cc] ss:$16 sps:$4 sm:$0xff]  }
 0x1a8   :  { %2319 = vmatprep.subr.bf16.mxu0 %v4234_v38  ;;  %v4298_v38 = vld [vmem:[#allocation5 + $0x2c8] ss:$16 sps:$4 sm:$0xff]  }
 0x1ab   :  { %2320 = vmatpush1.bf16.msra.mxu0 %v4232_v39  ;;  %v4303_v39 = vld [vmem:[#allocation5 + $0x2ac] ss:$16 sps:$4 sm:$0xff]  }
 0x1ac   :  { %2321 = vmatprep.subr.bf16.mxu0 %v4240_v40  ;;  %v4301_v40 = vld [vmem:[#allocation5 + $0x2a8] ss:$16 sps:$4 sm:$0xff]  }
 0x1af   :  { %2322 = vmatpush1.bf16.msra.mxu0 %v4238_v41  ;;  %v4306_v41 = vld [vmem:[#allocation5 + $0x28c] ss:$16 sps:$4 sm:$0xff]  }
 0x1b0   :  { %2323 = vmatprep.subr.bf16.mxu0 %v4246_v42  ;;  %v4343_v42 = vld [vmem:[#allocation7 + $0x70] ss:$8 sps:$4 sm:$0xff]  }
 0x1b3   :  { %2324 = vmatpush1.bf16.msra.mxu0 %v4244_v43  ;;  %v4345_v43 = vld [vmem:[#allocation7 + $0x74] ss:$8 sps:$4 sm:$0xff]  }
 0x1b4   :  { %2325 = vmatprep.subr.bf16.mxu0 %v4252_v45  ;;  %v4348_v45 = vld [vmem:[#allocation7 + $0x64] ss:$8 sps:$4 sm:$0xff]  }
 0x1b7   :  { %2326 = vmatpush2.bf16.msra.mxu0 %v4250_v46  ;;  %v4304_v46 = vld [vmem:[#allocation5 + $0x288] ss:$16 sps:$4 sm:$0xff]  }
 0x1b8   :  { %2327 = vmatprep.subr.bf16.mxu0 %v4258_v47  ;;  %v4346_v47 = vld [vmem:[#allocation7 + $0x60] ss:$8 sps:$4 sm:$0xff]  }
 0x1bb   :  { %2328 = vmatpush2.bf16.msra.mxu0 %v4256_v44  ;;  %v4309_v44 = vld [vmem:[#allocation5 + $0x26c] ss:$16 sps:$4 sm:$0xff]  }
 0x1bc   :  { %2329 = vmatprep.subr.bf16.mxu0 %v4264_v48  ;;  %v4307_v48 = vld [vmem:[#allocation5 + $0x268] ss:$16 sps:$4 sm:$0xff]  }
 0x1bf   :  { %2330 = vmatpush2.bf16.msra.mxu0 %v4262_v49  ;;  %v4349_v49 = vld [vmem:[#allocation7 + $0x50] ss:$8 sps:$4 sm:$0xff]  }
 0x1c0   :  { %2331 = vmatprep.subr.bf16.mxu0 %v4270_v50  ;;  %v4312_v50 = vld [vmem:[#allocation5 + $0x24c] ss:$16 sps:$4 sm:$0xff]  }
 0x1c3   :  { %2332 = vmatpush2.bf16.msra.mxu0 %v4268_v51  ;;  %v4354_v51 = vld [vmem:[#allocation7 + $0x44] ss:$8 sps:$4 sm:$0xff]  }
 0x1c4   :  { %2333 = vmatprep.subr.bf16.mxu0 %v4276_v52  ;;  %v4310_v52 = vld [vmem:[#allocation5 + $0x248] ss:$16 sps:$4 sm:$0xff]  }
 0x1c7   :  { %2334 = vmatpush2.bf16.msra.mxu0 %v4274_v56  ;;  %v4357_v56 = vld [vmem:[#allocation7 + $0x34] ss:$8 sps:$4 sm:$0xff]  }
 0x1c8   :  { %2335 = vmatprep.subr.bf16.mxu0 %v4282_v31  ;;  %v4355_v31 = vld [vmem:[#allocation7 + $0x30] ss:$8 sps:$4 sm:$0xff]  }
 0x1ca   :  { %v1499_v5 = vpop.f32.mrf.mxu0  ;;  %v1540_v7 = vpop.f32.mrf.mxu1 }
 0x1cb   :  { %v1541_v27 = vadd.f32 %v1540_v7, %v1499_v5  ;;  %2336 = vmatpush2.bf16.msra.mxu0 %v4280_v33  ;;  %v4360_v33 = vld [vmem:[#allocation7 + $0x24] ss:$8 sps:$4 sm:$0xff]   ;;  %v4363_v5 = vld [vmem:[#allocation7 + $0x14] ss:$8 sps:$4 sm:$0xff]   ;;  %v4319_v7 = vld [vmem:[#allocation5 + $0x3e8] ss:$16 sps:$4 sm:$0xff]  }
 0x1cc   :  { %v1501_v55 = vpop.f32.mrf.mxu0  ;;  %v1542_v29 = vpop.f32.mrf.mxu1  ;;  %2337 = vmatprep.subr.bf16.mxu0 %v4288_v3  ;;  %v4358_v3 = vld [vmem:[#allocation7 + $0x20] ss:$8 sps:$4 sm:$0xff]  }
 0x1cd   :  { %v1549_v30 = vpack.c.bf16 %v1541_v27, %v1541_v27  ;;  %v1543_v11 = vadd.f32 %v1542_v29, %v1501_v55  ;;  %v4361_v27 = vld [vmem:[#allocation7 + $0x10] ss:$8 sps:$4 sm:$0xff]   ;;  %v4366_v55 = vld [vmem:[#allocation7 + $0x4] ss:$8 sps:$4 sm:$0xff]  }
 0x1ce   :  { %v1503_v14 = vpop.f32.mrf.mxu0  ;;  %v1544_v15 = vpop.f32.mrf.mxu1  ;;  %v4322_v29 = vld [vmem:[#allocation5 + $0x3c8] ss:$16 sps:$4 sm:$0xff]  }
 0x1cf   :  { %v1550_v19 = vpack.c.bf16 %v1543_v11, %v1543_v11  ;;  %2338 = vmatpush2.bf16.msra.mxu0 %v4286_v8  ;;  %v1581_v22 = vadd.bf16 %v5078_v28, %v1549_v30  ;;  %v4324_v8 = vld [vmem:[#allocation5 + $0x3cc] ss:$16 sps:$4 sm:$0xff]   ;;  %v4325_v14 = vld [vmem:[#allocation5 + $0x3a8] ss:$16 sps:$4 sm:$0xff]  }
 0x1d0   :  { %v1504_v0 = vpop.f32.mrf.mxu0  ;;  %v1545_v24 = vpop.f32.mrf.mxu1  ;;  %2339 = vmatprep.subr.bf16.mxu0 %v4294_v10  ;;  %v4364_v10 = vld [vmem:[#allocation7] ss:$8 sps:$4 sm:$0xff]   ;;  %v4327_v30 = vld [vmem:[#allocation5 + $0x3ac] ss:$16 sps:$4 sm:$0xff]   ;;  %v4367_v15 = vld [vmem:[#allocation7 + $0xf0] ss:$8 sps:$4 sm:$0xff]  }
 0x1d1   :  { %v1582_v25 = vadd.bf16 %v5081_v13, %v1550_v19  ;;  %v5087_v36 = vmax.bf16 %v4882_v1, %v1581_v22  ;;  %v4369_v11 = vld [vmem:[#allocation7 + $0xf4] ss:$8 sps:$4 sm:$0xff]   ;;  %v4328_v22 = vld [vmem:[#allocation5 + $0x388] ss:$16 sps:$4 sm:$0xff]  }
 0x1d2   :  { %v4330_v19 = vld [vmem:[#allocation5 + $0x38c] ss:$16 sps:$4 sm:$0xff]   ;;  %v4370_v0 = vld [vmem:[#allocation7 + $0xe0] ss:$8 sps:$4 sm:$0xff]  }
 0x1d3   :  { %2340 = vmatpush2.bf16.msra.mxu0 %v4292_v20  ;;  %v1586_v26 = vmax.bf16 %v4882_v1, %v1582_v25  ;;  %v4372_v20 = vld [vmem:[#allocation7 + $0xe4] ss:$8 sps:$4 sm:$0xff]   ;;  %v4375_v25 = vld [vmem:[#allocation7 + $0xd4] ss:$8 sps:$4 sm:$0xff]  }
 0x1d4   :  { %2751 = vmatprep.subr.bf16.mxu0 %v4345_v43  ;;  %v4333_v24 = vld [vmem:[#allocation5 + $0x36c] ss:$16 sps:$4 sm:$0xff]   ;;  %v4337_v43 = vld [vmem:[#allocation5 + $0x328] ss:$16 sps:$4 sm:$0xff]  }
 0x1d5   :  { %2300 = vmatprep.mubr.bf16.mxu1 %v1586_v26 }
 0x1d6   :  { %2301 = vmatmul.mubr.bf16.vlgmr.msra.gmra.mxu1 %v5087_v36  ;;  %2342 = vmatmul.mubr.bf16.vlgmr.msra.gmra.mxu0 %v5070_v21  ;;  %v4351_v21 = vld [vmem:[#allocation7 + $0x54] ss:$8 sps:$4 sm:$0xff]  }
 0x1d7   :  { %2351 = vmatpush1.bf16.msra.mxu1 %v4295_v35  ;;  %2382 = vmatprep.mubr.bf16.mxu1 %v1586_v26  ;;  %v4331_v26 = vld [vmem:[#allocation5 + $0x368] ss:$16 sps:$4 sm:$0xff]  }
 0x1d8   :  { %2352 = vmatprep.subr.bf16.mxu1 %v4300_v37  ;;  %2752 = vmatpush1.bf16.msra.mxu0 %v4343_v42  ;;  %v4373_v35 = vld [vmem:[#allocation7 + $0xd0] ss:$8 sps:$4 sm:$0xff]   ;;  %v4336_v37 = vld [vmem:[#allocation5 + $0x34c] ss:$16 sps:$4 sm:$0xff]  }
 0x1d9   :  { %2753 = vmatprep.subr.bf16.mxu0 %v4348_v45  ;;  %v4381_v42 = vld [vmem:[#allocation7 + $0xb4] ss:$8 sps:$4 sm:$0xff]   ;;  %v4379_v45 = vld [vmem:[#allocation7 + $0xb0] ss:$8 sps:$4 sm:$0xff]  }
 0x1db   :  { %2353 = vmatpush1.bf16.msra.mxu1 %v4298_v38  ;;  %v4378_v38 = vld [vmem:[#allocation7 + $0xc4] ss:$8 sps:$4 sm:$0xff]  }
 0x1dc   :  { %2354 = vmatprep.subr.bf16.mxu1 %v4303_v39  ;;  %2754 = vmatpush1.bf16.msra.mxu0 %v4346_v47  ;;  %v4334_v39 = vld [vmem:[#allocation5 + $0x348] ss:$16 sps:$4 sm:$0xff]  }
 0x1dd   :  { %2755 = vmatprep.subr.bf16.mxu0 %v4351_v21  ;;  %v4340_v47 = vld [vmem:[#allocation5 + $0x308] ss:$16 sps:$4 sm:$0xff]  }
 0x1de   :  { %v4382_v21 = vld [vmem:[#allocation7 + $0xa0] ss:$8 sps:$4 sm:$0xff]  }
 0x1df   :  { %2355 = vmatpush1.bf16.msra.mxu1 %v4301_v40  ;;  %v4376_v40 = vld [vmem:[#allocation7 + $0xc0] ss:$8 sps:$4 sm:$0xff]  }
 0x1e0   :  { %2356 = vmatprep.subr.bf16.mxu1 %v4306_v41  ;;  %2756 = vmatpush1.bf16.msra.mxu0 %v4349_v49  ;;  %v4339_v41 = vld [vmem:[#allocation5 + $0x32c] ss:$16 sps:$4 sm:$0xff]   ;;  %v4385_v49 = vld [vmem:[#allocation7 + $0x90] ss:$8 sps:$4 sm:$0xff]  }
 0x1e1   :  { %2757 = vmatprep.subr.bf16.mxu0 %v4354_v51  ;;  %v4390_v51 = vld [vmem:[#allocation7 + $0x84] ss:$8 sps:$4 sm:$0xff]  }
 0x1e3   :  { %2357 = vmatpush1.bf16.msra.mxu1 %v4304_v46  ;;  %v4342_v46 = vld [vmem:[#allocation5 + $0x30c] ss:$16 sps:$4 sm:$0xff]  }
 0x1e4   :  { %2358 = vmatprep.subr.bf16.mxu1 %v4309_v44  ;;  %2758 = vmatpush1.bf16.msra.mxu0 %v4352_v53  ;;  %v4384_v44 = vld [vmem:[#allocation7 + $0xa4] ss:$8 sps:$4 sm:$0xff]   ;;  %v4393_v53 = vld [vmem:[#allocation7 + $0x174] ss:$8 sps:$4 sm:$0xff]  }
 0x1e5   :  { %2759 = vmatprep.subr.bf16.mxu0 %v4357_v56  ;;  %v4396_v56 = vld [vmem:[#allocation7 + $0x164] ss:$8 sps:$4 sm:$0xff]  }
 0x1e7   :  { %2359 = vmatpush1.bf16.msra.mxu1 %v4307_v48  ;;  %v4387_v48 = vld [vmem:[#allocation7 + $0x94] ss:$8 sps:$4 sm:$0xff]  }
 0x1e8   :  { %2360 = vmatprep.subr.bf16.mxu1 %v4312_v50  ;;  %2760 = vmatpush1.bf16.msra.mxu0 %v4355_v31  ;;  %v4388_v50 = vld [vmem:[#allocation7 + $0x80] ss:$8 sps:$4 sm:$0xff]   ;;  %v4402_v31 = vld [vmem:[#allocation7 + $0x144] ss:$8 sps:$4 sm:$0xff]  }
 0x1e9   :  { %2761 = vmatprep.subr.bf16.mxu0 %v4360_v33  ;;  %v4405_v33 = vld [vmem:[#allocation7 + $0x134] ss:$8 sps:$4 sm:$0xff]  }
 0x1eb   :  { %2361 = vmatpush1.bf16.msra.mxu1 %v4310_v52  ;;  %v4391_v52 = vld [vmem:[#allocation7 + $0x170] ss:$8 sps:$4 sm:$0xff]  }
 0x1ec   :  { %2362 = vmatprep.subr.bf16.mxu1 %v4315_v54  ;;  %2762 = vmatpush1.bf16.msra.mxu0 %v4358_v3  ;;  %v4394_v54 = vld [vmem:[#allocation7 + $0x160] ss:$8 sps:$4 sm:$0xff]   ;;  %v4408_v3 = vld [vmem:[#allocation7 + $0x124] ss:$8 sps:$4 sm:$0xff]  }
 0x1ed   :  { %2763 = vmatprep.subr.bf16.mxu0 %v4363_v5  ;;  %v4411_v5 = vld [vmem:[#allocation7 + $0x114] ss:$8 sps:$4 sm:$0xff]  }
 0x1ef   :  { %2363 = vmatpush1.bf16.msra.mxu1 %v4313_v2  ;;  %v4399_v2 = vld [vmem:[#allocation7 + $0x154] ss:$8 sps:$4 sm:$0xff]  }
 0x1f0   :  { %2364 = vmatprep.subr.bf16.mxu1 %v4318_v32  ;;  %2764 = vmatpush1.bf16.msra.mxu0 %v4361_v27  ;;  %v4400_v32 = vld [vmem:[#allocation7 + $0x140] ss:$8 sps:$4 sm:$0xff]   ;;  %v4414_v27 = vld [vmem:[#allocation7 + $0x104] ss:$8 sps:$4 sm:$0xff]  }
 0x1f1   :  { %2765 = vmatprep.subr.bf16.mxu0 %v4366_v55  ;;  %v4417_v55 = vld [vmem:[#allocation7 + $0x1f4] ss:$8 sps:$4 sm:$0xff]  }
 0x1f3   :  { %2365 = vmatpush1.bf16.msra.mxu1 %v4316_v34  ;;  %v4403_v34 = vld [vmem:[#allocation7 + $0x130] ss:$8 sps:$4 sm:$0xff]  }
 0x1f4   :  { %2366 = vmatprep.subr.bf16.mxu1 %v4321_v4  ;;  %2766 = vmatpush1.bf16.msra.mxu0 %v4364_v10  ;;  %v4406_v4 = vld [vmem:[#allocation7 + $0x120] ss:$8 sps:$4 sm:$0xff]   ;;  %v4420_v10 = vld [vmem:[#allocation7 + $0x1e4] ss:$8 sps:$4 sm:$0xff]  }
 0x1f5   :  { %2767 = vmatprep.subr.bf16.mxu0 %v4369_v11  ;;  %v5092_v11 = vld [vmem:[#allocation7 + $0x1d4] ss:$8 sps:$4 sm:$0xff]  }
 0x1f7   :  { %2367 = vmatpush2.bf16.msra.mxu1 %v4319_v7  ;;  %v4409_v7 = vld [vmem:[#allocation7 + $0x110] ss:$8 sps:$4 sm:$0xff]  }
 0x1f8   :  { %2368 = vmatprep.subr.bf16.mxu1 %v4324_v8  ;;  %2768 = vmatpush2.bf16.msra.mxu0 %v4367_v15  ;;  %v4412_v8 = vld [vmem:[#allocation7 + $0x100] ss:$8 sps:$4 sm:$0xff]   ;;  %v5097_v15 = vld [vmem:[#allocation7 + $0x1c4] ss:$8 sps:$4 sm:$0xff]  }
 0x1f9   :  { %2769 = vmatprep.subr.bf16.mxu0 %v4372_v20  ;;  %v5103_v20 = vld [vmem:[#allocation7 + $0x1b4] ss:$8 sps:$4 sm:$0xff]  }
 0x1fb   :  { %2369 = vmatpush2.bf16.msra.mxu1 %v4322_v29  ;;  %v4415_v29 = vld [vmem:[#allocation7 + $0x1f0] ss:$8 sps:$4 sm:$0xff]  }
 0x1fc   :  { %2370 = vmatprep.subr.bf16.mxu1 %v4327_v30  ;;  %2770 = vmatpush2.bf16.msra.mxu0 %v4370_v0  ;;  %v4418_v30 = vld [vmem:[#allocation7 + $0x1e0] ss:$8 sps:$4 sm:$0xff]   ;;  %v5109_v0 = vld [vmem:[#allocation7 + $0x1a4] ss:$8 sps:$4 sm:$0xff]  }
 0x1fd   :  { %2771 = vmatprep.subr.bf16.mxu0 %v4375_v25 }
 0x1ff   :  { %2371 = vmatpush2.bf16.msra.mxu1 %v4325_v14  ;;  %v5094_v14 = vld [vmem:[#allocation7 + $0x1d0] ss:$8 sps:$4 sm:$0xff]  }
 0x200   :  { %2372 = vmatprep.subr.bf16.mxu1 %v4330_v19  ;;  %2772 = vmatpush2.bf16.msra.mxu0 %v4373_v35  ;;  %v5100_v19 = vld [vmem:[#allocation7 + $0x1c0] ss:$8 sps:$4 sm:$0xff]  }
 0x201   :  { %2773 = vmatprep.subr.bf16.mxu0 %v4378_v38 }
 0x203   :  { %2373 = vmatpush2.bf16.msra.mxu1 %v4328_v22  ;;  %v5106_v22 = vld [vmem:[#allocation7 + $0x1b0] ss:$8 sps:$4 sm:$0xff]  }
 0x204   :  { %2374 = vmatprep.subr.bf16.mxu1 %v4333_v24  ;;  %2774 = vmatpush2.bf16.msra.mxu0 %v4376_v40  ;;  %v5112_v24 = vld [vmem:[#allocation7 + $0x1a0] ss:$8 sps:$4 sm:$0xff]  }
 0x205   :  { %2775 = vmatprep.subr.bf16.mxu0 %v4381_v42  ;;  %v4455_v42 = vld [vmem:[#allocation2 + $0xe4] ss:$16 sps:$4 sm:$0xff]  }
 0x207   :  { %2375 = vmatpush2.bf16.msra.mxu1 %v4331_v26  ;;  %v5116_v26 = vld [vmem:[#allocation7 + $0x194] ss:$8 sps:$4 sm:$0xff]  }
 0x208   :  { %2376 = vmatprep.subr.bf16.mxu1 %v4336_v37  ;;  %2776 = vmatpush2.bf16.msra.mxu0 %v4379_v45  ;;  %v5118_v37 = vld [vmem:[#allocation7 + $0x190] ss:$8 sps:$4 sm:$0xff]  }
 0x209   :  { %2777 = vmatprep.subr.bf16.mxu0 %v4384_v44 }
 0x20b   :  { %2377 = vmatpush2.bf16.msra.mxu1 %v4334_v39  ;;  %v5122_v39 = vld [vmem:[#allocation7 + $0x184] ss:$8 sps:$4 sm:$0xff]  }
 0x20c   :  { %2378 = vmatprep.subr.bf16.mxu1 %v4339_v41  ;;  %2778 = vmatpush2.bf16.msra.mxu0 %v4382_v21  ;;  %v5124_v41 = vld [vmem:[#allocation7 + $0x180] ss:$8 sps:$4 sm:$0xff]  }
 0x20d   :  { %2779 = vmatprep.subr.bf16.mxu0 %v4387_v48 }
 0x20f   :  { %2379 = vmatpush2.bf16.msra.mxu1 %v4337_v43  ;;  %v381_v43 = vld [vmem:[%s5331_s6] sm:$0xf] }
 0x210   :  { %2380 = vmatprep.subr.bf16.mxu1 %v4342_v46  ;;  %2780 = vmatpush2.bf16.msra.mxu0 %v4385_v49  ;;  %v386_v45 = vrot.slane %v381_v43, %v4972_v12  ;;  %v390_v46 = vrot.slane %v381_v43, %v4974_v16 }
 0x211   :  { %2781 = vmatprep.subr.bf16.mxu0 %v4390_v51 }
 0x212   :  { %v404_v44 = vpack.c.bf16 %v390_v46, %v390_v46 }
 0x213   :  { %2381 = vmatpush2.bf16.msra.mxu1 %v4340_v47  ;;  %v403_v47 = vpack.c.bf16 %v386_v45, %v386_v45 }
 0x214   :  { %2782 = vmatpush2.bf16.msra.mxu0 %v4388_v50  ;;  %2792 = vmatprep.subr.bf16.mxu1 %v4393_v53  ;;  %v2403_v48 = vpack.i.b16 %v404_v44, %v404_v44  ;;  %v3048_v44 = vmax.f32 %v5031_v58, 0.0  ;;  %v5161_v58 = vld [vmem:[#allocation8 + $0x38] sm:$0xff]  }
 0x215   :  { %v2396_v21 = vpack.i.b16 %v403_v47, %v403_v47 }
 0x216   :  { %2383 = vmatmul.mubr.bf16.vlgmr.msra.gmra.mxu1 %v5087_v36  ;;  %v4397_v36 = vld [vmem:[#allocation7 + $0x150] ss:$8 sps:$4 sm:$0xff]  }
 0x217   :  { %2793 = vmatpush1.bf16.msra.mxu1 %v4391_v52  ;;  %v5134_v52 = vrot.slane %v2396_v21, %v4972_v12 }
 0x218   :  { %2794 = vmatprep.subr.bf16.mxu1 %v4396_v56 }
 0x21b   :  { %2795 = vmatpush1.bf16.msra.mxu1 %v4394_v54 }
 0x21c   :  { %2796 = vmatprep.subr.bf16.mxu1 %v4399_v2 }
 0x21f   :  { %2797 = vmatpush1.bf16.msra.mxu1 %v4397_v36  ;;  %v5137_v36 = vrot.slane %v2403_v48, %v4972_v12 }
 0x220   :  { %2798 = vmatprep.subr.bf16.mxu1 %v4402_v31 }
 0x223   :  { %2799 = vmatpush1.bf16.msra.mxu1 %v4400_v32 }
 0x224   :  { %2800 = vmatprep.subr.bf16.mxu1 %v4405_v33 }
 0x227   :  { %2801 = vmatpush1.bf16.msra.mxu1 %v4403_v34 }
 0x228   :  { %2802 = vmatprep.subr.bf16.mxu1 %v4408_v3 }
 0x22b   :  { %2803 = vmatpush1.bf16.msra.mxu1 %v4406_v4 }
 0x22c   :  { %2804 = vmatprep.subr.bf16.mxu1 %v4411_v5 }
 0x22f   :  { %2805 = vmatpush1.bf16.msra.mxu1 %v4409_v7 }
 0x230   :  { %2806 = vmatprep.subr.bf16.mxu1 %v4414_v27 }
 0x233   :  { %2807 = vmatpush1.bf16.msra.mxu1 %v4412_v8  ;;  %v394_v8 = vrot.slane %v381_v43, %v4976_v17 }
 0x234   :  { %2808 = vmatprep.subr.bf16.mxu1 %v4417_v55  ;;  %v398_v55 = vrot.slane %v381_v43, %v4978_v18 }
 0x237   :  { %2809 = vmatpush2.bf16.msra.mxu1 %v4415_v29  ;;  %v405_v29 = vpack.c.bf16 %v394_v8, %v394_v8  ;;  %v5182_v8 = vld [vmem:[#allocation8 + $0x58] sm:$0xff]  }
 0x238   :  { %2810 = vmatprep.subr.bf16.mxu1 %v4420_v10  ;;  %v406_v10 = vpack.c.bf16 %v398_v55, %v398_v55  ;;  %v4466_v55 = vld [vmem:[#allocation2 + $0x40] ss:$16 sps:$4 sm:$0xff]  }
 0x23b   :  { %2811 = vmatpush2.bf16.msra.mxu1 %v4418_v30  ;;  %v2410_v30 = vpack.i.b16 %v405_v29, %v405_v29  ;;  %v5185_v29 = vld [vmem:[#allocation8 + $0x18] sm:$0xff]  }
 0x23c   :  { %2812 = vmatprep.subr.bf16.mxu1 %v5092_v11 }
 0x23f   :  { %2813 = vmatpush2.bf16.msra.mxu1 %v5094_v14 }
 0x240   :  { %2814 = vmatprep.subr.bf16.mxu1 %v5097_v15 }
 0x243   :  { %2815 = vmatpush2.bf16.msra.mxu1 %v5100_v19 }
 0x244   :  { %2816 = vmatprep.subr.bf16.mxu1 %v5103_v20 }
 0x247   :  { %2817 = vmatpush2.bf16.msra.mxu1 %v5106_v22 }
 0x248   :  { %2818 = vmatprep.subr.bf16.mxu1 %v5109_v0 }
 0x24b   :  { %2819 = vmatpush2.bf16.msra.mxu1 %v5112_v24 }
 0x24c   :  { %2820 = vmatprep.subr.bf16.mxu1 %v5116_v26 }
 0x24f   :  { %2821 = vmatpush2.bf16.msra.mxu1 %v5118_v37 }
 0x250   :  { %2822 = vmatprep.subr.bf16.mxu1 %v5122_v39 }
 0x253   :  { %2823 = vmatpush2.bf16.msra.mxu1 %v5124_v41 }
 0x254   :  { %3055 = vmatprep.subr.bf16.mxu1 %v4455_v42 }
 0x256   :  { %v2261_v25 = vpop.f32.mrf.mxu0 }
 0x258   :  { %v2263_v35 = vpop.f32.mrf.mxu0 }
 0x25a   :  { %v2265_v38 = vpop.f32.mrf.mxu0 }
 0x25c   :  { %v2266_v40 = vpop.f32.mrf.mxu0 }
 0x25d   :  { %v5146_v40 = vrot.slane %v2410_v30, %v4972_v12  ;;  %v5188_v30 = vld [vmem:[#allocation8 + $0x50] sm:$0xff]  }
 0x296   :  { %v2302_v49 = vpop.f32.mrf.mxu1  ;;  %v2343_v50 = vpop.f32.mrf.mxu0 }
 0x297   :  { %v2303_v51 = vadd.f32 %v2302_v49, %v2261_v25  ;;  %v2417_v25 = vpack.i.b16 %v406_v10, %v406_v10  ;;  %v5156_v49 = vpack.c.bf16 %v3048_v44, %v3048_v44  ;;  %v4467_v10 = vld [vmem:[#allocation2 + $0x24] ss:$16 sps:$4 sm:$0xff]  }
 0x298   :  { %v2304_v53 = vpop.f32.mrf.mxu1  ;;  %v2345_v54 = vpop.f32.mrf.mxu0  ;;  %v4479_v44 = vld [vmem:[#allocation2 + $0x164] ss:$16 sps:$4 sm:$0xff]  }
 0x299   :  { %v2391_v56 = vpack.c.bf16 %v2303_v51, %v2303_v51  ;;  %v2305_v2 = vadd.f32 %v2304_v53, %v2263_v35  ;;  %v4457_v51 = vld [vmem:[#allocation2 + $0xc4] ss:$16 sps:$4 sm:$0xff]   ;;  %v4458_v53 = vld [vmem:[#allocation2 + $0xc0] ss:$16 sps:$4 sm:$0xff]  }
 0x29a   :  { %v2306_v31 = vpop.f32.mrf.mxu1  ;;  %v2347_v32 = vpop.f32.mrf.mxu0 }
 0x29b   :  { %v2392_v33 = vpack.c.bf16 %v2305_v2, %v2305_v2  ;;  %v2423_v34 = vadd.bf16 %v5134_v52, %v2391_v56  ;;  %v5159_v56 = vld [vmem:[#allocation8 + $0x78] sm:$0xff]   ;;  %v5167_v2 = vld [vmem:[#allocation8 + $0x30] sm:$0xff]   ;;  %v5170_v32 = vld [vmem:[#allocation8 + $0x68] sm:$0xff]  }
 0x29c   :  { %v2307_v3 = vpop.f32.mrf.mxu1  ;;  %v2348_v4 = vpop.f32.mrf.mxu0  ;;  %3893 = vmatprep.subr.bf16.mxu0 %v5159_v56  ;;  %v4461_v31 = vld [vmem:[#allocation2 + $0x84] ss:$16 sps:$4 sm:$0xff]  }
 0x29d   :  { %v2424_v5 = vadd.bf16 %v5137_v36, %v2392_v33  ;;  %v2427_v27 = vadd.bf16 %v2423_v34, %v5039_v62  ;;  %v5149_v62 = vrot.slane %v2417_v25, %v4972_v12  ;;  %v4462_v33 = vld [vmem:[#allocation2 + $0x80] ss:$16 sps:$4 sm:$0xff]   ;;  %v5173_v34 = vld [vmem:[#allocation8 + $0x28] sm:$0xff]   ;;  %v4463_v3 = vld [vmem:[#allocation2 + $0x64] ss:$16 sps:$4 sm:$0xff]  }
 0x29e   :  { %v5176_v4 = vld [vmem:[#allocation8 + $0x60] sm:$0xff]  }
 0x29f   :  { %v2428_v7 = vadd.bf16 %v2424_v5, %v5035_v60  ;;  %v4464_v5 = vld [vmem:[#allocation2 + $0x60] ss:$16 sps:$4 sm:$0xff]  }
 0x2a0   :  { %v4468_v25 = vld [vmem:[#allocation2 + $0x20] ss:$16 sps:$4 sm:$0xff]  }
 0x2a1   :  { %2783 = vmatprep.mubr.bf16.mxu0 %v2428_v7  ;;  %v5179_v7 = vld [vmem:[#allocation8 + $0x20] sm:$0xff]  }
 0x2a2   :  { %2784 = vmatmul.mubr.bf16.vlgmr.msra.gmra.mxu0 %v2427_v27  ;;  %v4465_v27 = vld [vmem:[#allocation2 + $0x44] ss:$16 sps:$4 sm:$0xff]  }
 0x2a3   :  { %3894 = vmatpush3.bf16.msra.mxu0 %v5161_v58 }
 0x2d6   :  { %v2384_v35 = vpop.f32.mrf.mxu1 }
 0x2d7   :  { %v2385_v38 = vadd.f32 %v2384_v35, %v2343_v50  ;;  %v4456_v50 = vld [vmem:[#allocation2 + $0xe0] ss:$16 sps:$4 sm:$0xff]   ;;  %v4469_v35 = vld [vmem:[#allocation2 + $0x4] ss:$16 sps:$4 sm:$0xff]  }
 0x2d8   :  { %v2386_v42 = vpop.f32.mrf.mxu1 }
 0x2d9   :  { %v2393_v45 = vpack.c.bf16 %v2385_v38, %v2385_v38  ;;  %v2387_v60 = vadd.f32 %v2386_v42, %v2345_v54  ;;  %v4459_v54 = vld [vmem:[#allocation2 + $0xa4] ss:$16 sps:$4 sm:$0xff]   ;;  %v4470_v38 = vld [vmem:[#allocation2] ss:$16 sps:$4 sm:$0xff]  }
 0x2da   :  { %v2388_v46 = vpop.f32.mrf.mxu1  ;;  %v4471_v42 = vld [vmem:[#allocation2 + $0x1e4] ss:$16 sps:$4 sm:$0xff]  }
 0x2db   :  { %v2394_v47 = vpack.c.bf16 %v2387_v60, %v2387_v60  ;;  %v2425_v17 = vadd.bf16 %v5146_v40, %v2393_v45  ;;  %v4472_v45 = vld [vmem:[#allocation2 + $0x1e0] ss:$16 sps:$4 sm:$0xff]   ;;  %v4473_v60 = vld [vmem:[#allocation2 + $0x1c4] ss:$16 sps:$4 sm:$0xff]  }
 0x2dc   :  { %v2389_v18 = vpop.f32.mrf.mxu1  ;;  %v4474_v46 = vld [vmem:[#allocation2 + $0x1c0] ss:$16 sps:$4 sm:$0xff]  }
 0x2dd   :  { %v2426_v43 = vadd.bf16 %v5149_v62, %v2394_v47  ;;  %v2429_v48 = vadd.bf16 %v2425_v17, %v5041_v63  ;;  %v4460_v63 = vld [vmem:[#allocation2 + $0xa0] ss:$16 sps:$4 sm:$0xff]   ;;  %v4475_v47 = vld [vmem:[#allocation2 + $0x1a4] ss:$16 sps:$4 sm:$0xff]  }
 0x2de   :  { %v4476_v17 = vld [vmem:[#allocation2 + $0x1a0] ss:$16 sps:$4 sm:$0xff]   ;;  %v4477_v18 = vld [vmem:[#allocation2 + $0x184] ss:$16 sps:$4 sm:$0xff]  }
 0x2df   :  { %v2430_v21 = vadd.bf16 %v2426_v43, %v5037_v61  ;;  %v5163_v61 = vld [vmem:[#allocation8 + $0x70] sm:$0xff]  }
 0x2e0   :  { %3895 = vmatprep.subr.bf16.mxu0 %v5163_v61  ;;  %v4478_v43 = vld [vmem:[#allocation2 + $0x180] ss:$16 sps:$4 sm:$0xff]  }
 0x2e1   :  { %2824 = vmatprep.mubr.bf16.mxu1 %v2430_v21  ;;  %3896 = vmatpush3.bf16.msra.mxu0 %v5167_v2  ;;  %v4480_v21 = vld [vmem:[#allocation2 + $0x160] ss:$16 sps:$4 sm:$0xff]  }
 0x2e2   :  { %2825 = vmatmul.mubr.bf16.vlgmr.msra.gmra.mxu1 %v2429_v48  ;;  %3897 = vmatprep.subr.bf16.mxu0 %v5170_v32  ;;  %v4481_v48 = vld [vmem:[#allocation2 + $0x144] ss:$16 sps:$4 sm:$0xff]  }
 0x2e3   :  { %3056 = vmatpush1.bf16.msra.mxu1 %v4456_v50  ;;  %3087 = vmatprep.mubr.bf16.mxu1 %v5156_v49  ;;  %v4482_v50 = vld [vmem:[#allocation2 + $0x140] ss:$16 sps:$4 sm:$0xff]  }
 0x2e4   :  { %3057 = vmatprep.subr.bf16.mxu1 %v4457_v51  ;;  %v4483_v51 = vld [vmem:[#allocation2 + $0x124] ss:$16 sps:$4 sm:$0xff]  }
 0x2e5   :  { %3898 = vmatpush3.bf16.msra.mxu0 %v5173_v34 }
 0x2e6   :  { %3899 = vmatprep.subr.bf16.mxu0 %v5176_v4 }
 0x2e7   :  { %3058 = vmatpush1.bf16.msra.mxu1 %v4458_v53  ;;  %v4484_v53 = vld [vmem:[#allocation2 + $0x120] ss:$16 sps:$4 sm:$0xff]  }
 0x2e8   :  { %3059 = vmatprep.subr.bf16.mxu1 %v4459_v54  ;;  %v3047_v54 = vmax.f32 %v5027_v23, 0.0  ;;  %v5200_v23 = vld [vmem:[#allocation8 + $0x48] sm:$0xff]  }
 0x2e9   :  { %3900 = vmatpush3.bf16.msra.mxu0 %v5179_v7 }
 0x2ea   :  { %3901 = vmatprep.subr.bf16.mxu0 %v5182_v8 }
 0x2eb   :  { %3060 = vmatpush1.bf16.msra.mxu1 %v4460_v63  ;;  %v4485_v63 = vld [vmem:[#allocation2 + $0x104] ss:$16 sps:$4 sm:$0xff]  }
 0x2ec   :  { %3061 = vmatprep.subr.bf16.mxu1 %v4461_v31  ;;  %v4486_v31 = vld [vmem:[#allocation2 + $0x100] ss:$16 sps:$4 sm:$0xff]  }
 0x2ed   :  { %3902 = vmatpush3.bf16.msra.mxu0 %v5185_v29 }
 0x2ee   :  { %3903 = vmatprep.subr.bf16.mxu0 %v5188_v30 }
 0x2ef   :  { %3062 = vmatpush1.bf16.msra.mxu1 %v4462_v33  ;;  %v5193_v33 = vpack.c.bf16 %v3047_v54, %v3047_v54  ;;  %v4505_v54 = vld [vmem:[#allocation2 + $0x1e8] ss:$16 sps:$4 sm:$0xff]  }
 0x2f0   :  { %3063 = vmatprep.subr.bf16.mxu1 %v4463_v3  ;;  %v4487_v3 = vld [vmem:[#allocation2 + $0xec] ss:$16 sps:$4 sm:$0xff]  }
 0x2f3   :  { %3064 = vmatpush1.bf16.msra.mxu1 %v4464_v5  ;;  %v5195_v5 = vld [vmem:[#allocation8 + $0x10] sm:$0xff]  }
 0x2f4   :  { %3065 = vmatprep.subr.bf16.mxu1 %v4465_v27  ;;  %v4488_v27 = vld [vmem:[#allocation2 + $0xe8] ss:$16 sps:$4 sm:$0xff]   ;;  %3904 = vmatpush3.bf16.msra.mxu0 %v5195_v5 }
 0x2f5   :  { %3905 = vmatprep.subr.bf16.mxu0 %v5200_v23 }
 0x2f7   :  { %3066 = vmatpush1.bf16.msra.mxu1 %v4466_v55  ;;  %v4489_v55 = vld [vmem:[#allocation2 + $0xcc] ss:$16 sps:$4 sm:$0xff]  }
 0x2f8   :  { %3067 = vmatprep.subr.bf16.mxu1 %v4467_v10  ;;  %v5202_v10 = vld [vmem:[#allocation8 + $0x8] sm:$0xff]  }
 0x2f9   :  { %3906 = vmatpush3.bf16.msra.mxu0 %v5202_v10 }
 0x2fb   :  { %3068 = vmatpush1.bf16.msra.mxu1 %v4468_v25  ;;  %v4490_v25 = vld [vmem:[#allocation2 + $0xc8] ss:$16 sps:$4 sm:$0xff]  }
 0x2fc   :  { %3069 = vmatprep.subr.bf16.mxu1 %v4469_v35  ;;  %v4491_v35 = vld [vmem:[#allocation2 + $0xac] ss:$16 sps:$4 sm:$0xff]  }
 0x2ff   :  { %3070 = vmatpush1.bf16.msra.mxu1 %v4470_v38  ;;  %v5206_v38 = vld [vmem:[#allocation8 + $0x40] sm:$0xff]  }
 0x300   :  { %3071 = vmatprep.subr.bf16.mxu1 %v4471_v42  ;;  %v5208_v42 = vld [vmem:[#allocation8] sm:$0xff]   ;;  %3907 = vmatprep.subr.bf16.mxu0 %v5206_v38 }
 0x301   :  { %3908 = vmatpush3.bf16.msra.mxu0 %v5208_v42 }
 0x303   :  { %3072 = vmatpush2.bf16.msra.mxu1 %v4472_v45  ;;  %v4492_v45 = vld [vmem:[#allocation2 + $0xa8] ss:$16 sps:$4 sm:$0xff]  }
 0x304   :  { %3073 = vmatprep.subr.bf16.mxu1 %v4473_v60  ;;  %v4493_v60 = vld [vmem:[#allocation2 + $0x8c] ss:$16 sps:$4 sm:$0xff]  }
 0x307   :  { %3074 = vmatpush2.bf16.msra.mxu1 %v4474_v46  ;;  %v4494_v46 = vld [vmem:[#allocation2 + $0x2e4] ss:$16 sps:$4 sm:$0xff]  }
 0x308   :  { %3075 = vmatprep.subr.bf16.mxu1 %v4475_v47  ;;  %3096 = vmatprep.subr.bf16.mxu0 %v4494_v46  ;;  %v4495_v47 = vld [vmem:[#allocation2 + $0x88] ss:$16 sps:$4 sm:$0xff]  }
 0x309   :  { %v4515_v46 = vld [vmem:[#allocation2 + $0x148] ss:$16 sps:$4 sm:$0xff]  }
 0x30b   :  { %3076 = vmatpush2.bf16.msra.mxu1 %v4476_v17  ;;  %v4496_v17 = vld [vmem:[#allocation2 + $0x6c] ss:$16 sps:$4 sm:$0xff]  }
 0x30c   :  { %3077 = vmatprep.subr.bf16.mxu1 %v4477_v18  ;;  %v4497_v18 = vld [vmem:[#allocation2 + $0x68] ss:$16 sps:$4 sm:$0xff]  }
 0x30f   :  { %3078 = vmatpush2.bf16.msra.mxu1 %v4478_v43  ;;  %v4498_v43 = vld [vmem:[#allocation2 + $0x4c] ss:$16 sps:$4 sm:$0xff]  }
 0x310   :  { %3079 = vmatprep.subr.bf16.mxu1 %v4479_v44  ;;  %v4499_v44 = vld [vmem:[#allocation2 + $0x48] ss:$16 sps:$4 sm:$0xff]  }
 0x313   :  { %3080 = vmatpush2.bf16.msra.mxu1 %v4480_v21  ;;  %v4500_v21 = vld [vmem:[#allocation2 + $0x2c] ss:$16 sps:$4 sm:$0xff]  }
 0x314   :  { %3081 = vmatprep.subr.bf16.mxu1 %v4481_v48  ;;  %v4501_v48 = vld [vmem:[#allocation2 + $0x28] ss:$16 sps:$4 sm:$0xff]  }
 0x317   :  { %3082 = vmatpush2.bf16.msra.mxu1 %v4482_v50  ;;  %v4502_v50 = vld [vmem:[#allocation2 + $0xc] ss:$16 sps:$4 sm:$0xff]  }
 0x318   :  { %3083 = vmatprep.subr.bf16.mxu1 %v4483_v51  ;;  %v4503_v51 = vld [vmem:[#allocation2 + $0x8] ss:$16 sps:$4 sm:$0xff]  }
 0x31b   :  { %3084 = vmatpush2.bf16.msra.mxu1 %v4484_v53  ;;  %v4504_v53 = vld [vmem:[#allocation2 + $0x1ec] ss:$16 sps:$4 sm:$0xff]  }
 0x31c   :  { %3085 = vmatprep.subr.bf16.mxu1 %v4485_v63  ;;  %v4506_v63 = vld [vmem:[#allocation2 + $0x1cc] ss:$16 sps:$4 sm:$0xff]  }
 0x31f   :  { %3086 = vmatpush2.bf16.msra.mxu1 %v4486_v31  ;;  %v4507_v31 = vld [vmem:[#allocation2 + $0x1c8] ss:$16 sps:$4 sm:$0xff]  }
 0x320   :  { %3137 = vmatprep.subr.bf16.mxu1 %v4487_v3  ;;  %v4508_v3 = vld [vmem:[#allocation2 + $0x1ac] ss:$16 sps:$4 sm:$0xff]  }
 0x322   :  { %3088 = vmatmul.mubr.bf16.vlgmr.msra.gmra.mxu1 %v5193_v33 }
 0x323   :  { %3138 = vmatpush1.bf16.msra.mxu1 %v4488_v27  ;;  %3169 = vmatprep.mubr.bf16.mxu1 %v5156_v49  ;;  %v4509_v27 = vld [vmem:[#allocation2 + $0x1a8] ss:$16 sps:$4 sm:$0xff]  }
 0x324   :  { %3139 = vmatprep.subr.bf16.mxu1 %v4489_v55  ;;  %v4510_v55 = vld [vmem:[#allocation2 + $0x18c] ss:$16 sps:$4 sm:$0xff]  }
 0x327   :  { %3140 = vmatpush1.bf16.msra.mxu1 %v4490_v25  ;;  %v4511_v25 = vld [vmem:[#allocation2 + $0x188] ss:$16 sps:$4 sm:$0xff]  }
 0x328   :  { %3141 = vmatprep.subr.bf16.mxu1 %v4491_v35  ;;  %v4512_v35 = vld [vmem:[#allocation2 + $0x16c] ss:$16 sps:$4 sm:$0xff]  }
 0x32b   :  { %3142 = vmatpush1.bf16.msra.mxu1 %v4492_v45  ;;  %v4513_v45 = vld [vmem:[#allocation2 + $0x168] ss:$16 sps:$4 sm:$0xff]  }
 0x32c   :  { %3143 = vmatprep.subr.bf16.mxu1 %v4493_v60  ;;  %v4514_v60 = vld [vmem:[#allocation2 + $0x14c] ss:$16 sps:$4 sm:$0xff]  }
 0x32f   :  { %3144 = vmatpush1.bf16.msra.mxu1 %v4495_v47  ;;  %v4516_v47 = vld [vmem:[#allocation2 + $0x12c] ss:$16 sps:$4 sm:$0xff]  }
 0x330   :  { %3145 = vmatprep.subr.bf16.mxu1 %v4496_v17  ;;  %v4517_v17 = vld [vmem:[#allocation2 + $0x128] ss:$16 sps:$4 sm:$0xff]  }
 0x333   :  { %3146 = vmatpush1.bf16.msra.mxu1 %v4497_v18  ;;  %v4518_v18 = vld [vmem:[#allocation2 + $0x10c] ss:$16 sps:$4 sm:$0xff]  }
 0x334   :  { %3147 = vmatprep.subr.bf16.mxu1 %v4498_v43  ;;  %v4519_v43 = vld [vmem:[#allocation2 + $0x108] ss:$16 sps:$4 sm:$0xff]  }
 0x337   :  { %3148 = vmatpush1.bf16.msra.mxu1 %v4499_v44  ;;  %v4520_v44 = vld [vmem:[#allocation5 + $0xe4] ss:$16 sps:$4 sm:$0xff]  }
 0x338   :  { %3149 = vmatprep.subr.bf16.mxu1 %v4500_v21 }
 0x33b   :  { %3150 = vmatpush1.bf16.msra.mxu1 %v4501_v48  ;;  %v4521_v48 = vld [vmem:[#allocation5 + $0xe0] ss:$16 sps:$4 sm:$0xff]  }
 0x33c   :  { %3151 = vmatprep.subr.bf16.mxu1 %v4502_v50 }
 0x33f   :  { %3152 = vmatpush1.bf16.msra.mxu1 %v4503_v51  ;;  %v4522_v51 = vld [vmem:[#allocation5 + $0xc4] ss:$16 sps:$4 sm:$0xff]  }
 0x340   :  { %3153 = vmatprep.subr.bf16.mxu1 %v4504_v53 }
 0x343   :  { %3154 = vmatpush2.bf16.msra.mxu1 %v4505_v54  ;;  %v4523_v54 = vld [vmem:[#allocation5 + $0xc0] ss:$16 sps:$4 sm:$0xff]  }
 0x344   :  { %3155 = vmatprep.subr.bf16.mxu1 %v4506_v63 }
 0x347   :  { %3156 = vmatpush2.bf16.msra.mxu1 %v4507_v31  ;;  %v4524_v31 = vld [vmem:[#allocation5 + $0xa4] ss:$16 sps:$4 sm:$0xff]  }
 0x348   :  { %3157 = vmatprep.subr.bf16.mxu1 %v4508_v3  ;;  %v4525_v3 = vld [vmem:[#allocation5 + $0xa0] ss:$16 sps:$4 sm:$0xff]  }
 0x34b   :  { %3158 = vmatpush2.bf16.msra.mxu1 %v4509_v27  ;;  %v4526_v27 = vld [vmem:[#allocation5 + $0x84] ss:$16 sps:$4 sm:$0xff]  }
 0x34c   :  { %3159 = vmatprep.subr.bf16.mxu1 %v4510_v55  ;;  %v4527_v55 = vld [vmem:[#allocation5 + $0x80] ss:$16 sps:$4 sm:$0xff]  }
 0x34f   :  { %3160 = vmatpush2.bf16.msra.mxu1 %v4511_v25  ;;  %v4528_v25 = vld [vmem:[#allocation5 + $0x64] ss:$16 sps:$4 sm:$0xff]  }
 0x350   :  { %3161 = vmatprep.subr.bf16.mxu1 %v4512_v35  ;;  %v4529_v35 = vld [vmem:[#allocation5 + $0x60] ss:$16 sps:$4 sm:$0xff]  }
 0x353   :  { %3162 = vmatpush2.bf16.msra.mxu1 %v4513_v45  ;;  %v4530_v45 = vld [vmem:[#allocation5 + $0x44] ss:$16 sps:$4 sm:$0xff]  }
 0x354   :  { %3163 = vmatprep.subr.bf16.mxu1 %v4514_v60  ;;  %v4531_v60 = vld [vmem:[#allocation5 + $0x40] ss:$16 sps:$4 sm:$0xff]  }
 0x357   :  { %3164 = vmatpush2.bf16.msra.mxu1 %v4515_v46  ;;  %v4532_v46 = vld [vmem:[#allocation5 + $0x24] ss:$16 sps:$4 sm:$0xff]  }
 0x358   :  { %3165 = vmatprep.subr.bf16.mxu1 %v4516_v47  ;;  %v4533_v47 = vld [vmem:[#allocation5 + $0x20] ss:$16 sps:$4 sm:$0xff]  }
 0x35b   :  { %3166 = vmatpush2.bf16.msra.mxu1 %v4517_v17  ;;  %v4534_v17 = vld [vmem:[#allocation5 + $0x4] ss:$16 sps:$4 sm:$0xff]  }
 0x35c   :  { %3167 = vmatprep.subr.bf16.mxu1 %v4518_v18  ;;  %v4535_v18 = vld [vmem:[#allocation5] ss:$16 sps:$4 sm:$0xff]  }
 0x35f   :  { %3168 = vmatpush2.bf16.msra.mxu1 %v4519_v43  ;;  %v4536_v43 = vld [vmem:[#allocation5 + $0x1e4] ss:$16 sps:$4 sm:$0xff]  }
 0x360   :  { %3231 = vmatprep.subr.bf16.mxu1 %v4520_v44  ;;  %v4537_v44 = vld [vmem:[#allocation5 + $0x1e0] ss:$16 sps:$4 sm:$0xff]  }
 0x362   :  { %3170 = vmatmul.mubr.bf16.vlgmr.msra.gmra.mxu1 %v5193_v33  ;;  %v5213_v21 = vpop.f32.mrf.mxu0 }
 0x363   :  { %3232 = vmatpush1.bf16.msra.mxu1 %v4521_v48  ;;  %v4538_v48 = vld [vmem:[#allocation5 + $0x1c4] ss:$16 sps:$4 sm:$0xff]  }
 0x364   :  { %v5215_v50 = vpop.f32.mrf.mxu0  ;;  %3233 = vmatprep.subr.bf16.mxu1 %v4522_v51  ;;  %v4539_v51 = vld [vmem:[#allocation5 + $0x1c0] ss:$16 sps:$4 sm:$0xff]  }
 0x366   :  { %v2789_v53 = vpop.f32.mrf.mxu0 }
 0x367   :  { %3234 = vmatpush1.bf16.msra.mxu1 %v4523_v54  ;;  %v4540_v53 = vld [vmem:[#allocation5 + $0x1a4] ss:$16 sps:$4 sm:$0xff]   ;;  %v4541_v54 = vld [vmem:[#allocation5 + $0x1a0] ss:$16 sps:$4 sm:$0xff]  }
 0x368   :  { %v2790_v63 = vpop.f32.mrf.mxu0  ;;  %3235 = vmatprep.subr.bf16.mxu1 %v4524_v31  ;;  %v4543_v31 = vld [vmem:[#allocation5 + $0x180] ss:$16 sps:$4 sm:$0xff]  }
 0x369   :  { %v4542_v63 = vld [vmem:[#allocation5 + $0x184] ss:$16 sps:$4 sm:$0xff]  }
 0x36b   :  { %3236 = vmatpush1.bf16.msra.mxu1 %v4525_v3  ;;  %v4544_v3 = vld [vmem:[#allocation5 + $0x164] ss:$16 sps:$4 sm:$0xff]  }
 0x36c   :  { %3237 = vmatprep.subr.bf16.mxu1 %v4526_v27  ;;  %v4545_v27 = vld [vmem:[#allocation5 + $0x160] ss:$16 sps:$4 sm:$0xff]  }
 0x36f   :  { %3238 = vmatpush1.bf16.msra.mxu1 %v4527_v55  ;;  %v4546_v55 = vld [vmem:[#allocation5 + $0x144] ss:$16 sps:$4 sm:$0xff]  }
 0x370   :  { %3239 = vmatprep.subr.bf16.mxu1 %v4528_v25  ;;  %v471_v25 = vld [vmem:[%s5333_s8] sm:$0x3] }
 0x373   :  { %3240 = vmatpush1.bf16.msra.mxu1 %v4529_v35  ;;  %v4547_v35 = vld [vmem:[#allocation5 + $0x140] ss:$16 sps:$4 sm:$0xff]  }
 0x374   :  { %3241 = vmatprep.subr.bf16.mxu1 %v4530_v45  ;;  %v476_v45 = vrot.slane %v471_v25, %v4972_v12 }
 0x377   :  { %3242 = vmatpush1.bf16.msra.mxu1 %v4531_v60  ;;  %v4548_v60 = vld [vmem:[#allocation5 + $0x124] ss:$16 sps:$4 sm:$0xff]  }
 0x378   :  { %3243 = vmatprep.subr.bf16.mxu1 %v4532_v46  ;;  %v480_v46 = vrot.slane %v471_v25, %v4974_v16 }
 0x37b   :  { %3244 = vmatpush1.bf16.msra.mxu1 %v4533_v47  ;;  %v4549_v47 = vld [vmem:[#allocation5 + $0x120] ss:$16 sps:$4 sm:$0xff]  }
 0x37c   :  { %3245 = vmatprep.subr.bf16.mxu1 %v4534_v17  ;;  %v483_v17 = vpack.c.bf16 %v476_v45, %v476_v45 }
 0x37f   :  { %3246 = vmatpush1.bf16.msra.mxu1 %v4535_v18  ;;  %v4550_v18 = vld [vmem:[#allocation5 + $0x104] ss:$16 sps:$4 sm:$0xff]  }
 0x380   :  { %3247 = vmatprep.subr.bf16.mxu1 %v4536_v43  ;;  %v484_v43 = vpack.c.bf16 %v480_v46, %v480_v46 }
 0x383   :  { %3248 = vmatpush2.bf16.msra.mxu1 %v4537_v44  ;;  %v4551_v44 = vld [vmem:[#allocation5 + $0x100] ss:$16 sps:$4 sm:$0xff]  }
 0x384   :  { %3249 = vmatprep.subr.bf16.mxu1 %v4538_v48  ;;  %v2836_v48 = vpack.i.b16 %v483_v17, %v483_v17 }
 0x387   :  { %3250 = vmatpush2.bf16.msra.mxu1 %v4539_v51  ;;  %v4552_v51 = vld [vmem:[#allocation5 + $0xec] ss:$16 sps:$4 sm:$0xff]  }
 0x388   :  { %3251 = vmatprep.subr.bf16.mxu1 %v4540_v53  ;;  %v2843_v53 = vpack.i.b16 %v484_v43, %v484_v43  ;;  %v4555_v43 = vld [vmem:[#allocation2 + $0x2c0] ss:$16 sps:$4 sm:$0xff]  }
 0x38b   :  { %3252 = vmatpush2.bf16.msra.mxu1 %v4541_v54 }
 0x38c   :  { %3253 = vmatprep.subr.bf16.mxu1 %v4542_v63 }
 0x38f   :  { %3254 = vmatpush2.bf16.msra.mxu1 %v4543_v31  ;;  %v5224_v31 = vrot.slane %v2836_v48, %v4972_v12  ;;  %v4557_v48 = vld [vmem:[#allocation2 + $0x2a0] ss:$16 sps:$4 sm:$0xff]  }
 0x390   :  { %3255 = vmatprep.subr.bf16.mxu1 %v4544_v3 }
 0x393   :  { %3256 = vmatpush2.bf16.msra.mxu1 %v4545_v27 }
 0x394   :  { %3257 = vmatprep.subr.bf16.mxu1 %v4546_v55  ;;  %v5228_v55 = vrot.slane %v2843_v53, %v4972_v12  ;;  %v4554_v12 = vld [vmem:[#allocation2 + $0x2c4] ss:$16 sps:$4 sm:$0xff]  }
 0x395   :  { %v4560_v53 = vld [vmem:[#allocation2 + $0x264] ss:$16 sps:$4 sm:$0xff]  }
 0x397   :  { %3258 = vmatpush2.bf16.msra.mxu1 %v4547_v35 }
 0x398   :  { %3259 = vmatprep.subr.bf16.mxu1 %v4548_v60 }
 0x39b   :  { %3260 = vmatpush2.bf16.msra.mxu1 %v4549_v47  ;;  %v3050_v47 = vmax.f32 %v5033_v59, 0.0  ;;  %v4558_v59 = vld [vmem:[#allocation2 + $0x284] ss:$16 sps:$4 sm:$0xff]  }
 0x39c   :  { %3261 = vmatprep.subr.bf16.mxu1 %v4550_v18 }
 0x39d   :  { %v5235_v18 = vpack.c.bf16 %v3050_v47, %v3050_v47  ;;  %v4571_v47 = vld [vmem:[#allocation2 + $0x3c0] ss:$16 sps:$4 sm:$0xff]  }
 0x39f   :  { %3262 = vmatpush2.bf16.msra.mxu1 %v4551_v44  ;;  %v4556_v44 = vld [vmem:[#allocation2 + $0x2a4] ss:$16 sps:$4 sm:$0xff]  }
 0x3a0   :  { %3313 = vmatprep.subr.bf16.mxu1 %v4552_v51  ;;  %v4559_v51 = vld [vmem:[#allocation2 + $0x280] ss:$16 sps:$4 sm:$0xff]  }
 0x3a2   :  { %v2826_v54 = vpop.f32.mrf.mxu1 }
 0x3a3   :  { %v2827_v63 = vadd.f32 %v2826_v54, %v5213_v21  ;;  %v4561_v54 = vld [vmem:[#allocation2 + $0x260] ss:$16 sps:$4 sm:$0xff]  }
 0x3a4   :  { %v2828_v3 = vpop.f32.mrf.mxu1 }
 0x3a5   :  { %v2833_v16 = vpack.c.bf16 %v2827_v63, %v2827_v63  ;;  %v2829_v27 = vadd.f32 %v2828_v3, %v5215_v50  ;;  %v4553_v50 = vld [vmem:[#allocation2 + $0x2e0] ss:$16 sps:$4 sm:$0xff]   ;;  %v4562_v63 = vld [vmem:[#allocation2 + $0x244] ss:$16 sps:$4 sm:$0xff]  }
 0x3a6   :  { %v2830_v25 = vpop.f32.mrf.mxu1  ;;  %v4563_v3 = vld [vmem:[#allocation2 + $0x240] ss:$16 sps:$4 sm:$0xff]  }
 0x3a7   :  { %v2834_v35 = vpack.c.bf16 %v2829_v27, %v2829_v27  ;;  %v2849_v45 = vadd.bf16 %v5224_v31, %v2833_v16  ;;  %v4564_v16 = vld [vmem:[#allocation2 + $0x224] ss:$16 sps:$4 sm:$0xff]   ;;  %v4565_v27 = vld [vmem:[#allocation2 + $0x220] ss:$16 sps:$4 sm:$0xff]  }
 0x3a8   :  { %v2831_v60 = vpop.f32.mrf.mxu1  ;;  %v4566_v25 = vld [vmem:[#allocation2 + $0x204] ss:$16 sps:$4 sm:$0xff]  }
 0x3a9   :  { %v2850_v46 = vadd.bf16 %v5228_v55, %v2834_v35  ;;  %v2851_v17 = vmax.bf16 %v4882_v1, %v2849_v45  ;;  %v4567_v35 = vld [vmem:[#allocation2 + $0x200] ss:$16 sps:$4 sm:$0xff]   ;;  %v4568_v45 = vld [vmem:[#allocation2 + $0x3e4] ss:$16 sps:$4 sm:$0xff]  }
 0x3aa   :  { %v4569_v60 = vld [vmem:[#allocation2 + $0x3e0] ss:$16 sps:$4 sm:$0xff]  }
 0x3ab   :  { %v2852_v21 = vmax.bf16 %v4882_v1, %v2850_v46  ;;  %v4570_v46 = vld [vmem:[#allocation2 + $0x3c4] ss:$16 sps:$4 sm:$0xff]  }
 0x3ad   :  { %2987 = vmatprep.mubr.bf16.mxu0 %v2852_v21  ;;  %v4572_v21 = vld [vmem:[#allocation2 + $0x3a4] ss:$16 sps:$4 sm:$0xff]  }
 0x3ae   :  { %2988 = vmatmul.mubr.bf16.vlgmr.msra.gmra.mxu0 %v2851_v17  ;;  %v4573_v17 = vld [vmem:[#allocation2 + $0x3a0] ss:$16 sps:$4 sm:$0xff]  }
 0x3af   :  { %3097 = vmatpush1.bf16.msra.mxu0 %v4553_v50  ;;  %3128 = vmatprep.mubr.bf16.mxu0 %v5235_v18  ;;  %v4574_v50 = vld [vmem:[#allocation2 + $0x384] ss:$16 sps:$4 sm:$0xff]  }
 0x3b0   :  { %3098 = vmatprep.subr.bf16.mxu0 %v4554_v12  ;;  %v4575_v12 = vld [vmem:[#allocation2 + $0x380] ss:$16 sps:$4 sm:$0xff]  }
 0x3b3   :  { %3099 = vmatpush1.bf16.msra.mxu0 %v4555_v43  ;;  %v4576_v43 = vld [vmem:[#allocation2 + $0x364] ss:$16 sps:$4 sm:$0xff]  }
 0x3b4   :  { %3100 = vmatprep.subr.bf16.mxu0 %v4556_v44  ;;  %v4577_v44 = vld [vmem:[#allocation2 + $0x360] ss:$16 sps:$4 sm:$0xff]  }
 0x3b7   :  { %3101 = vmatpush1.bf16.msra.mxu0 %v4557_v48  ;;  %v4578_v48 = vld [vmem:[#allocation2 + $0x344] ss:$16 sps:$4 sm:$0xff]  }
 0x3b8   :  { %3102 = vmatprep.subr.bf16.mxu0 %v4558_v59 }
 0x3bb   :  { %3103 = vmatpush1.bf16.msra.mxu0 %v4559_v51  ;;  %v4579_v51 = vld [vmem:[#allocation2 + $0x340] ss:$16 sps:$4 sm:$0xff]  }
 0x3bc   :  { %3104 = vmatprep.subr.bf16.mxu0 %v4560_v53 }
 0x3bf   :  { %3105 = vmatpush1.bf16.msra.mxu0 %v4561_v54  ;;  %v4580_v54 = vld [vmem:[#allocation2 + $0x324] ss:$16 sps:$4 sm:$0xff]  }
 0x3c0   :  { %3106 = vmatprep.subr.bf16.mxu0 %v4562_v63 }
 0x3c3   :  { %3107 = vmatpush1.bf16.msra.mxu0 %v4563_v3  ;;  %v4581_v3 = vld [vmem:[#allocation2 + $0x320] ss:$16 sps:$4 sm:$0xff]  }
 0x3c4   :  { %3108 = vmatprep.subr.bf16.mxu0 %v4564_v16  ;;  %v3049_v16 = vmax.f32 %v5029_v57, 0.0  ;;  %v4588_v57 = vld [vmem:[#allocation2 + $0x2ac] ss:$16 sps:$4 sm:$0xff]  }
 0x3c7   :  { %3109 = vmatpush1.bf16.msra.mxu0 %v4565_v27 }
 0x3c8   :  { %3110 = vmatprep.subr.bf16.mxu0 %v4566_v25  ;;  %v4582_v25 = vld [vmem:[#allocation2 + $0x304] ss:$16 sps:$4 sm:$0xff]  }
 0x3cb   :  { %3111 = vmatpush1.bf16.msra.mxu0 %v4567_v35  ;;  %v4583_v35 = vld [vmem:[#allocation2 + $0x300] ss:$16 sps:$4 sm:$0xff]  }
 0x3cc   :  { %3112 = vmatprep.subr.bf16.mxu0 %v4568_v45  ;;  %v5243_v45 = vpack.c.bf16 %v3049_v16, %v3049_v16  ;;  %v4599_v16 = vld [vmem:[#allocation2 + $0x208] ss:$16 sps:$4 sm:$0xff]  }
 0x3cf   :  { %3113 = vmatpush2.bf16.msra.mxu0 %v4569_v60  ;;  %v4584_v60 = vld [vmem:[#allocation2 + $0x2ec] ss:$16 sps:$4 sm:$0xff]  }
 0x3d0   :  { %3114 = vmatprep.subr.bf16.mxu0 %v4570_v46  ;;  %v4585_v46 = vld [vmem:[#allocation2 + $0x2e8] ss:$16 sps:$4 sm:$0xff]  }
 0x3d3   :  { %3115 = vmatpush2.bf16.msra.mxu0 %v4571_v47  ;;  %v4586_v47 = vld [vmem:[#allocation2 + $0x2cc] ss:$16 sps:$4 sm:$0xff]  }
 0x3d4   :  { %3116 = vmatprep.subr.bf16.mxu0 %v4572_v21  ;;  %v4587_v21 = vld [vmem:[#allocation2 + $0x2c8] ss:$16 sps:$4 sm:$0xff]  }
 0x3d7   :  { %3117 = vmatpush2.bf16.msra.mxu0 %v4573_v17  ;;  %v4589_v17 = vld [vmem:[#allocation2 + $0x2a8] ss:$16 sps:$4 sm:$0xff]  }
 0x3d8   :  { %3118 = vmatprep.subr.bf16.mxu0 %v4574_v50  ;;  %v4590_v50 = vld [vmem:[#allocation2 + $0x28c] ss:$16 sps:$4 sm:$0xff]  }
 0x3db   :  { %3119 = vmatpush2.bf16.msra.mxu0 %v4575_v12  ;;  %v4591_v12 = vld [vmem:[#allocation2 + $0x288] ss:$16 sps:$4 sm:$0xff]  }
 0x3dc   :  { %3120 = vmatprep.subr.bf16.mxu0 %v4576_v43  ;;  %v4592_v43 = vld [vmem:[#allocation2 + $0x26c] ss:$16 sps:$4 sm:$0xff]  }
 0x3df   :  { %3121 = vmatpush2.bf16.msra.mxu0 %v4577_v44  ;;  %v4593_v44 = vld [vmem:[#allocation2 + $0x268] ss:$16 sps:$4 sm:$0xff]  }
 0x3e0   :  { %3122 = vmatprep.subr.bf16.mxu0 %v4578_v48  ;;  %v4594_v48 = vld [vmem:[#allocation2 + $0x24c] ss:$16 sps:$4 sm:$0xff]  }
 0x3e2   :  { %v5238_v59 = vpop.f32.mrf.mxu1 }
 0x3e3   :  { %3123 = vmatpush2.bf16.msra.mxu0 %v4579_v51  ;;  %v4595_v51 = vld [vmem:[#allocation2 + $0x248] ss:$16 sps:$4 sm:$0xff]  }
 0x3e4   :  { %v5240_v53 = vpop.f32.mrf.mxu1  ;;  %3124 = vmatprep.subr.bf16.mxu0 %v4580_v54  ;;  %v4596_v54 = vld [vmem:[#allocation2 + $0x22c] ss:$16 sps:$4 sm:$0xff]  }
 0x3e6   :  { %v3093_v63 = vpop.f32.mrf.mxu1 }
 0x3e7   :  { %3125 = vmatpush2.bf16.msra.mxu0 %v4581_v3  ;;  %v4597_v63 = vld [vmem:[#allocation2 + $0x228] ss:$16 sps:$4 sm:$0xff]   ;;  %v4598_v3 = vld [vmem:[#allocation2 + $0x20c] ss:$16 sps:$4 sm:$0xff]  }
 0x3e8   :  { %v3094_v27 = vpop.f32.mrf.mxu1  ;;  %3126 = vmatprep.subr.bf16.mxu0 %v4582_v25  ;;  %v4601_v25 = vld [vmem:[#allocation2 + $0x3e8] ss:$16 sps:$4 sm:$0xff]  }
 0x3e9   :  { %v4600_v27 = vld [vmem:[#allocation2 + $0x3ec] ss:$16 sps:$4 sm:$0xff]  }
 0x3eb   :  { %3127 = vmatpush2.bf16.msra.mxu0 %v4583_v35  ;;  %v4602_v35 = vld [vmem:[#allocation2 + $0x3cc] ss:$16 sps:$4 sm:$0xff]  }
 0x3ec   :  { %3178 = vmatprep.subr.bf16.mxu0 %v4584_v60  ;;  %v4603_v60 = vld [vmem:[#allocation2 + $0x3c8] ss:$16 sps:$4 sm:$0xff]  }
 0x3ee   :  { %3129 = vmatmul.mubr.bf16.vlgmr.msra.gmra.mxu0 %v5243_v45 }
 0x3ef   :  { %3179 = vmatpush1.bf16.msra.mxu0 %v4585_v46  ;;  %3210 = vmatprep.mubr.bf16.mxu0 %v5235_v18  ;;  %v4604_v46 = vld [vmem:[#allocation2 + $0x3ac] ss:$16 sps:$4 sm:$0xff]  }
 0x3f0   :  { %3180 = vmatprep.subr.bf16.mxu0 %v4586_v47  ;;  %v4605_v47 = vld [vmem:[#allocation2 + $0x3a8] ss:$16 sps:$4 sm:$0xff]  }
 0x3f3   :  { %3181 = vmatpush1.bf16.msra.mxu0 %v4587_v21  ;;  %v4606_v21 = vld [vmem:[#allocation2 + $0x38c] ss:$16 sps:$4 sm:$0xff]  }
 0x3f4   :  { %3182 = vmatprep.subr.bf16.mxu0 %v4588_v57  ;;  %v4607_v57 = vld [vmem:[#allocation2 + $0x388] ss:$16 sps:$4 sm:$0xff]  }
 0x3f7   :  { %3183 = vmatpush1.bf16.msra.mxu0 %v4589_v17  ;;  %v4608_v17 = vld [vmem:[#allocation2 + $0x36c] ss:$16 sps:$4 sm:$0xff]  }
 0x3f8   :  { %3184 = vmatprep.subr.bf16.mxu0 %v4590_v50  ;;  %v4609_v50 = vld [vmem:[#allocation2 + $0x368] ss:$16 sps:$4 sm:$0xff]  }
 0x3fb   :  { %3185 = vmatpush1.bf16.msra.mxu0 %v4591_v12  ;;  %v4610_v12 = vld [vmem:[#allocation2 + $0x34c] ss:$16 sps:$4 sm:$0xff]  }
 0x3fc   :  { %3186 = vmatprep.subr.bf16.mxu0 %v4592_v43 }
 0x3ff   :  { %3187 = vmatpush1.bf16.msra.mxu0 %v4593_v44  ;;  %v4611_v44 = vld [vmem:[#allocation2 + $0x348] ss:$16 sps:$4 sm:$0xff]  }
 0x400   :  { %3188 = vmatprep.subr.bf16.mxu0 %v4594_v48 }
 0x403   :  { %3189 = vmatpush1.bf16.msra.mxu0 %v4595_v51  ;;  %v4612_v51 = vld [vmem:[#allocation2 + $0x32c] ss:$16 sps:$4 sm:$0xff]  }
 0x404   :  { %3190 = vmatprep.subr.bf16.mxu0 %v4596_v54 }
 0x407   :  { %3191 = vmatpush1.bf16.msra.mxu0 %v4597_v63  ;;  %v4613_v63 = vld [vmem:[#allocation2 + $0x328] ss:$16 sps:$4 sm:$0xff]  }
 0x408   :  { %3192 = vmatprep.subr.bf16.mxu0 %v4598_v3 }
 0x40b   :  { %3193 = vmatpush1.bf16.msra.mxu0 %v4599_v16  ;;  %v4614_v16 = vld [vmem:[#allocation2 + $0x30c] ss:$16 sps:$4 sm:$0xff]  }
 0x40c   :  { %3194 = vmatprep.subr.bf16.mxu0 %v4600_v27  ;;  %v4615_v27 = vld [vmem:[#allocation2 + $0x308] ss:$16 sps:$4 sm:$0xff]  }
 0x40f   :  { %3195 = vmatpush2.bf16.msra.mxu0 %v4601_v25  ;;  %v4616_v25 = vld [vmem:[#allocation5 + $0x2e4] ss:$16 sps:$4 sm:$0xff]  }
 0x410   :  { %3196 = vmatprep.subr.bf16.mxu0 %v4602_v35  ;;  %v4617_v35 = vld [vmem:[#allocation5 + $0x2e0] ss:$16 sps:$4 sm:$0xff]  }
 0x413   :  { %3197 = vmatpush2.bf16.msra.mxu0 %v4603_v60  ;;  %v4618_v60 = vld [vmem:[#allocation5 + $0x2c4] ss:$16 sps:$4 sm:$0xff]  }
 0x414   :  { %3198 = vmatprep.subr.bf16.mxu0 %v4604_v46  ;;  %v4619_v46 = vld [vmem:[#allocation5 + $0x2c0] ss:$16 sps:$4 sm:$0xff]  }
 0x417   :  { %3199 = vmatpush2.bf16.msra.mxu0 %v4605_v47  ;;  %v4620_v47 = vld [vmem:[#allocation5 + $0x2a4] ss:$16 sps:$4 sm:$0xff]  }
 0x418   :  { %3200 = vmatprep.subr.bf16.mxu0 %v4606_v21  ;;  %v4621_v21 = vld [vmem:[#allocation5 + $0x2a0] ss:$16 sps:$4 sm:$0xff]  }
 0x41b   :  { %3201 = vmatpush2.bf16.msra.mxu0 %v4607_v57  ;;  %v4622_v57 = vld [vmem:[#allocation5 + $0x284] ss:$16 sps:$4 sm:$0xff]  }
 0x41c   :  { %3202 = vmatprep.subr.bf16.mxu0 %v4608_v17  ;;  %v4623_v17 = vld [vmem:[#allocation5 + $0x280] ss:$16 sps:$4 sm:$0xff]  }
 0x41f   :  { %3203 = vmatpush2.bf16.msra.mxu0 %v4609_v50  ;;  %v4624_v50 = vld [vmem:[#allocation5 + $0x264] ss:$16 sps:$4 sm:$0xff]  }
 0x420   :  { %3204 = vmatprep.subr.bf16.mxu0 %v4610_v12  ;;  %v4625_v12 = vld [vmem:[#allocation5 + $0x260] ss:$16 sps:$4 sm:$0xff]  }
 0x422   :  { %v5247_v43 = vpop.f32.mrf.mxu1 }
 0x423   :  { %3205 = vmatpush2.bf16.msra.mxu0 %v4611_v44  ;;  %v4626_v44 = vld [vmem:[#allocation5 + $0x244] ss:$16 sps:$4 sm:$0xff]  }
 0x424   :  { %v5249_v48 = vpop.f32.mrf.mxu1  ;;  %3206 = vmatprep.subr.bf16.mxu0 %v4612_v51  ;;  %v4627_v51 = vld [vmem:[#allocation5 + $0x240] ss:$16 sps:$4 sm:$0xff]  }
 0x426   :  { %v3175_v54 = vpop.f32.mrf.mxu1 }
 0x427   :  { %3207 = vmatpush2.bf16.msra.mxu0 %v4613_v63  ;;  %v4628_v54 = vld [vmem:[#allocation5 + $0x224] ss:$16 sps:$4 sm:$0xff]   ;;  %v4629_v63 = vld [vmem:[#allocation5 + $0x220] ss:$16 sps:$4 sm:$0xff]  }
 0x428   :  { %v3176_v3 = vpop.f32.mrf.mxu1  ;;  %3208 = vmatprep.subr.bf16.mxu0 %v4614_v16  ;;  %v4631_v16 = vld [vmem:[#allocation5 + $0x200] ss:$16 sps:$4 sm:$0xff]  }
 0x429   :  { %v4630_v3 = vld [vmem:[#allocation5 + $0x204] ss:$16 sps:$4 sm:$0xff]  }
 0x42b   :  { %3209 = vmatpush2.bf16.msra.mxu0 %v4615_v27  ;;  %v4632_v27 = vld [vmem:[#allocation5 + $0x3e4] ss:$16 sps:$4 sm:$0xff]  }
 0x42c   :  { %3272 = vmatprep.subr.bf16.mxu0 %v4616_v25  ;;  %v4633_v25 = vld [vmem:[#allocation5 + $0x3e0] ss:$16 sps:$4 sm:$0xff]  }
 0x42e   :  { %3211 = vmatmul.mubr.bf16.vlgmr.msra.gmra.mxu0 %v5243_v45 }
 0x42f   :  { %3273 = vmatpush1.bf16.msra.mxu0 %v4617_v35  ;;  %v4634_v35 = vld [vmem:[#allocation5 + $0x3c4] ss:$16 sps:$4 sm:$0xff]  }
 0x430   :  { %3274 = vmatprep.subr.bf16.mxu0 %v4618_v60  ;;  %v4635_v60 = vld [vmem:[#allocation5 + $0x3c0] ss:$16 sps:$4 sm:$0xff]  }
 0x433   :  { %3275 = vmatpush1.bf16.msra.mxu0 %v4619_v46  ;;  %v4636_v46 = vld [vmem:[#allocation5 + $0x3a4] ss:$16 sps:$4 sm:$0xff]  }
 0x434   :  { %3276 = vmatprep.subr.bf16.mxu0 %v4620_v47  ;;  %v4637_v47 = vld [vmem:[#allocation5 + $0x3a0] ss:$16 sps:$4 sm:$0xff]  }
 0x437   :  { %3277 = vmatpush1.bf16.msra.mxu0 %v4621_v21  ;;  %v4638_v21 = vld [vmem:[#allocation5 + $0x384] ss:$16 sps:$4 sm:$0xff]  }
 0x438   :  { %3278 = vmatprep.subr.bf16.mxu0 %v4622_v57  ;;  %v4639_v57 = vld [vmem:[#allocation5 + $0x380] ss:$16 sps:$4 sm:$0xff]  }
 0x43b   :  { %3279 = vmatpush1.bf16.msra.mxu0 %v4623_v17  ;;  %v4640_v17 = vld [vmem:[#allocation5 + $0x364] ss:$16 sps:$4 sm:$0xff]  }
 0x43c   :  { %3280 = vmatprep.subr.bf16.mxu0 %v4624_v50  ;;  %v4641_v50 = vld [vmem:[#allocation5 + $0x360] ss:$16 sps:$4 sm:$0xff]  }
 0x43f   :  { %3281 = vmatpush1.bf16.msra.mxu0 %v4625_v12  ;;  %v4642_v12 = vld [vmem:[#allocation5 + $0x344] ss:$16 sps:$4 sm:$0xff]  }
 0x440   :  { %3282 = vmatprep.subr.bf16.mxu0 %v4626_v44  ;;  %v4643_v44 = vld [vmem:[#allocation5 + $0x340] ss:$16 sps:$4 sm:$0xff]  }
 0x443   :  { %3283 = vmatpush1.bf16.msra.mxu0 %v4627_v51  ;;  %v4644_v51 = vld [vmem:[#allocation5 + $0x324] ss:$16 sps:$4 sm:$0xff]  }
 0x444   :  { %3284 = vmatprep.subr.bf16.mxu0 %v4628_v54  ;;  %v4645_v54 = vld [vmem:[#allocation5 + $0x320] ss:$16 sps:$4 sm:$0xff]  }
 0x447   :  { %3285 = vmatpush1.bf16.msra.mxu0 %v4629_v63  ;;  %v4646_v63 = vld [vmem:[#allocation5 + $0x304] ss:$16 sps:$4 sm:$0xff]  }
 0x448   :  { %3286 = vmatprep.subr.bf16.mxu0 %v4630_v3  ;;  %v4647_v3 = vld [vmem:[#allocation5 + $0x300] ss:$16 sps:$4 sm:$0xff]  }
 0x44b   :  { %3287 = vmatpush1.bf16.msra.mxu0 %v4631_v16  ;;  %v4648_v16 = vld [vmem:[#allocation5 + $0x2ec] ss:$16 sps:$4 sm:$0xff]  }
 0x44c   :  { %3288 = vmatprep.subr.bf16.mxu0 %v4632_v27 }
 0x44f   :  { %3289 = vmatpush2.bf16.msra.mxu0 %v4633_v25  ;;  %v5255_v25 = vld [vmem:[%s5335_s10] ss:$0 sm:$0xff]  ;;  %s4885_s10 = smov [#allocation10]  }
 0x450   :  { %3290 = vmatprep.subr.bf16.mxu0 %v4634_v35  ;;  %s3542_s30 = sshll.u32 %s4885_s10, 4  ;;  %s3543_s30 = int_to_ptr.vmem [resolvable:$true] %s3542_s30 }
 0x451   :  { %s4843_s12 = scalar_lea.vmem %s3543_s30, 128  ;;  %p4848_p7 = scmp.lt.s32.totalorder %s3543_s30, %s3543_s30 }
 0x452   :  { %p4844_p6 = scmp.ne.s32.totalorder %s3543_s30, %s4843_s12  ;;  %p4849_p8 = scmp.lt.s32.totalorder %s4843_s12, %s4843_s12 }
 0x453   :  { %3291 = vmatpush2.bf16.msra.mxu0 %v4635_v60 }
 0x454   :  { %3292 = vmatprep.subr.bf16.mxu0 %v4636_v46  ;;  %p4850_p9 = por %p4849_p8, %p4848_p7 }
 0x456   :  { %p4851_p10 = pnand %p4850_p9, %p4844_p6 }
 0x457   :  { %3293 = vmatpush2.bf16.msra.mxu0 %v4637_v47 }
 0x458   :  { %3294 = vmatprep.subr.bf16.mxu0 %v4638_v21 }
 0x45b   :  { %3295 = vmatpush2.bf16.msra.mxu0 %v4639_v57 }
 0x45c   :  { %3296 = vmatprep.subr.bf16.mxu0 %v4640_v17 }
 0x45f   :  { %3297 = vmatpush2.bf16.msra.mxu0 %v4641_v50 }
 0x460   :  { %3298 = vmatprep.subr.bf16.mxu0 %v4642_v12 }
 0x463   :  { %3299 = vmatpush2.bf16.msra.mxu0 %v4643_v44 }
 0x464   :  { %3300 = vmatprep.subr.bf16.mxu0 %v4644_v51 }
 0x467   :  { %3301 = vmatpush2.bf16.msra.mxu0 %v4645_v54 }
 0x468   :  { %3302 = vmatprep.subr.bf16.mxu0 %v4646_v63 }
 0x46b   :  { %3303 = vmatpush2.bf16.msra.mxu0 %v4647_v3 }
 0x46c   :  { %3354 = vmatprep.subr.bf16.mxu0 %v4648_v16 }
 0x46e   :  { %v3909_v27 = vpop.f32.mrf.mxu0 }
 0x470   :  { %v3910_v35 = vpop.f32.mrf.mxu0 }
 0x471   :  { %v3911_v60 = vadd.f32 %v3910_v35, %v3909_v27 }
 0x472   :  { %v3912_v46 = vpop.f32.mrf.mxu0 }
 0x473   :  { %v2990_v47 = vadd.f32 %v3911_v60, %v5255_v25  ;;  %v4650_v46 = vld [vmem:[#allocation5 + $0xcc] ss:$16 sps:$4 sm:$0xff]  }
 0x474   :  { %v3913_v21 = vpop.f32.mrf.mxu0 }
 0x475   :  { %v2995_v57 = vpack.c.bf16 %v2990_v47, %v2990_v47  ;;  %v4652_v47 = vld [vmem:[#allocation5 + $0xac] ss:$16 sps:$4 sm:$0xff]   ;;  %v4655_v21 = vld [vmem:[#allocation5 + $0x88] ss:$16 sps:$4 sm:$0xff]  }
 0x477   :  { %2996 = vst [vmem:[#allocation10] sm:$0xf] %v2995_v57  ;;  %v4656_v57 = vld [vmem:[#allocation5 + $0x6c] ss:$16 sps:$4 sm:$0xff]  }
 0x4ae   :  { %v3130_v17 = vpop.f32.mrf.mxu0 }
 0x4af   :  { %v3131_v50 = vadd.f32 %v3130_v17, %v5238_v59  ;;  %v4649_v59 = vld [vmem:[#allocation5 + $0xe8] ss:$16 sps:$4 sm:$0xff]  }
 0x4b0   :  { %v3132_v12 = vpop.f32.mrf.mxu0  ;;  %v4657_v17 = vld [vmem:[#allocation5 + $0x68] ss:$16 sps:$4 sm:$0xff]  }
 0x4b1   :  { %v3219_v44 = vpack.c.bf16 %v3131_v50, %v3131_v50  ;;  %v3133_v51 = vadd.f32 %v3132_v12, %v5240_v53  ;;  %v4651_v53 = vld [vmem:[#allocation5 + $0xc8] ss:$16 sps:$4 sm:$0xff]   ;;  %v4658_v50 = vld [vmem:[#allocation5 + $0x4c] ss:$16 sps:$4 sm:$0xff]  }
 0x4b2   :  { %v3134_v54 = vpop.f32.mrf.mxu0  ;;  %v4659_v12 = vld [vmem:[#allocation5 + $0x48] ss:$16 sps:$4 sm:$0xff]  }
 0x4b3   :  { %v3220_v63 = vpack.c.bf16 %v3133_v51, %v3133_v51  ;;  %v3223_v3 = vadd.bf16 %v3219_v44, %v5061_v6  ;;  %v4653_v6 = vld [vmem:[#allocation5 + $0xa8] ss:$16 sps:$4 sm:$0xff]   ;;  %v4660_v44 = vld [vmem:[#allocation5 + $0x2c] ss:$16 sps:$4 sm:$0xff]  }
 0x4b4   :  { %v3135_v16 = vpop.f32.mrf.mxu0  ;;  %v4661_v51 = vld [vmem:[#allocation5 + $0x28] ss:$16 sps:$4 sm:$0xff]   ;;  %v4662_v54 = vld [vmem:[#allocation5 + $0xc] ss:$16 sps:$4 sm:$0xff]  }
 0x4b5   :  { %v3224_v27 = vadd.bf16 %v3220_v63, %v5064_v9  ;;  %v5264_v60 = vmax.bf16 %v4882_v1, %v3223_v3  ;;  %v4654_v9 = vld [vmem:[#allocation5 + $0x8c] ss:$16 sps:$4 sm:$0xff]   ;;  %v4663_v63 = vld [vmem:[#allocation5 + $0x8] ss:$16 sps:$4 sm:$0xff]  }
 0x4b6   :  { %v4664_v3 = vld [vmem:[#allocation5 + $0x1ec] ss:$16 sps:$4 sm:$0xff]   ;;  %v4665_v16 = vld [vmem:[#allocation5 + $0x1e8] ss:$16 sps:$4 sm:$0xff]  }
 0x4b7   :  { %v3228_v35 = vmax.bf16 %v4882_v1, %v3224_v27  ;;  %v4666_v27 = vld [vmem:[#allocation5 + $0x1cc] ss:$16 sps:$4 sm:$0xff]  }
 0x4b9   :  { %3263 = vmatprep.mubr.bf16.mxu1 %v3228_v35 }
 0x4ba   :  { %3264 = vmatmul.mubr.bf16.vlgmr.msra.gmra.mxu1 %v5264_v60 }
 0x4bb   :  { %3314 = vmatpush1.bf16.msra.mxu1 %v4649_v59  ;;  %3345 = vmatprep.mubr.bf16.mxu1 %v3228_v35  ;;  %v4667_v35 = vld [vmem:[#allocation5 + $0x1c8] ss:$16 sps:$4 sm:$0xff]   ;;  %v4668_v59 = vld [vmem:[#allocation5 + $0x1ac] ss:$16 sps:$4 sm:$0xff]  }
 0x4bc   :  { %3315 = vmatprep.subr.bf16.mxu1 %v4650_v46  ;;  %v4669_v46 = vld [vmem:[#allocation5 + $0x1a8] ss:$16 sps:$4 sm:$0xff]  }
 0x4bf   :  { %3316 = vmatpush1.bf16.msra.mxu1 %v4651_v53  ;;  %v4670_v53 = vld [vmem:[#allocation5 + $0x18c] ss:$16 sps:$4 sm:$0xff]  }
 0x4c0   :  { %3317 = vmatprep.subr.bf16.mxu1 %v4652_v47  ;;  %v4671_v47 = vld [vmem:[#allocation5 + $0x188] ss:$16 sps:$4 sm:$0xff]  }
 0x4c3   :  { %3318 = vmatpush1.bf16.msra.mxu1 %v4653_v6  ;;  %v4672_v6 = vld [vmem:[#allocation5 + $0x16c] ss:$16 sps:$4 sm:$0xff]  }
 0x4c4   :  { %3319 = vmatprep.subr.bf16.mxu1 %v4654_v9  ;;  %v4673_v9 = vld [vmem:[#allocation5 + $0x168] ss:$16 sps:$4 sm:$0xff]  }
 0x4c7   :  { %3320 = vmatpush1.bf16.msra.mxu1 %v4655_v21  ;;  %v4674_v21 = vld [vmem:[#allocation5 + $0x14c] ss:$16 sps:$4 sm:$0xff]  }
 0x4c8   :  { %3321 = vmatprep.subr.bf16.mxu1 %v4656_v57 }
 0x4cb   :  { %3322 = vmatpush1.bf16.msra.mxu1 %v4657_v17 }
 0x4cc   :  { %3323 = vmatprep.subr.bf16.mxu1 %v4658_v50  ;;  %v4675_v50 = vld [vmem:[#allocation5 + $0x148] ss:$16 sps:$4 sm:$0xff]  }
 0x4cf   :  { %3324 = vmatpush1.bf16.msra.mxu1 %v4659_v12 }
 0x4d0   :  { %3325 = vmatprep.subr.bf16.mxu1 %v4660_v44  ;;  %v4676_v44 = vld [vmem:[#allocation5 + $0x12c] ss:$16 sps:$4 sm:$0xff]  }
 0x4d3   :  { %3326 = vmatpush1.bf16.msra.mxu1 %v4661_v51 }
 0x4d4   :  { %3327 = vmatprep.subr.bf16.mxu1 %v4662_v54 }
 0x4d7   :  { %3328 = vmatpush1.bf16.msra.mxu1 %v4663_v63 }
 0x4d8   :  { %3329 = vmatprep.subr.bf16.mxu1 %v4664_v3 }
 0x4db   :  { %3330 = vmatpush2.bf16.msra.mxu1 %v4665_v16  ;;  %v4677_v16 = vld [vmem:[#allocation5 + $0x128] ss:$16 sps:$4 sm:$0xff]  }
 0x4dc   :  { %3331 = vmatprep.subr.bf16.mxu1 %v4666_v27 }
 0x4df   :  { %3332 = vmatpush2.bf16.msra.mxu1 %v4667_v35 }
 0x4e0   :  { %3333 = vmatprep.subr.bf16.mxu1 %v4668_v59  ;;  %v4678_v59 = vld [vmem:[#allocation5 + $0x10c] ss:$16 sps:$4 sm:$0xff]  }
 0x4e3   :  { %3334 = vmatpush2.bf16.msra.mxu1 %v4669_v46 }
 0x4e4   :  { %3335 = vmatprep.subr.bf16.mxu1 %v4670_v53 }
 0x4e7   :  { %3336 = vmatpush2.bf16.msra.mxu1 %v4671_v47 }
 0x4e8   :  { %3337 = vmatprep.subr.bf16.mxu1 %v4672_v6  ;;  %v4680_v6 = vld [vmem:[#allocation7 + $0x74] ss:$8 sps:$4 sm:$0xff]  }
 0x4eb   :  { %3338 = vmatpush2.bf16.msra.mxu1 %v4673_v9  ;;  %v4684_v9 = vld [vmem:[#allocation7 + $0x64] ss:$8 sps:$4 sm:$0xff]  }
 0x4ec   :  { %3339 = vmatprep.subr.bf16.mxu1 %v4674_v21  ;;  %v4685_v21 = vld [vmem:[#allocation5 + $0x2c8] ss:$16 sps:$4 sm:$0xff]  }
 0x4ee   :  { %v3212_v57 = vpop.f32.mrf.mxu0 }
 0x4ef   :  { %v3213_v17 = vadd.f32 %v3212_v57, %v5247_v43  ;;  %3340 = vmatpush2.bf16.msra.mxu1 %v4675_v50  ;;  %v4679_v43 = vld [vmem:[#allocation5 + $0x108] ss:$16 sps:$4 sm:$0xff]   ;;  %v4686_v57 = vld [vmem:[#allocation5 + $0x2ac] ss:$16 sps:$4 sm:$0xff]  }
 0x4f0   :  { %v3214_v12 = vpop.f32.mrf.mxu0  ;;  %3341 = vmatprep.subr.bf16.mxu1 %v4676_v44  ;;  %v4688_v50 = vld [vmem:[#allocation7 + $0x54] ss:$8 sps:$4 sm:$0xff]   ;;  %v4691_v44 = vld [vmem:[#allocation7 + $0x50] ss:$8 sps:$4 sm:$0xff]  }
 0x4f1   :  { %v3221_v51 = vpack.c.bf16 %v3213_v17, %v3213_v17  ;;  %v3215_v54 = vadd.f32 %v3214_v12, %v5249_v48  ;;  %v4682_v48 = vld [vmem:[#allocation5 + $0x2cc] ss:$16 sps:$4 sm:$0xff]   ;;  %v4687_v17 = vld [vmem:[#allocation7 + $0x60] ss:$8 sps:$4 sm:$0xff]  }
 0x4f2   :  { %v3216_v63 = vpop.f32.mrf.mxu0  ;;  %v4690_v12 = vld [vmem:[#allocation5 + $0x28c] ss:$16 sps:$4 sm:$0xff]  }
 0x4f3   :  { %v3222_v3 = vpack.c.bf16 %v3215_v54, %v3215_v54  ;;  %3342 = vmatpush2.bf16.msra.mxu1 %v4677_v16  ;;  %v3225_v27 = vadd.bf16 %v3221_v51, %v5078_v28  ;;  %v4681_v28 = vld [vmem:[#allocation5 + $0x2e8] ss:$16 sps:$4 sm:$0xff]   ;;  %v4692_v51 = vld [vmem:[#allocation7 + $0x44] ss:$8 sps:$4 sm:$0xff]   ;;  %v4696_v16 = vld [vmem:[#allocation7 + $0x34] ss:$8 sps:$4 sm:$0xff]  }
 0x4f4   :  { %v3217_v35 = vpop.f32.mrf.mxu0  ;;  %3343 = vmatprep.subr.bf16.mxu1 %v4678_v59  ;;  %v4693_v54 = vld [vmem:[#allocation5 + $0x288] ss:$16 sps:$4 sm:$0xff]   ;;  %v4694_v63 = vld [vmem:[#allocation5 + $0x26c] ss:$16 sps:$4 sm:$0xff]  }
 0x4f5   :  { %v3226_v46 = vadd.bf16 %v3222_v3, %v5081_v13  ;;  %v5273_v47 = vmax.bf16 %v4882_v1, %v3225_v27  ;;  %v4683_v13 = vld [vmem:[#allocation7 + $0x70] ss:$8 sps:$4 sm:$0xff]   ;;  %v4695_v3 = vld [vmem:[#allocation7 + $0x40] ss:$8 sps:$4 sm:$0xff]   ;;  %v4698_v35 = vld [vmem:[#allocation5 + $0x24c] ss:$16 sps:$4 sm:$0xff]  }
 0x4f6   :  { %v4697_v27 = vld [vmem:[#allocation5 + $0x268] ss:$16 sps:$4 sm:$0xff]  }
 0x4f7   :  { %3344 = vmatpush2.bf16.msra.mxu1 %v4679_v43  ;;  %v3230_v53 = vmax.bf16 %v4882_v1, %v3226_v46  ;;  %v4699_v59 = vld [vmem:[#allocation7 + $0x30] ss:$8 sps:$4 sm:$0xff]   ;;  %v4700_v46 = vld [vmem:[#allocation7 + $0x24] ss:$8 sps:$4 sm:$0xff]  }
 0x4f8   :  { %3407 = vmatprep.subr.bf16.mxu1 %v4680_v6  ;;  %v4701_v43 = vld [vmem:[#allocation5 + $0x248] ss:$16 sps:$4 sm:$0xff]  }
 0x4f9   :  { %3304 = vmatprep.mubr.bf16.mxu0 %v3230_v53  ;;  %v4703_v6 = vld [vmem:[#allocation7 + $0x20] ss:$8 sps:$4 sm:$0xff]  }
 0x4fa   :  { %3346 = vmatmul.mubr.bf16.vlgmr.msra.gmra.mxu1 %v5264_v60  ;;  %3305 = vmatmul.mubr.bf16.vlgmr.msra.gmra.mxu0 %v5273_v47  ;;  %v4689_v60 = vld [vmem:[#allocation5 + $0x2a8] ss:$16 sps:$4 sm:$0xff]  }
 0x4fb   :  { %3355 = vmatpush1.bf16.msra.mxu0 %v4681_v28  ;;  %3386 = vmatprep.mubr.bf16.mxu0 %v3230_v53  ;;  %v4702_v53 = vld [vmem:[#allocation5 + $0x22c] ss:$16 sps:$4 sm:$0xff]  }
 0x4fc   :  { %3356 = vmatprep.subr.bf16.mxu0 %v4682_v48  ;;  %3408 = vmatpush1.bf16.msra.mxu1 %v4683_v13  ;;  %v4704_v28 = vld [vmem:[#allocation7 + $0x14] ss:$8 sps:$4 sm:$0xff]   ;;  %v4705_v48 = vld [vmem:[#allocation5 + $0x228] ss:$16 sps:$4 sm:$0xff]  }
 0x4fd   :  { %3409 = vmatprep.subr.bf16.mxu1 %v4684_v9  ;;  %v4706_v13 = vld [vmem:[#allocation5 + $0x20c] ss:$16 sps:$4 sm:$0xff]   ;;  %v4707_v9 = vld [vmem:[#allocation7 + $0x10] ss:$8 sps:$4 sm:$0xff]  }
 0x4ff   :  { %3357 = vmatpush1.bf16.msra.mxu0 %v4685_v21  ;;  %v4708_v21 = vld [vmem:[#allocation7 + $0x4] ss:$8 sps:$4 sm:$0xff]  }
 0x500   :  { %3358 = vmatprep.subr.bf16.mxu0 %v4686_v57  ;;  %3410 = vmatpush1.bf16.msra.mxu1 %v4687_v17  ;;  %v4709_v57 = vld [vmem:[#allocation5 + $0x208] ss:$16 sps:$4 sm:$0xff]   ;;  %v4710_v17 = vld [vmem:[#allocation5 + $0x3ec] ss:$16 sps:$4 sm:$0xff]  }
 0x501   :  { %3411 = vmatprep.subr.bf16.mxu1 %v4688_v50  ;;  %v4711_v50 = vld [vmem:[#allocation7] ss:$8 sps:$4 sm:$0xff]  }
 0x503   :  { %3359 = vmatpush1.bf16.msra.mxu0 %v4689_v60  ;;  %v4712_v60 = vld [vmem:[#allocation7 + $0xf4] ss:$8 sps:$4 sm:$0xff]  }
 0x504   :  { %3360 = vmatprep.subr.bf16.mxu0 %v4690_v12  ;;  %3412 = vmatpush1.bf16.msra.mxu1 %v4691_v44  ;;  %v4713_v12 = vld [vmem:[#allocation5 + $0x3e8] ss:$16 sps:$4 sm:$0xff]   ;;  %v4714_v44 = vld [vmem:[#allocation5 + $0x3cc] ss:$16 sps:$4 sm:$0xff]  }
 0x505   :  { %3413 = vmatprep.subr.bf16.mxu1 %v4692_v51  ;;  %v4715_v51 = vld [vmem:[#allocation7 + $0xf0] ss:$8 sps:$4 sm:$0xff]  }
 0x507   :  { %3361 = vmatpush1.bf16.msra.mxu0 %v4693_v54  ;;  %v4716_v54 = vld [vmem:[#allocation7 + $0xe4] ss:$8 sps:$4 sm:$0xff]  }
 0x508   :  { %3362 = vmatprep.subr.bf16.mxu0 %v4694_v63  ;;  %3414 = vmatpush1.bf16.msra.mxu1 %v4695_v3  ;;  %v4717_v63 = vld [vmem:[#allocation5 + $0x3c8] ss:$16 sps:$4 sm:$0xff]   ;;  %v4718_v3 = vld [vmem:[#allocation5 + $0x3ac] ss:$16 sps:$4 sm:$0xff]  }
 0x509   :  { %3415 = vmatprep.subr.bf16.mxu1 %v4696_v16  ;;  %v4719_v16 = vld [vmem:[#allocation7 + $0xe0] ss:$8 sps:$4 sm:$0xff]  }
 0x50b   :  { %3363 = vmatpush1.bf16.msra.mxu0 %v4697_v27  ;;  %v4720_v27 = vld [vmem:[#allocation7 + $0xd4] ss:$8 sps:$4 sm:$0xff]  }
 0x50c   :  { %3364 = vmatprep.subr.bf16.mxu0 %v4698_v35  ;;  %3416 = vmatpush1.bf16.msra.mxu1 %v4699_v59  ;;  %v4721_v35 = vld [vmem:[#allocation5 + $0x3a8] ss:$16 sps:$4 sm:$0xff]   ;;  %v4722_v59 = vld [vmem:[#allocation5 + $0x38c] ss:$16 sps:$4 sm:$0xff]  }
 0x50d   :  { %3417 = vmatprep.subr.bf16.mxu1 %v4700_v46  ;;  %v4723_v46 = vld [vmem:[#allocation7 + $0xd0] ss:$8 sps:$4 sm:$0xff]  }
 0x50f   :  { %3365 = vmatpush1.bf16.msra.mxu0 %v4701_v43  ;;  %v4724_v43 = vld [vmem:[#allocation7 + $0xc4] ss:$8 sps:$4 sm:$0xff]  }
 0x510   :  { %3366 = vmatprep.subr.bf16.mxu0 %v4702_v53  ;;  %3418 = vmatpush1.bf16.msra.mxu1 %v4703_v6  ;;  %v4725_v53 = vld [vmem:[#allocation5 + $0x388] ss:$16 sps:$4 sm:$0xff]   ;;  %v4726_v6 = vld [vmem:[#allocation5 + $0x36c] ss:$16 sps:$4 sm:$0xff]  }
 0x511   :  { %3419 = vmatprep.subr.bf16.mxu1 %v4704_v28  ;;  %v4727_v28 = vld [vmem:[#allocation7 + $0xc0] ss:$8 sps:$4 sm:$0xff]  }
 0x513   :  { %3367 = vmatpush1.bf16.msra.mxu0 %v4705_v48  ;;  %v4728_v48 = vld [vmem:[#allocation7 + $0xb4] ss:$8 sps:$4 sm:$0xff]  }
 0x514   :  { %3368 = vmatprep.subr.bf16.mxu0 %v4706_v13  ;;  %3420 = vmatpush1.bf16.msra.mxu1 %v4707_v9  ;;  %v4729_v13 = vld [vmem:[#allocation5 + $0x368] ss:$16 sps:$4 sm:$0xff]   ;;  %v4730_v9 = vld [vmem:[#allocation5 + $0x34c] ss:$16 sps:$4 sm:$0xff]  }
 0x515   :  { %3421 = vmatprep.subr.bf16.mxu1 %v4708_v21  ;;  %v4731_v21 = vld [vmem:[#allocation7 + $0xb0] ss:$8 sps:$4 sm:$0xff]  }
 0x517   :  { %3369 = vmatpush1.bf16.msra.mxu0 %v4709_v57  ;;  %v4732_v57 = vld [vmem:[#allocation7 + $0xa4] ss:$8 sps:$4 sm:$0xff]  }
 0x518   :  { %3370 = vmatprep.subr.bf16.mxu0 %v4710_v17  ;;  %3422 = vmatpush1.bf16.msra.mxu1 %v4711_v50  ;;  %v4733_v17 = vld [vmem:[#allocation5 + $0x348] ss:$16 sps:$4 sm:$0xff]   ;;  %v4734_v50 = vld [vmem:[#allocation5 + $0x32c] ss:$16 sps:$4 sm:$0xff]  }
 0x519   :  { %3423 = vmatprep.subr.bf16.mxu1 %v4712_v60  ;;  %v4735_v60 = vld [vmem:[#allocation7 + $0xa0] ss:$8 sps:$4 sm:$0xff]  }
 0x51b   :  { %3371 = vmatpush2.bf16.msra.mxu0 %v4713_v12  ;;  %v4736_v12 = vld [vmem:[#allocation7 + $0x94] ss:$8 sps:$4 sm:$0xff]  }
 0x51c   :  { %3372 = vmatprep.subr.bf16.mxu0 %v4714_v44  ;;  %3424 = vmatpush2.bf16.msra.mxu1 %v4715_v51  ;;  %v4737_v44 = vld [vmem:[#allocation5 + $0x328] ss:$16 sps:$4 sm:$0xff]   ;;  %v4738_v51 = vld [vmem:[#allocation5 + $0x30c] ss:$16 sps:$4 sm:$0xff]  }
 0x51d   :  { %3425 = vmatprep.subr.bf16.mxu1 %v4716_v54  ;;  %v4739_v54 = vld [vmem:[#allocation7 + $0x90] ss:$8 sps:$4 sm:$0xff]  }
 0x51f   :  { %3373 = vmatpush2.bf16.msra.mxu0 %v4717_v63  ;;  %v4740_v63 = vld [vmem:[#allocation7 + $0x84] ss:$8 sps:$4 sm:$0xff]  }
 0x520   :  { %3374 = vmatprep.subr.bf16.mxu0 %v4718_v3  ;;  %3426 = vmatpush2.bf16.msra.mxu1 %v4719_v16  ;;  %v4741_v3 = vld [vmem:[#allocation5 + $0x308] ss:$16 sps:$4 sm:$0xff]  }
 0x521   :  { %3427 = vmatprep.subr.bf16.mxu1 %v4720_v27  ;;  %v4742_v16 = vld [vmem:[#allocation7 + $0x80] ss:$8 sps:$4 sm:$0xff]   ;;  %v4743_v27 = vld [vmem:[#allocation7 + $0x174] ss:$8 sps:$4 sm:$0xff]  }
 0x523   :  { %3375 = vmatpush2.bf16.msra.mxu0 %v4721_v35  ;;  %v4744_v35 = vld [vmem:[#allocation7 + $0x170] ss:$8 sps:$4 sm:$0xff]  }
 0x524   :  { %3376 = vmatprep.subr.bf16.mxu0 %v4722_v59  ;;  %3428 = vmatpush2.bf16.msra.mxu1 %v4723_v46  ;;  %v4745_v59 = vld [vmem:[#allocation7 + $0x164] ss:$8 sps:$4 sm:$0xff]   ;;  %v4746_v46 = vld [vmem:[#allocation7 + $0x160] ss:$8 sps:$4 sm:$0xff]  }
 0x525   :  { %3429 = vmatprep.subr.bf16.mxu1 %v4724_v43  ;;  %v4747_v43 = vld [vmem:[#allocation7 + $0x154] ss:$8 sps:$4 sm:$0xff]  }
 0x527   :  { %3377 = vmatpush2.bf16.msra.mxu0 %v4725_v53  ;;  %v4748_v53 = vld [vmem:[#allocation7 + $0x150] ss:$8 sps:$4 sm:$0xff]  }
 0x528   :  { %3378 = vmatprep.subr.bf16.mxu0 %v4726_v6  ;;  %3430 = vmatpush2.bf16.msra.mxu1 %v4727_v28  ;;  %v4749_v6 = vld [vmem:[#allocation7 + $0x144] ss:$8 sps:$4 sm:$0xff]   ;;  %v4750_v28 = vld [vmem:[#allocation7 + $0x140] ss:$8 sps:$4 sm:$0xff]  }
 0x529   :  { %3431 = vmatprep.subr.bf16.mxu1 %v4728_v48  ;;  %v4751_v48 = vld [vmem:[#allocation7 + $0x134] ss:$8 sps:$4 sm:$0xff]  }
 0x52b   :  { %3379 = vmatpush2.bf16.msra.mxu0 %v4729_v13  ;;  %v4752_v13 = vld [vmem:[#allocation7 + $0x130] ss:$8 sps:$4 sm:$0xff]  }
 0x52c   :  { %3380 = vmatprep.subr.bf16.mxu0 %v4730_v9  ;;  %3432 = vmatpush2.bf16.msra.mxu1 %v4731_v21  ;;  %v4755_v9 = vld [vmem:[#allocation7 + $0x114] ss:$8 sps:$4 sm:$0xff]   ;;  %v4756_v21 = vld [vmem:[#allocation7 + $0x110] ss:$8 sps:$4 sm:$0xff]  }
 0x52d   :  { %3433 = vmatprep.subr.bf16.mxu1 %v4732_v57  ;;  %v4757_v57 = vld [vmem:[#allocation7 + $0x104] ss:$8 sps:$4 sm:$0xff]  }
 0x52f   :  { %3381 = vmatpush2.bf16.msra.mxu0 %v4733_v17  ;;  %v4758_v17 = vld [vmem:[#allocation7 + $0x100] ss:$8 sps:$4 sm:$0xff]  }
 0x530   :  { %3382 = vmatprep.subr.bf16.mxu0 %v4734_v50  ;;  %3434 = vmatpush2.bf16.msra.mxu1 %v4735_v60  ;;  %v4759_v50 = vld [vmem:[#allocation7 + $0x1f4] ss:$8 sps:$4 sm:$0xff]   ;;  %v4760_v60 = vld [vmem:[#allocation7 + $0x1f0] ss:$8 sps:$4 sm:$0xff]  }
 0x531   :  { %3435 = vmatprep.subr.bf16.mxu1 %v4736_v12  ;;  %v4761_v12 = vld [vmem:[#allocation7 + $0x1e4] ss:$8 sps:$4 sm:$0xff]  }
 0x533   :  { %3383 = vmatpush2.bf16.msra.mxu0 %v4737_v44  ;;  %v4762_v44 = vld [vmem:[#allocation7 + $0x1e0] ss:$8 sps:$4 sm:$0xff]  }
 0x534   :  { %3384 = vmatprep.subr.bf16.mxu0 %v4738_v51  ;;  %3436 = vmatpush2.bf16.msra.mxu1 %v4739_v54 }
 0x535   :  { %3437 = vmatprep.subr.bf16.mxu1 %v4740_v63 }
 0x537   :  { %3385 = vmatpush2.bf16.msra.mxu0 %v4741_v3 }
 0x538   :  { %3438 = vmatpush2.bf16.msra.mxu1 %v4742_v16  ;;  %3448 = vmatprep.subr.bf16.mxu0 %v4743_v27 }
 0x539   :  { %3915 = vmatprep.subr.bf16.mxu1 %v5159_v56  ;;  %v4753_v56 = vld [vmem:[#allocation7 + $0x124] ss:$8 sps:$4 sm:$0xff]  }
 0x53a   :  { %3387 = vmatmul.mubr.bf16.vlgmr.msra.gmra.mxu0 %v5273_v47  ;;  %v4754_v47 = vld [vmem:[#allocation7 + $0x120] ss:$8 sps:$4 sm:$0xff]  }
 0x53b   :  { %3449 = vmatpush1.bf16.msra.mxu0 %v4744_v35 }
 0x53c   :  { %3450 = vmatprep.subr.bf16.mxu0 %v4745_v59 }
 0x53f   :  { %3451 = vmatpush1.bf16.msra.mxu0 %v4746_v46 }
 0x540   :  { %3452 = vmatprep.subr.bf16.mxu0 %v4747_v43 }
 0x543   :  { %3453 = vmatpush1.bf16.msra.mxu0 %v4748_v53 }
 0x544   :  { %3454 = vmatprep.subr.bf16.mxu0 %v4749_v6 }
 0x547   :  { %3455 = vmatpush1.bf16.msra.mxu0 %v4750_v28 }
 0x548   :  { %3456 = vmatprep.subr.bf16.mxu0 %v4751_v48 }
 0x54b   :  { %3457 = vmatpush1.bf16.msra.mxu0 %v4752_v13 }
 0x54c   :  { %3458 = vmatprep.subr.bf16.mxu0 %v4753_v56 }
 0x54f   :  { %3459 = vmatpush1.bf16.msra.mxu0 %v4754_v47 }
 0x550   :  { %3460 = vmatprep.subr.bf16.mxu0 %v4755_v9 }
 0x553   :  { %3461 = vmatpush1.bf16.msra.mxu0 %v4756_v21 }
 0x554   :  { %3462 = vmatprep.subr.bf16.mxu0 %v4757_v57 }
 0x557   :  { %3463 = vmatpush1.bf16.msra.mxu0 %v4758_v17 }
 0x558   :  { %3464 = vmatprep.subr.bf16.mxu0 %v4759_v50 }
 0x55b   :  { %3465 = vmatpush2.bf16.msra.mxu0 %v4760_v60 }
 0x55c   :  { %3466 = vmatprep.subr.bf16.mxu0 %v4761_v12 }
 0x55f   :  { %3467 = vmatpush2.bf16.msra.mxu0 %v4762_v44 }
 0x560   :  { %3468 = vmatprep.subr.bf16.mxu0 %v5092_v11 }
 0x563   :  { %3469 = vmatpush2.bf16.msra.mxu0 %v5094_v14 }
 0x564   :  { %3470 = vmatprep.subr.bf16.mxu0 %v5097_v15 }
 0x567   :  { %3471 = vmatpush2.bf16.msra.mxu0 %v5100_v19 }
 0x568   :  { %3472 = vmatprep.subr.bf16.mxu0 %v5103_v20 }
 0x56b   :  { %3473 = vmatpush2.bf16.msra.mxu0 %v5106_v22 }
 0x56c   :  { %3474 = vmatprep.subr.bf16.mxu0 %v5109_v0 }
 0x56f   :  { %3475 = vmatpush2.bf16.msra.mxu0 %v5112_v24 }
 0x570   :  { %3476 = vmatprep.subr.bf16.mxu0 %v5116_v26 }
 0x573   :  { %3477 = vmatpush2.bf16.msra.mxu0 %v5118_v37 }
 0x574   :  { %3478 = vmatprep.subr.bf16.mxu0 %v5122_v39 }
 0x577   :  { %3479 = vmatpush2.bf16.msra.mxu0 %v5124_v41 }
 0x57a   :  { %v3265_v11 = vpop.f32.mrf.mxu1 }
 0x57c   :  { %v3267_v14 = vpop.f32.mrf.mxu1 }
 0x57e   :  { %v3269_v15 = vpop.f32.mrf.mxu1 }
 0x580   :  { %v3270_v19 = vpop.f32.mrf.mxu1 }
 0x5ba   :  { %v3347_v51 = vpop.f32.mrf.mxu1  ;;  %v3306_v20 = vpop.f32.mrf.mxu0 }
 0x5bb   :  { %v3307_v54 = vadd.f32 %v3306_v20, %v3265_v11 }
 0x5bc   :  { %v3349_v22 = vpop.f32.mrf.mxu1  ;;  %v3308_v63 = vpop.f32.mrf.mxu0 }
 0x5bd   :  { %v3395_v0 = vpack.c.bf16 %v3307_v54, %v3307_v54  ;;  %v3309_v3 = vadd.f32 %v3308_v63, %v3267_v14 }
 0x5be   :  { %v3351_v24 = vpop.f32.mrf.mxu1  ;;  %v3310_v16 = vpop.f32.mrf.mxu0 }
 0x5bf   :  { %v3396_v26 = vpack.c.bf16 %v3309_v3, %v3309_v3  ;;  %v3399_v37 = vadd.bf16 %v3395_v0, %v5134_v52 }
 0x5c0   :  { %v3352_v27 = vpop.f32.mrf.mxu1  ;;  %v3311_v39 = vpop.f32.mrf.mxu0 }
 0x5c1   :  { %v3400_v41 = vadd.bf16 %v3396_v26, %v5137_v36  ;;  %v3403_v59 = vadd.bf16 %v3399_v37, %v5193_v33 }
 0x5c3   :  { %v3404_v35 = vadd.bf16 %v3400_v41, %v5156_v49 }
 0x5c5   :  { %3439 = vmatprep.mubr.bf16.mxu1 %v3404_v35 }
 0x5c6   :  { %3440 = vmatmul.mubr.bf16.vlgmr.msra.gmra.mxu1 %v3403_v59 }
 0x5c7   :  { %3916 = vmatpush3.bf16.msra.mxu1 %v5161_v58 }
 0x5c8   :  { %3917 = vmatprep.subr.bf16.mxu1 %v5163_v61 }
 0x5cb   :  { %3918 = vmatpush3.bf16.msra.mxu1 %v5167_v2 }
 0x5cc   :  { %3919 = vmatprep.subr.bf16.mxu1 %v5170_v32 }
 0x5cf   :  { %3920 = vmatpush3.bf16.msra.mxu1 %v5173_v34 }
 0x5d0   :  { %3921 = vmatprep.subr.bf16.mxu1 %v5176_v4 }
 0x5d3   :  { %3922 = vmatpush3.bf16.msra.mxu1 %v5179_v7 }
 0x5d4   :  { %3923 = vmatprep.subr.bf16.mxu1 %v5182_v8 }
 0x5d7   :  { %3924 = vmatpush3.bf16.msra.mxu1 %v5185_v29 }
 0x5d8   :  { %3925 = vmatprep.subr.bf16.mxu1 %v5188_v30 }
 0x5db   :  { %3926 = vmatpush3.bf16.msra.mxu1 %v5195_v5 }
 0x5dc   :  { %3927 = vmatprep.subr.bf16.mxu1 %v5200_v23 }
 0x5df   :  { %3928 = vmatpush3.bf16.msra.mxu1 %v5202_v10 }
 0x5e0   :  { %3929 = vmatprep.subr.bf16.mxu1 %v5206_v38 }
 0x5e3   :  { %3930 = vmatpush3.bf16.msra.mxu1 %v5208_v42 }
 0x5fa   :  { %v3388_v52 = vpop.f32.mrf.mxu0 }
 0x5fb   :  { %v3389_v36 = vadd.f32 %v3388_v52, %v3347_v51 }
 0x5fc   :  { %v3390_v49 = vpop.f32.mrf.mxu0 }
 0x5fd   :  { %v3397_v58 = vpack.c.bf16 %v3389_v36, %v3389_v36  ;;  %v3391_v61 = vadd.f32 %v3390_v49, %v3349_v22 }
 0x5fe   :  { %v3392_v2 = vpop.f32.mrf.mxu0 }
 0x5ff   :  { %v3398_v32 = vpack.c.bf16 %v3391_v61, %v3391_v61  ;;  %v3401_v34 = vadd.bf16 %v3397_v58, %v5146_v40 }
 0x600   :  { %v3393_v4 = vpop.f32.mrf.mxu0 }
 0x601   :  { %v3402_v7 = vadd.bf16 %v3398_v32, %v5149_v62  ;;  %v3405_v29 = vadd.bf16 %v3401_v34, %v5243_v45 }
 0x603   :  { %v3406_v8 = vadd.bf16 %v3402_v7, %v5235_v18 }
 0x605   :  { %3480 = vmatprep.mubr.bf16.mxu0 %v3406_v8 }
 0x606   :  { %3481 = vmatmul.mubr.bf16.vlgmr.msra.gmra.mxu0 %v3405_v29 }
 0x686   :  { %v3441_v30 = vpop.f32.mrf.mxu1 }
 0x688   :  { %v3443_v33 = vpop.f32.mrf.mxu1 }
 0x68a   :  { %v3445_v5 = vpop.f32.mrf.mxu1 }
 0x68c   :  { %v3446_v23 = vpop.f32.mrf.mxu1 }
 0x6c6   :  { %v3482_v10 = vpop.f32.mrf.mxu0 }
 0x6c7   :  { %v3483_v38 = vadd.f32 %v3482_v10, %v3441_v30 }
 0x6c8   :  { %v3484_v42 = vpop.f32.mrf.mxu0 }
 0x6c9   :  { %v3489_v46 = vpack.c.bf16 %v3483_v38, %v3483_v38  ;;  %v3485_v43 = vadd.f32 %v3484_v42, %v3443_v33 }
 0x6ca   :  { %v3486_v53 = vpop.f32.mrf.mxu0 }
 0x6cb   :  { %v3490_v40 = vpack.c.bf16 %v3485_v43, %v3485_v43  ;;  %v3491_v6 = vadd.bf16 %v3489_v46, %v5224_v31 }
 0x6cc   :  { %v3487_v62 = vpop.f32.mrf.mxu0 }
 0x6cd   :  { %v3492_v18 = vadd.bf16 %v3490_v40, %v5228_v55  ;;  %v3493_v28 = vmax.bf16 %v4882_v1, %v3491_v6 }
 0x6cf   :  { %v3494_v45 = vmax.bf16 %v4882_v1, %v3492_v18 }
 0x6d1   :  { %3527 = vmatprep.mubr.bf16.mxu1 %v3494_v45 }
 0x6d2   :  { %3528 = vmatmul.mubr.bf16.vlgmr.msra.gmra.mxu1 %v3493_v28 }
 0x792   :  { %v3931_v48 = vpop.f32.mrf.mxu1 }
 0x794   :  { %v3932_v13 = vpop.f32.mrf.mxu1 }
 0x795   :  { %v3933_v56 = vadd.f32 %v3932_v13, %v3931_v48 }
 0x796   :  { %v3934_v47 = vpop.f32.mrf.mxu1 }
 0x797   :  { %v3530_v9 = vadd.f32 %v3933_v56, %v5255_v25 }
 0x798   :  { %v3935_v21 = vpop.f32.mrf.mxu1 }
 0x799   :  { %v3535_v57 = vpack.c.bf16 %v3530_v9, %v3530_v9 }
 0x79b   :  { %3536 = vst [vmem:[#allocation10 + $0x4] sm:$0xf] %v3535_v57 }
 0x79c   :  { %4854 = shalt.err (!%p4851_p10)
}
 0x79d   :  { %3548 = dma.vmem_to_hbm [thread:$0]  %s3543_s30, 128, %s5336_s11, [#allocation4], %s4879_s18, %s4879_s18, %s4880_s19  }
 0x79e   :  { %4869 = dma.done.wait [#allocation4], 128  }
 0x79f   :  { %4870 = vsyncadd [#allocation4], 4294967168 }
 0x7a0   :  { %3552 = vsyncpa [#allocation3], 1 }
 0x7a1   :  { %3553 = vsyncpa [#allocation6], 1 }
 0x7a2   :  { %3554 = vsyncpa [#allocation9], 1 }
 0x7a3   :  { %3555 = vsyncpa [#allocation4], 1 }

</bundles_post_ra>
